<compile_context>
chip_gen: v6e
topology: v6e:2x2x1
jax: 0.10.0
libtpu: 0.0.40
codegen_flags: <defaults>
</compile_context>

<pallas_src>
import functools
import math

import jax
import jax.numpy as jnp
from jax.experimental import pallas as pl
from jax.experimental.pallas import tpu as pltpu


# ---------------------------------------------------------------------------
# Fused LeNet kernel: one grid step == G images stacked along the M axis.
# ---------------------------------------------------------------------------
def _lenet_kernel(xb_ref, w1_ref, cb1_ref, pr1_ref, lsel_ref,
                  band2_ref, cb2_ref, p2l_ref,
                  wfc1_ref, bfc1_ref, wfc2_ref, bfc2_ref, wfc3_ref, bfc3_ref,
                  out_ref, *, G):
    f32, bf16 = jnp.float32, jnp.bfloat16
    GT = G * 10

    # --- Conv2d(1, 6, k=5, pad=2) + Sigmoid: ONE (G*28,160)x(160,168) matmul.
    h1 = jax.nn.sigmoid(
        jnp.dot(xb_ref[...], w1_ref[...], preferred_element_type=f32)
        + cb1_ref[...])                                            # (G*28, 168)

    # --- AvgPool1 over columns (0.25 folded into pr1): lane c*28+x -> c*14+x.
    hl = jnp.dot(h1.astype(bf16), pr1_ref[...],
                 preferred_element_type=f32)                       # (G*28, 84)

    # --- AvgPool1 over rows + conv2 band/row selection, fused in one
    #     block-diagonal matmul.  Row i*G*10 + g*10 + r of lhs2 is the fully
    #     pooled row (r+i) of image g.
    lhs2 = jnp.dot(lsel_ref[...], hl.astype(bf16),
                   preferred_element_type=f32)                     # (5*G*10, 84)

    # --- Conv2d(6, 16, k=5, valid) + Sigmoid: 5 banded matmuls on aligned
    #     static slices (offsets are multiples of G*10 = 80 -> sublane-aligned).
    acc2 = jnp.dot(lhs2[0:GT].astype(bf16), band2_ref[0],
                   preferred_element_type=f32)
    for i in range(1, 5):
        acc2 += jnp.dot(lhs2[i * GT:(i + 1) * GT].astype(bf16), band2_ref[i],
                        preferred_element_type=f32)
    h2 = jax.nn.sigmoid(acc2 + cb2_ref[...])                       # (G*10, 160)

    # --- AvgPool2 over rows (output rows y-major: row = y*G + g).  The column
    #     pooling and the NCHW flatten are folded into wfc1.
    prows = jnp.dot(p2l_ref[...], h2.astype(bf16),
                    preferred_element_type=f32)                    # (5*G, 160)

    # --- Linear(400,120) + Sigmoid: 5 (G,160)x(160,120) matmuls, aligned slices.
    f = jnp.dot(prows[0:G].astype(bf16), wfc1_ref[0],
                preferred_element_type=f32)
    for y in range(1, 5):
        f += jnp.dot(prows[y * G:(y + 1) * G].astype(bf16), wfc1_ref[y],
                     preferred_element_type=f32)
    f = jax.nn.sigmoid(f + bfc1_ref[...])                          # (G, 120)

    # --- Linear(120,84)+Sigmoid, Linear(84,10 padded to 128) + log_softmax.
    f = jax.nn.sigmoid(jnp.dot(f.astype(bf16), wfc2_ref[...],
                               preferred_element_type=f32) + bfc2_ref[...])
    logits = jnp.dot(f.astype(bf16), wfc3_ref[...],
                     preferred_element_type=f32) + bfc3_ref[...]   # (G, 128)

    s = logits - jnp.max(logits, axis=-1, keepdims=True)
    out_ref[...] = s - jnp.log(jnp.sum(jnp.exp(s), axis=-1, keepdims=True))


# ---------------------------------------------------------------------------
# Wrapper-side weight preprocessing (tiny, weight-only; no data expansion).
# ---------------------------------------------------------------------------
def _prep_weights(params, G):
    f32, bf16 = jnp.float32, jnp.bfloat16

    # conv1 band matrix, merged over bands: W1[i*32 + (x+j), c*28 + x] = w1[c,i,j]
    w1 = params["conv1_w"].astype(f32)[:, 0]                       # (6, 5, 5) c,i,j
    shift1 = jnp.stack(
        [(jnp.arange(32)[:, None] == jnp.arange(28)[None, :] + j).astype(f32)
         for j in range(5)], axis=0)                               # (5, 32, 28) j,k,x
    band1 = jnp.einsum("jrx,cij->ircx", shift1, w1).reshape(5, 32, 6 * 28)
    W1 = band1.reshape(5 * 32, 6 * 28)                             # (160, 168)
    cb1 = jnp.repeat(params["conv1_b"].astype(f32), 28).reshape(1, 168)

    # avgpool1 column matmul (0.25 folded): pr1[c*28+xx, c*14+x] = 0.25, xx//2 == x
    pcol1 = (jnp.arange(28)[:, None] // 2
             == jnp.arange(14)[None, :]).astype(f32)               # (28, 14)
    pr1 = 0.25 * jnp.einsum("ab,xy->axby", jnp.eye(6, dtype=f32),
                            pcol1).reshape(6 * 28, 6 * 14)         # (168, 84)

    # avgpool1 row-sum + conv2 band select:
    # Lsel[i*G*10 + g*10 + r, g*28 + c28] = 1  iff  c28 // 2 == r + i
    rpi = jnp.broadcast_to(jnp.arange(5)[:, None, None]
                           + jnp.arange(10)[None, None, :], (5, G, 10))
    gg = jnp.broadcast_to(jnp.arange(G)[None, :, None], (5, G, 10))
    col = jnp.arange(G * 28)
    lsel = ((col[None, None, None, :] // 28 == gg[..., None])
            & ((col[None, None, None, :] % 28) // 2 == rpi[..., None]))
    lsel = lsel.astype(f32).reshape(5 * G * 10, G * 28)

    # conv2 band matrices: band2[i][c*14 + (x+j), d*10 + x] = w2[d,c,i,j]
    w2 = params["conv2_w"].astype(f32)                             # (16, 6, 5, 5)
    shift2 = jnp.stack(
        [(jnp.arange(14)[:, None] == jnp.arange(10)[None, :] + j).astype(f32)
         for j in range(5)], axis=0)                               # (5, 14, 10)
    band2 = jnp.einsum("jrx,dcij->icrdx", shift2, w2).reshape(5, 6 * 14, 16 * 10)
    cb2 = jnp.repeat(params["conv2_b"].astype(f32), 10).reshape(1, 160)

    # avgpool2 row-sum, y-major output rows: P2L[y*G + g, g*10 + c10] = 1, c10//2 == y
    yy = jnp.broadcast_to(jnp.arange(5)[:, None], (5, G))
    gg2 = jnp.broadcast_to(jnp.arange(G)[None, :], (5, G))
    col2 = jnp.arange(G * 10)
    p2l = ((col2[None, None, :] // 10 == gg2[..., None])
           & ((col2[None, None, :] % 10) // 2 == yy[..., None]))
    p2l = p2l.astype(f32).reshape(5 * G, G * 10)

    # fc1 with avgpool2-column pooling (0.25) + NCHW flatten folded in:
    # wfc1_fold[y, d*10 + xx, n] = 0.25 * fc1_w[n, d*25 + y*5 + xx//2]
    wfc1 = params["fc1_w"].astype(f32).reshape(120, 16, 5, 5)      # (n, d, y, x)
    expand = (jnp.arange(10)[:, None] // 2
              == jnp.arange(5)[None, :]).astype(f32)               # (10, 5) xx,x
    wfc1_fold = 0.25 * jnp.einsum("ndyx,wx->ydwn", wfc1, expand)   # (5, 16, 10, 120)
    wfc1_fold = wfc1_fold.reshape(5, 160, 120)
    bfc1 = params["fc1_b"].astype(f32).reshape(1, 120)

    wfc2 = params["fc2_w"].astype(f32).T                           # (120, 84)
    bfc2 = params["fc2_b"].astype(f32).reshape(1, 84)

    # fc3 padded to 128 lanes (lane-dense output); padded biases = -1e30 so the
    # in-kernel log_softmax over 128 lanes is unaffected.
    wfc3 = jnp.zeros((84, 128), f32).at[:, :10].set(params["fc3_w"].astype(f32).T)
    bfc3 = jnp.full((1, 128), -1e30, f32).at[0, :10].set(params["fc3_b"].astype(f32))

    return (W1.astype(bf16), cb1, pr1.astype(bf16), lsel.astype(bf16),
            band2.astype(bf16), cb2, p2l.astype(bf16),
            wfc1_fold.astype(bf16), bfc1, wfc2.astype(bf16), bfc2,
            wfc3.astype(bf16), bfc3)


def lenet_forward(x_nchw, params, *, G=8):
    # G must be a multiple of 8 so every in-kernel slice / output block is
    # sublane-aligned.  G=8 -> conv1 M=224 (good v6e/v7x MXU fill); keep >= 2
    # grid steps on v7x so both TensorCores are used.
    assert G % 8 == 0
    B = x_nchw.shape[0]
    Bp = ((B + G - 1) // G) * G

    x = x_nchw.astype(jnp.float32)[:, 0]                           # (B, 28, 28)
    if Bp != B:
        x = jnp.pad(x, ((0, Bp - B), (0, 0), (0, 0)))
    xpad = jnp.pad(x, ((0, 0), (2, 2), (2, 2)))                    # (Bp, 32, 32)

    # Row-banded bf16 conv1 LHS: xband[b*28 + r, i*32 + k] = xpad[b, r+i, k].
    ridx = jnp.arange(28)[:, None] + jnp.arange(5)[None, :]        # (28, 5)
    xband = xpad[:, ridx, :].reshape(Bp * 28, 5 * 32).astype(jnp.bfloat16)

    weights = _prep_weights(params, G)

    def _const_spec(w):
        if w.ndim == 3:
            return pl.BlockSpec(w.shape, lambda b: (0, 0, 0))
        return pl.BlockSpec(w.shape, lambda b: (0, 0))

    w_specs = [_const_spec(w) for w in weights]

    out = pl.pallas_call(
        functools.partial(_lenet_kernel, G=G),
        out_shape=jax.ShapeDtypeStruct((Bp, 128), jnp.float32),
        grid=(Bp // G,),
        in_specs=[pl.BlockSpec((G * 28, 160), lambda b: (b, 0))] + w_specs,
        out_specs=pl.BlockSpec((G, 128), lambda b: (b, 0)),
        compiler_params=pltpu.CompilerParams(
            dimension_semantics=("parallel",)),
    )(xband, *weights)

    return out[:B, :10]


# ---------------------------------------------------------------------------
# Parameter init (matches PyTorch defaults) and plain-JAX reference.
# ---------------------------------------------------------------------------
def init_params(key):
    def uinit(k, shape, fan_in):
        bound = 1.0 / math.sqrt(fan_in)
        return jax.random.uniform(k, shape, jnp.float32, -bound, bound)

    ks = jax.random.split(key, 10)
    return {
        "conv1_w": uinit(ks[0], (6, 1, 5, 5), 1 * 5 * 5),
        "conv1_b": uinit(ks[1], (6,), 1 * 5 * 5),
        "conv2_w": uinit(ks[2], (16, 6, 5, 5), 6 * 5 * 5),
        "conv2_b": uinit(ks[3], (16,), 6 * 5 * 5),
        "fc1_w": uinit(ks[4], (120, 400), 400),
        "fc1_b": uinit(ks[5], (120,), 400),
        "fc2_w": uinit(ks[6], (84, 120), 120),
        "fc2_b": uinit(ks[7], (84,), 120),
        "fc3_w": uinit(ks[8], (10, 84), 84),
        "fc3_b": uinit(ks[9], (10,), 84),
    }


def lenet_reference(x_nchw, params):
    dn = ("NCHW", "OIHW", "NCHW")
    B = x_nchw.shape[0]
    y = jax.lax.conv_general_dilated(
        x_nchw.astype(jnp.float32), params["conv1_w"], (1, 1),
        ((2, 2), (2, 2)), dimension_numbers=dn)
    y = jax.nn.sigmoid(y + params["conv1_b"][None, :, None, None])
    y = y.reshape(B, 6, 14, 2, 14, 2).mean(axis=(3, 5))
    y = jax.lax.conv_general_dilated(y, params["conv2_w"], (1, 1),
                                     ((0, 0), (0, 0)), dimension_numbers=dn)
    y = jax.nn.sigmoid(y + params["conv2_b"][None, :, None, None])
    y = y.reshape(B, 16, 5, 2, 5, 2).mean(axis=(3, 5))
    y = y.reshape(B, 400)
    y = jax.nn.sigmoid(y @ params["fc1_w"].T + params["fc1_b"])
    y = jax.nn.sigmoid(y @ params["fc2_w"].T + params["fc2_b"])
    y = y @ params["fc3_w"].T + params["fc3_b"]
    return jax.nn.log_softmax(y, axis=-1)


if __name__ == "__main__":
    key = jax.random.PRNGKey(0)
    k_param, k_x = jax.random.split(key)
    params = init_params(k_param)
    # B=10: exercises batch padding (10 -> 16) and a 2-step grid with G=8.
    x = jax.random.normal(k_x, (10, 1, 28, 28), dtype=jnp.float32)

    out = jax.jit(lenet_forward)(x, params)
    out = jax.block_until_ready(out)

    assert out.shape == (10, 10)
    # log_softmax rows must exponentiate-sum to ~1 (computed in f32 in-kernel).
    assert bool(jnp.allclose(jnp.sum(jnp.exp(out), axis=1), 1.0, atol=1e-4))
    # Match the plain-JAX/XLA reference (bf16 MXU operands -> loose tolerance).
    ref = lenet_reference(x, params)
    assert bool(jnp.allclose(out, ref, atol=5e-2)), \
        float(jnp.max(jnp.abs(out - ref)))
    print("KERNEL_OK")
</pallas_src>

<mosaic_0001>
module attributes {stable_mosaic.version = 11 : i64} {
  func.func @_lenet_kernel(%arg0: i32, %arg1: memref<224x160xbf16, #tpu.memory_space<vmem>>, %arg2: memref<160x168xbf16, #tpu.memory_space<vmem>>, %arg3: memref<1x168xf32, #tpu.memory_space<vmem>>, %arg4: memref<168x84xbf16, #tpu.memory_space<vmem>>, %arg5: memref<400x224xbf16, #tpu.memory_space<vmem>>, %arg6: memref<5x84x160xbf16, #tpu.memory_space<vmem>>, %arg7: memref<1x160xf32, #tpu.memory_space<vmem>>, %arg8: memref<40x80xbf16, #tpu.memory_space<vmem>>, %arg9: memref<5x160x120xbf16, #tpu.memory_space<vmem>>, %arg10: memref<1x120xf32, #tpu.memory_space<vmem>>, %arg11: memref<120x84xbf16, #tpu.memory_space<vmem>>, %arg12: memref<1x84xf32, #tpu.memory_space<vmem>>, %arg13: memref<84x128xbf16, #tpu.memory_space<vmem>>, %arg14: memref<1x128xf32, #tpu.memory_space<vmem>>, %arg15: memref<8x128xf32, #tpu.memory_space<vmem>>) attributes {dimension_semantics = [#tpu.dimension_semantics<parallel>], iteration_bounds = array<i64: 2>, scalar_prefetch = 0 : i64, scratch_operands = 0 : i64, tpu.core_type = #tpu.core_type<tc>, window_params = [{transform_indices = @transform_0, window_bounds = array<i64: 224, 160>}, {pipeline_mode = #tpu.pipeline_mode<synchronous>, transform_indices = @transform_1, window_bounds = array<i64: 160, 168>}, {pipeline_mode = #tpu.pipeline_mode<synchronous>, transform_indices = @transform_2, window_bounds = array<i64: 1, 168>}, {pipeline_mode = #tpu.pipeline_mode<synchronous>, transform_indices = @transform_3, window_bounds = array<i64: 168, 84>}, {pipeline_mode = #tpu.pipeline_mode<synchronous>, transform_indices = @transform_4, window_bounds = array<i64: 400, 224>}, {pipeline_mode = #tpu.pipeline_mode<synchronous>, transform_indices = @transform_5, window_bounds = array<i64: 5, 84, 160>}, {pipeline_mode = #tpu.pipeline_mode<synchronous>, transform_indices = @transform_6, window_bounds = array<i64: 1, 160>}, {pipeline_mode = #tpu.pipeline_mode<synchronous>, transform_indices = @transform_7, window_bounds = array<i64: 40, 80>}, {pipeline_mode = #tpu.pipeline_mode<synchronous>, transform_indices = @transform_8, window_bounds = array<i64: 5, 160, 120>}, {pipeline_mode = #tpu.pipeline_mode<synchronous>, transform_indices = @transform_9, window_bounds = array<i64: 1, 120>}, {pipeline_mode = #tpu.pipeline_mode<synchronous>, transform_indices = @transform_10, window_bounds = array<i64: 120, 84>}, {pipeline_mode = #tpu.pipeline_mode<synchronous>, transform_indices = @transform_11, window_bounds = array<i64: 1, 84>}, {pipeline_mode = #tpu.pipeline_mode<synchronous>, transform_indices = @transform_12, window_bounds = array<i64: 84, 128>}, {pipeline_mode = #tpu.pipeline_mode<synchronous>, transform_indices = @transform_13, window_bounds = array<i64: 1, 128>}, {transform_indices = @transform_14, window_bounds = array<i64: 8, 128>}]} {
    %c0 = arith.constant 0 : index
    %c0_0 = arith.constant 0 : index
    %0 = vector.load %arg1[%c0, %c0_0] : memref<224x160xbf16, #tpu.memory_space<vmem>>, vector<224x160xbf16>
    %c0_1 = arith.constant 0 : index
    %c0_2 = arith.constant 0 : index
    %1 = vector.load %arg2[%c0_1, %c0_2] : memref<160x168xbf16, #tpu.memory_space<vmem>>, vector<160x168xbf16>
    %cst = arith.constant dense<0.000000e+00> : vector<224x168xf32>
    %2 = tpu.matmul %0, %1, %cst {dimension_numbers = #tpu.dot_dimension_numbers<[1], [0], [0], [1], [0, 0, 1, 1], [], []>} : vector<224x160xbf16>, vector<160x168xbf16>, vector<224x168xf32> -> vector<224x168xf32>
    %c0_3 = arith.constant 0 : index
    %c0_4 = arith.constant 0 : index
    %3 = vector.load %arg3[%c0_3, %c0_4] : memref<1x168xf32, #tpu.memory_space<vmem>>, vector<1x168xf32>
    %4 = vector.broadcast %3 : vector<1x168xf32> to vector<224x168xf32>
    %5 = arith.addf %2, %4 : vector<224x168xf32>
    %6 = arith.negf %5 : vector<224x168xf32>
    %7 = math.exp %6 : vector<224x168xf32>
    %cst_5 = arith.constant 1.000000e+00 : f32
    %8 = vector.broadcast %cst_5 : f32 to vector<224x168xf32>
    %9 = arith.addf %8, %7 : vector<224x168xf32>
    %10 = arith.divf %8, %9 : vector<224x168xf32>
    %11 = arith.truncf %10 : vector<224x168xf32> to vector<224x168xbf16>
    %c0_6 = arith.constant 0 : index
    %c0_7 = arith.constant 0 : index
    %12 = vector.load %arg4[%c0_6, %c0_7] : memref<168x84xbf16, #tpu.memory_space<vmem>>, vector<168x84xbf16>
    %cst_8 = arith.constant dense<0.000000e+00> : vector<224x84xf32>
    %13 = tpu.matmul %11, %12, %cst_8 {dimension_numbers = #tpu.dot_dimension_numbers<[1], [0], [0], [1], [0, 0, 1, 1], [], []>} : vector<224x168xbf16>, vector<168x84xbf16>, vector<224x84xf32> -> vector<224x84xf32>
    %c0_9 = arith.constant 0 : index
    %c0_10 = arith.constant 0 : index
    %14 = vector.load %arg5[%c0_9, %c0_10] : memref<400x224xbf16, #tpu.memory_space<vmem>>, vector<400x224xbf16>
    %15 = arith.truncf %13 : vector<224x84xf32> to vector<224x84xbf16>
    %cst_11 = arith.constant dense<0.000000e+00> : vector<400x84xf32>
    %16 = tpu.matmul %14, %15, %cst_11 {dimension_numbers = #tpu.dot_dimension_numbers<[1], [0], [0], [1], [0, 0, 1, 1], [], []>} : vector<400x224xbf16>, vector<224x84xbf16>, vector<400x84xf32> -> vector<400x84xf32>
    %17 = vector.extract_strided_slice %16 {offsets = [0, 0], sizes = [80, 84], strides = [1, 1]} : vector<400x84xf32> to vector<80x84xf32>
    %18 = arith.truncf %17 : vector<80x84xf32> to vector<80x84xbf16>
    %c0_12 = arith.constant 0 : index
    %c0_13 = arith.constant 0 : index
    %c0_14 = arith.constant 0 : index
    %19 = vector.load %arg6[%c0_12, %c0_13, %c0_14] : memref<5x84x160xbf16, #tpu.memory_space<vmem>>, vector<1x84x160xbf16>
    %20 = vector.shape_cast %19 : vector<1x84x160xbf16> to vector<84x160xbf16>
    %cst_15 = arith.constant dense<0.000000e+00> : vector<80x160xf32>
    %21 = tpu.matmul %18, %20, %cst_15 {dimension_numbers = #tpu.dot_dimension_numbers<[1], [0], [0], [1], [0, 0, 1, 1], [], []>} : vector<80x84xbf16>, vector<84x160xbf16>, vector<80x160xf32> -> vector<80x160xf32>
    %22 = vector.extract_strided_slice %16 {offsets = [80, 0], sizes = [80, 84], strides = [1, 1]} : vector<400x84xf32> to vector<80x84xf32>
    %23 = arith.truncf %22 : vector<80x84xf32> to vector<80x84xbf16>
    %c1 = arith.constant 1 : index
    %c0_16 = arith.constant 0 : index
    %c0_17 = arith.constant 0 : index
    %24 = vector.load %arg6[%c1, %c0_16, %c0_17] : memref<5x84x160xbf16, #tpu.memory_space<vmem>>, vector<1x84x160xbf16>
    %25 = vector.shape_cast %24 : vector<1x84x160xbf16> to vector<84x160xbf16>
    %cst_18 = arith.constant dense<0.000000e+00> : vector<80x160xf32>
    %26 = tpu.matmul %23, %25, %cst_18 {dimension_numbers = #tpu.dot_dimension_numbers<[1], [0], [0], [1], [0, 0, 1, 1], [], []>} : vector<80x84xbf16>, vector<84x160xbf16>, vector<80x160xf32> -> vector<80x160xf32>
    %27 = arith.addf %21, %26 : vector<80x160xf32>
    %28 = vector.extract_strided_slice %16 {offsets = [160, 0], sizes = [80, 84], strides = [1, 1]} : vector<400x84xf32> to vector<80x84xf32>
    %29 = arith.truncf %28 : vector<80x84xf32> to vector<80x84xbf16>
    %c2 = arith.constant 2 : index
    %c0_19 = arith.constant 0 : index
    %c0_20 = arith.constant 0 : index
    %30 = vector.load %arg6[%c2, %c0_19, %c0_20] : memref<5x84x160xbf16, #tpu.memory_space<vmem>>, vector<1x84x160xbf16>
    %31 = vector.shape_cast %30 : vector<1x84x160xbf16> to vector<84x160xbf16>
    %cst_21 = arith.constant dense<0.000000e+00> : vector<80x160xf32>
    %32 = tpu.matmul %29, %31, %cst_21 {dimension_numbers = #tpu.dot_dimension_numbers<[1], [0], [0], [1], [0, 0, 1, 1], [], []>} : vector<80x84xbf16>, vector<84x160xbf16>, vector<80x160xf32> -> vector<80x160xf32>
    %33 = arith.addf %27, %32 : vector<80x160xf32>
    %34 = vector.extract_strided_slice %16 {offsets = [240, 0], sizes = [80, 84], strides = [1, 1]} : vector<400x84xf32> to vector<80x84xf32>
    %35 = arith.truncf %34 : vector<80x84xf32> to vector<80x84xbf16>
    %c3 = arith.constant 3 : index
    %c0_22 = arith.constant 0 : index
    %c0_23 = arith.constant 0 : index
    %36 = vector.load %arg6[%c3, %c0_22, %c0_23] : memref<5x84x160xbf16, #tpu.memory_space<vmem>>, vector<1x84x160xbf16>
    %37 = vector.shape_cast %36 : vector<1x84x160xbf16> to vector<84x160xbf16>
    %cst_24 = arith.constant dense<0.000000e+00> : vector<80x160xf32>
    %38 = tpu.matmul %35, %37, %cst_24 {dimension_numbers = #tpu.dot_dimension_numbers<[1], [0], [0], [1], [0, 0, 1, 1], [], []>} : vector<80x84xbf16>, vector<84x160xbf16>, vector<80x160xf32> -> vector<80x160xf32>
    %39 = arith.addf %33, %38 : vector<80x160xf32>
    %40 = vector.extract_strided_slice %16 {offsets = [320, 0], sizes = [80, 84], strides = [1, 1]} : vector<400x84xf32> to vector<80x84xf32>
    %41 = arith.truncf %40 : vector<80x84xf32> to vector<80x84xbf16>
    %c4 = arith.constant 4 : index
    %c0_25 = arith.constant 0 : index
    %c0_26 = arith.constant 0 : index
    %42 = vector.load %arg6[%c4, %c0_25, %c0_26] : memref<5x84x160xbf16, #tpu.memory_space<vmem>>, vector<1x84x160xbf16>
    %43 = vector.shape_cast %42 : vector<1x84x160xbf16> to vector<84x160xbf16>
    %cst_27 = arith.constant dense<0.000000e+00> : vector<80x160xf32>
    %44 = tpu.matmul %41, %43, %cst_27 {dimension_numbers = #tpu.dot_dimension_numbers<[1], [0], [0], [1], [0, 0, 1, 1], [], []>} : vector<80x84xbf16>, vector<84x160xbf16>, vector<80x160xf32> -> vector<80x160xf32>
    %45 = arith.addf %39, %44 : vector<80x160xf32>
    %c0_28 = arith.constant 0 : index
    %c0_29 = arith.constant 0 : index
    %46 = vector.load %arg7[%c0_28, %c0_29] : memref<1x160xf32, #tpu.memory_space<vmem>>, vector<1x160xf32>
    %47 = vector.broadcast %46 : vector<1x160xf32> to vector<80x160xf32>
    %48 = arith.addf %45, %47 : vector<80x160xf32>
    %49 = arith.negf %48 : vector<80x160xf32>
    %50 = math.exp %49 : vector<80x160xf32>
    %cst_30 = arith.constant 1.000000e+00 : f32
    %51 = vector.broadcast %cst_30 : f32 to vector<80x160xf32>
    %52 = arith.addf %51, %50 : vector<80x160xf32>
    %53 = arith.divf %51, %52 : vector<80x160xf32>
    %c0_31 = arith.constant 0 : index
    %c0_32 = arith.constant 0 : index
    %54 = vector.load %arg8[%c0_31, %c0_32] : memref<40x80xbf16, #tpu.memory_space<vmem>>, vector<40x80xbf16>
    %55 = arith.truncf %53 : vector<80x160xf32> to vector<80x160xbf16>
    %cst_33 = arith.constant dense<0.000000e+00> : vector<40x160xf32>
    %56 = tpu.matmul %54, %55, %cst_33 {dimension_numbers = #tpu.dot_dimension_numbers<[1], [0], [0], [1], [0, 0, 1, 1], [], []>} : vector<40x80xbf16>, vector<80x160xbf16>, vector<40x160xf32> -> vector<40x160xf32>
    %57 = vector.extract_strided_slice %56 {offsets = [0, 0], sizes = [8, 160], strides = [1, 1]} : vector<40x160xf32> to vector<8x160xf32>
    %58 = arith.truncf %57 : vector<8x160xf32> to vector<8x160xbf16>
    %c0_34 = arith.constant 0 : index
    %c0_35 = arith.constant 0 : index
    %c0_36 = arith.constant 0 : index
    %59 = vector.load %arg9[%c0_34, %c0_35, %c0_36] : memref<5x160x120xbf16, #tpu.memory_space<vmem>>, vector<1x160x120xbf16>
    %60 = vector.shape_cast %59 : vector<1x160x120xbf16> to vector<160x120xbf16>
    %cst_37 = arith.constant dense<0.000000e+00> : vector<8x120xf32>
    %61 = tpu.matmul %58, %60, %cst_37 {dimension_numbers = #tpu.dot_dimension_numbers<[1], [0], [0], [1], [0, 0, 1, 1], [], []>} : vector<8x160xbf16>, vector<160x120xbf16>, vector<8x120xf32> -> vector<8x120xf32>
    %62 = vector.extract_strided_slice %56 {offsets = [8, 0], sizes = [8, 160], strides = [1, 1]} : vector<40x160xf32> to vector<8x160xf32>
    %63 = arith.truncf %62 : vector<8x160xf32> to vector<8x160xbf16>
    %c1_38 = arith.constant 1 : index
    %c0_39 = arith.constant 0 : index
    %c0_40 = arith.constant 0 : index
    %64 = vector.load %arg9[%c1_38, %c0_39, %c0_40] : memref<5x160x120xbf16, #tpu.memory_space<vmem>>, vector<1x160x120xbf16>
    %65 = vector.shape_cast %64 : vector<1x160x120xbf16> to vector<160x120xbf16>
    %cst_41 = arith.constant dense<0.000000e+00> : vector<8x120xf32>
    %66 = tpu.matmul %63, %65, %cst_41 {dimension_numbers = #tpu.dot_dimension_numbers<[1], [0], [0], [1], [0, 0, 1, 1], [], []>} : vector<8x160xbf16>, vector<160x120xbf16>, vector<8x120xf32> -> vector<8x120xf32>
    %67 = arith.addf %61, %66 : vector<8x120xf32>
    %68 = vector.extract_strided_slice %56 {offsets = [16, 0], sizes = [8, 160], strides = [1, 1]} : vector<40x160xf32> to vector<8x160xf32>
    %69 = arith.truncf %68 : vector<8x160xf32> to vector<8x160xbf16>
    %c2_42 = arith.constant 2 : index
    %c0_43 = arith.constant 0 : index
    %c0_44 = arith.constant 0 : index
    %70 = vector.load %arg9[%c2_42, %c0_43, %c0_44] : memref<5x160x120xbf16, #tpu.memory_space<vmem>>, vector<1x160x120xbf16>
    %71 = vector.shape_cast %70 : vector<1x160x120xbf16> to vector<160x120xbf16>
    %cst_45 = arith.constant dense<0.000000e+00> : vector<8x120xf32>
    %72 = tpu.matmul %69, %71, %cst_45 {dimension_numbers = #tpu.dot_dimension_numbers<[1], [0], [0], [1], [0, 0, 1, 1], [], []>} : vector<8x160xbf16>, vector<160x120xbf16>, vector<8x120xf32> -> vector<8x120xf32>
    %73 = arith.addf %67, %72 : vector<8x120xf32>
    %74 = vector.extract_strided_slice %56 {offsets = [24, 0], sizes = [8, 160], strides = [1, 1]} : vector<40x160xf32> to vector<8x160xf32>
    %75 = arith.truncf %74 : vector<8x160xf32> to vector<8x160xbf16>
    %c3_46 = arith.constant 3 : index
    %c0_47 = arith.constant 0 : index
    %c0_48 = arith.constant 0 : index
    %76 = vector.load %arg9[%c3_46, %c0_47, %c0_48] : memref<5x160x120xbf16, #tpu.memory_space<vmem>>, vector<1x160x120xbf16>
    %77 = vector.shape_cast %76 : vector<1x160x120xbf16> to vector<160x120xbf16>
    %cst_49 = arith.constant dense<0.000000e+00> : vector<8x120xf32>
    %78 = tpu.matmul %75, %77, %cst_49 {dimension_numbers = #tpu.dot_dimension_numbers<[1], [0], [0], [1], [0, 0, 1, 1], [], []>} : vector<8x160xbf16>, vector<160x120xbf16>, vector<8x120xf32> -> vector<8x120xf32>
    %79 = arith.addf %73, %78 : vector<8x120xf32>
    %80 = vector.extract_strided_slice %56 {offsets = [32, 0], sizes = [8, 160], strides = [1, 1]} : vector<40x160xf32> to vector<8x160xf32>
    %81 = arith.truncf %80 : vector<8x160xf32> to vector<8x160xbf16>
    %c4_50 = arith.constant 4 : index
    %c0_51 = arith.constant 0 : index
    %c0_52 = arith.constant 0 : index
    %82 = vector.load %arg9[%c4_50, %c0_51, %c0_52] : memref<5x160x120xbf16, #tpu.memory_space<vmem>>, vector<1x160x120xbf16>
    %83 = vector.shape_cast %82 : vector<1x160x120xbf16> to vector<160x120xbf16>
    %cst_53 = arith.constant dense<0.000000e+00> : vector<8x120xf32>
    %84 = tpu.matmul %81, %83, %cst_53 {dimension_numbers = #tpu.dot_dimension_numbers<[1], [0], [0], [1], [0, 0, 1, 1], [], []>} : vector<8x160xbf16>, vector<160x120xbf16>, vector<8x120xf32> -> vector<8x120xf32>
    %85 = arith.addf %79, %84 : vector<8x120xf32>
    %c0_54 = arith.constant 0 : index
    %c0_55 = arith.constant 0 : index
    %86 = vector.load %arg10[%c0_54, %c0_55] : memref<1x120xf32, #tpu.memory_space<vmem>>, vector<1x120xf32>
    %87 = vector.broadcast %86 : vector<1x120xf32> to vector<8x120xf32>
    %88 = arith.addf %85, %87 : vector<8x120xf32>
    %89 = arith.negf %88 : vector<8x120xf32>
    %90 = math.exp %89 : vector<8x120xf32>
    %cst_56 = arith.constant 1.000000e+00 : f32
    %91 = vector.broadcast %cst_56 : f32 to vector<8x120xf32>
    %92 = arith.addf %91, %90 : vector<8x120xf32>
    %93 = arith.divf %91, %92 : vector<8x120xf32>
    %94 = arith.truncf %93 : vector<8x120xf32> to vector<8x120xbf16>
    %c0_57 = arith.constant 0 : index
    %c0_58 = arith.constant 0 : index
    %95 = vector.load %arg11[%c0_57, %c0_58] : memref<120x84xbf16, #tpu.memory_space<vmem>>, vector<120x84xbf16>
    %cst_59 = arith.constant dense<0.000000e+00> : vector<8x84xf32>
    %96 = tpu.matmul %94, %95, %cst_59 {dimension_numbers = #tpu.dot_dimension_numbers<[1], [0], [0], [1], [0, 0, 1, 1], [], []>} : vector<8x120xbf16>, vector<120x84xbf16>, vector<8x84xf32> -> vector<8x84xf32>
    %c0_60 = arith.constant 0 : index
    %c0_61 = arith.constant 0 : index
    %97 = vector.load %arg12[%c0_60, %c0_61] : memref<1x84xf32, #tpu.memory_space<vmem>>, vector<1x84xf32>
    %98 = vector.broadcast %97 : vector<1x84xf32> to vector<8x84xf32>
    %99 = arith.addf %96, %98 : vector<8x84xf32>
    %100 = arith.negf %99 : vector<8x84xf32>
    %101 = math.exp %100 : vector<8x84xf32>
    %cst_62 = arith.constant 1.000000e+00 : f32
    %102 = vector.broadcast %cst_62 : f32 to vector<8x84xf32>
    %103 = arith.addf %102, %101 : vector<8x84xf32>
    %104 = arith.divf %102, %103 : vector<8x84xf32>
    %105 = arith.truncf %104 : vector<8x84xf32> to vector<8x84xbf16>
    %c0_63 = arith.constant 0 : index
    %c0_64 = arith.constant 0 : index
    %106 = vector.load %arg13[%c0_63, %c0_64] : memref<84x128xbf16, #tpu.memory_space<vmem>>, vector<84x128xbf16>
    %cst_65 = arith.constant dense<0.000000e+00> : vector<8x128xf32>
    %107 = tpu.matmul %105, %106, %cst_65 {dimension_numbers = #tpu.dot_dimension_numbers<[1], [0], [0], [1], [0, 0, 1, 1], [], []>} : vector<8x84xbf16>, vector<84x128xbf16>, vector<8x128xf32> -> vector<8x128xf32>
    %c0_66 = arith.constant 0 : index
    %c0_67 = arith.constant 0 : index
    %108 = vector.load %arg14[%c0_66, %c0_67] : memref<1x128xf32, #tpu.memory_space<vmem>>, vector<1x128xf32>
    %109 = vector.broadcast %108 : vector<1x128xf32> to vector<8x128xf32>
    %110 = arith.addf %107, %109 : vector<8x128xf32>
    %cst_68 = arith.constant dense<0xFF800000> : vector<8xf32>
    %111 = vector.multi_reduction <maximumf>, %110, %cst_68 [1] : vector<8x128xf32> to vector<8xf32>
    %112 = vector.shape_cast %111 : vector<8xf32> to vector<8x1xf32>
    %113 = vector.broadcast %112 : vector<8x1xf32> to vector<8x128xf32>
    %114 = arith.subf %110, %113 : vector<8x128xf32>
    %115 = math.exp %114 : vector<8x128xf32>
    %cst_69 = arith.constant dense<0.000000e+00> : vector<8xf32>
    %116 = vector.multi_reduction <add>, %115, %cst_69 [1] : vector<8x128xf32> to vector<8xf32>
    %117 = vector.shape_cast %116 : vector<8xf32> to vector<8x1xf32>
    %118 = math.log %117 : vector<8x1xf32>
    %119 = vector.broadcast %118 : vector<8x1xf32> to vector<8x128xf32>
    %120 = arith.subf %114, %119 : vector<8x128xf32>
    %c0_70 = arith.constant 0 : index
    %c0_71 = arith.constant 0 : index
    %121 = vector.load %arg15[%c0_70, %c0_71] : memref<8x128xf32, #tpu.memory_space<vmem>>, vector<8x128xf32>
    tpu.vector_store %arg15[%c0_70, %c0_71], %120 {strides = array<i32>} : memref<8x128xf32, #tpu.memory_space<vmem>>, vector<8x128xf32>,
    return
  }
  func.func @transform_0(%arg0: i32) -> (i32, i32) {
    %c0_i32 = arith.constant 0 : i32
    %c0_i32_0 = arith.constant 0 : i32
    return %arg0, %c0_i32 : i32, i32
  }
  func.func @transform_1(%arg0: i32) -> (i32, i32) {
    %c0_i32 = arith.constant 0 : i32
    %c0_i32_0 = arith.constant 0 : i32
    %c0_i32_1 = arith.constant 0 : i32
    return %c0_i32, %c0_i32_0 : i32, i32
  }
  func.func @transform_2(%arg0: i32) -> (i32, i32) {
    %c0_i32 = arith.constant 0 : i32
    %c0_i32_0 = arith.constant 0 : i32
    %c0_i32_1 = arith.constant 0 : i32
    return %c0_i32, %c0_i32_0 : i32, i32
  }
  func.func @transform_3(%arg0: i32) -> (i32, i32) {
    %c0_i32 = arith.constant 0 : i32
    %c0_i32_0 = arith.constant 0 : i32
    %c0_i32_1 = arith.constant 0 : i32
    return %c0_i32, %c0_i32_0 : i32, i32
  }
  func.func @transform_4(%arg0: i32) -> (i32, i32) {
    %c0_i32 = arith.constant 0 : i32
    %c0_i32_0 = arith.constant 0 : i32
    %c0_i32_1 = arith.constant 0 : i32
    return %c0_i32, %c0_i32_0 : i32, i32
  }
  func.func @transform_5(%arg0: i32) -> (i32, i32, i32) {
    %c0_i32 = arith.constant 0 : i32
    %c0_i32_0 = arith.constant 0 : i32
    %c0_i32_1 = arith.constant 0 : i32
    %c0_i32_2 = arith.constant 0 : i32
    return %c0_i32, %c0_i32_0, %c0_i32_1 : i32, i32, i32
  }
  func.func @transform_6(%arg0: i32) -> (i32, i32) {
    %c0_i32 = arith.constant 0 : i32
    %c0_i32_0 = arith.constant 0 : i32
    %c0_i32_1 = arith.constant 0 : i32
    return %c0_i32, %c0_i32_0 : i32, i32
  }
  func.func @transform_7(%arg0: i32) -> (i32, i32) {
    %c0_i32 = arith.constant 0 : i32
    %c0_i32_0 = arith.constant 0 : i32
    %c0_i32_1 = arith.constant 0 : i32
    return %c0_i32, %c0_i32_0 : i32, i32
  }
  func.func @transform_8(%arg0: i32) -> (i32, i32, i32) {
    %c0_i32 = arith.constant 0 : i32
    %c0_i32_0 = arith.constant 0 : i32
    %c0_i32_1 = arith.constant 0 : i32
    %c0_i32_2 = arith.constant 0 : i32
    return %c0_i32, %c0_i32_0, %c0_i32_1 : i32, i32, i32
  }
  func.func @transform_9(%arg0: i32) -> (i32, i32) {
    %c0_i32 = arith.constant 0 : i32
    %c0_i32_0 = arith.constant 0 : i32
    %c0_i32_1 = arith.constant 0 : i32
    return %c0_i32, %c0_i32_0 : i32, i32
  }
  func.func @transform_10(%arg0: i32) -> (i32, i32) {
    %c0_i32 = arith.constant 0 : i32
    %c0_i32_0 = arith.constant 0 : i32
    %c0_i32_1 = arith.constant 0 : i32
    return %c0_i32, %c0_i32_0 : i32, i32
  }
  func.func @transform_11(%arg0: i32) -> (i32, i32) {
    %c0_i32 = arith.constant 0 : i32
    %c0_i32_0 = arith.constant 0 : i32
    %c0_i32_1 = arith.constant 0 : i32
    return %c0_i32, %c0_i32_0 : i32, i32
  }
  func.func @transform_12(%arg0: i32) -> (i32, i32) {
    %c0_i32 = arith.constant 0 : i32
    %c0_i32_0 = arith.constant 0 : i32
    %c0_i32_1 = arith.constant 0 : i32
    return %c0_i32, %c0_i32_0 : i32, i32
  }
  func.func @transform_13(%arg0: i32) -> (i32, i32) {
    %c0_i32 = arith.constant 0 : i32
    %c0_i32_0 = arith.constant 0 : i32
    %c0_i32_1 = arith.constant 0 : i32
    return %c0_i32, %c0_i32_0 : i32, i32
  }
  func.func @transform_14(%arg0: i32) -> (i32, i32) {
    %c0_i32 = arith.constant 0 : i32
    %c0_i32_0 = arith.constant 0 : i32
    return %arg0, %c0_i32 : i32, i32
  }
}

</mosaic_0001>

<bundles_post_ra>
// kernel: lenet_forward.1
= control target key start
LH: loop header
LB: loop body
LE: loop exit
PB: predicated region body
PF: predicated region fallthrough
CT: control target
= control target key end

     0   :  { %s7024_s0 = inlined_call_operand.vmem [shape: bf16[448,160], index: 0, kind: input, shape index: {}]   ;;  %s7025_s1 = inlined_call_operand.vmem [shape: bf16[160,168], index: 1, kind: input, shape index: {}]   ;;  %s7026_s2 = inlined_call_operand.vmem [shape: f32[1,168], index: 2, kind: input, shape index: {}]   ;;  %s7027_s3 = inlined_call_operand.vmem [shape: bf16[168,84], index: 3, kind: input, shape index: {}]   ;;  %s7028_s4 = inlined_call_operand.vmem [shape: bf16[400,224], index: 4, kind: input, shape index: {}]   ;;  %s7029_s5 = inlined_call_operand.vmem [shape: bf16[5,84,160], index: 5, kind: input, shape index: {}]   ;;  %s7030_s6 = inlined_call_operand.vmem [shape: f32[1,160], index: 6, kind: input, shape index: {}]   ;;  %s7031_s7 = inlined_call_operand.vmem [shape: bf16[40,80], index: 7, kind: input, shape index: {}]   ;;  %s7032_s8 = inlined_call_operand.vmem [shape: bf16[5,160,120], index: 8, kind: input, shape index: {}]   ;;  %s7033_s9 = inlined_call_operand.vmem [shape: f32[1,120], index: 9, kind: input, shape index: {}]   ;;  %s7034_s10 = inlined_call_operand.vmem [shape: bf16[120,84], index: 10, kind: input, shape index: {}]   ;;  %s7035_s11 = inlined_call_operand.vmem [shape: f32[1,84], index: 11, kind: input, shape index: {}]   ;;  %s7036_s12 = inlined_call_operand.vmem [shape: bf16[84,128], index: 12, kind: input, shape index: {}]   ;;  %s7037_s13 = inlined_call_operand.vmem [shape: f32[1,128], index: 13, kind: input, shape index: {}]   ;;  %s7038_s14 = inlined_call_operand.hbm [shape: f32[16,128], index: 14, kind: output, shape index: {}]  }
   0x1   :  { %7043 = sst [smem:[#allocation9_spill]] %s7024_s0 }
   0x2   :  { %19 = vsyncpa [#allocation3], 0 }
   0x3   :  { %21 = vsyncpa [#allocation3 + $0x1], 0  ;;  %s5760_s29 = smov 0   ;;  %s5762_s30 = smov 0  }
   0x4   :  { %s5764_s15 = smov 0   ;;  %s5766_s16 = smov 0  }
   0x5 LB: > { %7044 = sst [smem:[#allocation5_spill]] %s5675_s15  ;;  %s5781_s17 = sadd.s32 4294967295, %s5679_s16   ;;  %s5679_s16 = sphi %s5766_s16, %s7052_s16   ;;  %s5675_s15 = sphi %s5764_s15, %s7054_s15   ;;  %s5671_s30 = sphi %s5762_s30, %s7056_s30   ;;  %s5667_s29 = sphi %s5760_s29, %s7055_s29  }
   0x6   : > { %s4353_s18 = sadd.s32 4294967294, %s5679_s16   ;;  %s5785_s19 = sadd.s32 1, %s5679_s16  }
   0x7   : > { %7045 = sst [smem:[#allocation6_spill]] %s5785_s19  ;;  %s333_s20 = sadd.s32 1, %s5675_s15 }
   0x8   : > { %s330_s21 = ssub.s32 %s5679_s16, %s5785_s19  ;;  %p343_p0 = scmp.ne.s32.totalorder %s5675_s15, %s5671_s30 }
   0x9   : > { %p331_p1 = scmp.eq.s32.totalorder %s330_s21, 0  ;;  %p344_p2 = scmp.eq.s32.totalorder %s5781_s17, 1 }
   0xa   : > { %p349_p3 = scmp.ne.s32.totalorder %s5671_s30, %s5667_s29  ;;  %p350_p4 = scmp.eq.s32.totalorder %s4353_s18, 1 }
   0xb   : > { %s5796_s22 = scalar_select %p331_p1, %s5675_s15, %s333_s20  }
   0xc   : > { %p5798_p5 = por %p344_p2, %p343_p0  ;;  %p5802_p6 = por %p350_p4, %p349_p3 }
   0xd   : > { %7046 = sst [smem:[#allocation7_spill]] %s5796_s22  ;;  %p4356_p7 = scmp.ge.s32.totalorder %s5679_s16, 1 }
   0xe   : > { %s7048_s24 = scalar_select %p5802_p6, 1, 0 }
   0xf   : > { %p417_p8 = scmp.lt.s32.totalorder %s5679_s16, 3 }
  0x10   : > { %7049 = sst [smem:[#allocation8_spill]] %s7048_s24 }
  0x11   : > { %p418_p9 = pnand %p4356_p7, %p417_p8 }
  0x12   : > { %s464_s27 = smul.u32 (!%p418_p9), 28, %s5781_s17  ;;  %s7050_s0 = sld [smem:[#allocation9_spill]] (!%p418_p9) }
  0x13   : > { %421 = sbr.rel (%p418_p9) target bundleno = 2580 (0xa14), region = 76  ;;  %s461_s24 = sand.u32 (!%p418_p9), 1, %s5671_s30  }
  0x14   : > { %p465_p10 = scmp.lt.s32.totalorder (!%p418_p9), %s464_s27, 55  ;;  %s4357_s22 = sshll.u32 (!%p418_p9), %s461_s24, 3 }
  0x15   : > { %s4895_s25 = sshll.u32 (!%p418_p9), %s5781_s17, 7  ;;  %s463_s28 = scalar_lea.vmem (!%p418_p9), [#allocation2], %s4357_s22 }
  0x16   : > { %s4294_s18 = sshll.u32 (!%p418_p9), %s463_s28, 4  ;;  %s4292_s21 = scalar_lea.hbm (!%p418_p9), %s7038_s14, %s4895_s25  ;;  %s4295_s18 = int_to_ptr.vmem [resolvable:$true] %s4294_s18 }
  0x17   : > { %s4281_s15 = scalar_lea.sflag (!%p418_p9), [#allocation3], %s461_s24 }
  0x18   : > { %v4993_v0 = vld [vmem:[%s7025_s1 + $0x74] ss:$8 sps:$4 sm:$0xff]   ;;  %v4995_v1 = vld [vmem:[%s7025_s1 + $0x70] ss:$8 sps:$4 sm:$0xff]   ;;  %v4996_v2 = vld [vmem:[%s7025_s1 + $0x64] ss:$8 sps:$4 sm:$0xff]   ;;  %v522_v61 = vlaneseq }
  0x19   : > { %801 = vmatprep.subr.bf16.mxu0 %v4993_v0  ;;  %v4998_v3 = vld [vmem:[%s7025_s1 + $0x60] ss:$8 sps:$4 sm:$0xff]   ;;  %v4999_v4 = vld [vmem:[%s7025_s1 + $0x54] ss:$8 sps:$4 sm:$0xff]   ;;  %s7058_s27 = smov (!%p465_p10, %s464_s27), 55  ;;  %vm758_vm0 = vcmask 261120  }
  0x1a   : > { %802 = vmatpush1.bf16.msra.mxu0 %v4995_v1  ;;  %v5001_v5 = vld [vmem:[%s7025_s1 + $0x50] ss:$8 sps:$4 sm:$0xff]   ;;  %v5002_v6 = vld [vmem:[%s7025_s1 + $0x44] ss:$8 sps:$4 sm:$0xff]   ;;  %s4898_s19 = sshll.u32 %s7058_s27, 3  ;;  %v5681_v40 = vmov 0  }
  0x1b   : > { %803 = vmatprep.subr.bf16.mxu0 %v4996_v2  ;;  %v5004_v7 = vld [vmem:[%s7025_s1 + $0x40] ss:$8 sps:$4 sm:$0xff]   ;;  %s5836_s26 = scalar_lea.vmem %s7050_s0, %s4898_s19  ;;  %v5005_v8 = vld [vmem:[%s7025_s1 + $0x34] ss:$8 sps:$4 sm:$0xff]   ;;  %v5007_v10 = vld [vmem:[%s7025_s1 + $0x30] ss:$8 sps:$4 sm:$0xff]   ;;  %1469 = vmatprep.subr.bf16.mxu1 %v5681_v40 }
  0x1c   : > { %v5025_v9 = vld [vmem:[%s5836_s26 + $0x4] ss:$8 sps:$4 sm:$0xff]   ;;  %v5010_v12 = vld [vmem:[%s7025_s1 + $0x20] ss:$8 sps:$4 sm:$0xff]   ;;  %v5011_v13 = vld [vmem:[%s7025_s1 + $0x14] ss:$8 sps:$4 sm:$0xff]  }
  0x1d   : > { %v5008_v11 = vld [vmem:[%s7025_s1 + $0x24] ss:$8 sps:$4 sm:$0xff]   ;;  %4408 = vmatprep.mubr.msk.bf16.mxu0 %vm758_vm0, %v5025_v9  ;;  %v5013_v14 = vld [vmem:[%s7025_s1 + $0x10] ss:$8 sps:$4 sm:$0xff]   ;;  %v5016_v16 = vld [vmem:[%s7025_s1] ss:$8 sps:$4 sm:$0xff]  }
  0x1e   : > { %804 = vmatpush1.bf16.msra.mxu0 %v4998_v3  ;;  %v5014_v15 = vld [vmem:[%s7025_s1 + $0x4] ss:$8 sps:$4 sm:$0xff]   ;;  %v5017_v17 = vld [vmem:[%s7025_s1 + $0x94] ss:$8 sps:$4 sm:$0xff]   ;;  %v5019_v18 = vld [vmem:[%s7025_s1 + $0x90] ss:$8 sps:$4 sm:$0xff]  }
  0x1f   : > { %805 = vmatprep.subr.bf16.mxu0 %v4999_v4  ;;  %v5020_v19 = vld [vmem:[%s7025_s1 + $0x84] ss:$8 sps:$4 sm:$0xff]   ;;  %v5022_v20 = vld [vmem:[%s7025_s1 + $0x80] ss:$8 sps:$4 sm:$0xff]   ;;  %v5026_v22 = vld [vmem:[%s5836_s26 + $0x14] ss:$8 sps:$4 sm:$0xff]  }
  0x20   : > { %v5023_v21 = vld [vmem:[%s5836_s26] ss:$8 sps:$4 sm:$0xff]   ;;  %v5028_v23 = vld [vmem:[%s5836_s26 + $0x10] ss:$8 sps:$4 sm:$0xff]   ;;  %v5029_v24 = vld [vmem:[%s5836_s26 + $0x24] ss:$8 sps:$4 sm:$0xff]  }
  0x21   : > { %v5031_v25 = vld [vmem:[%s5836_s26 + $0x20] ss:$8 sps:$4 sm:$0xff]   ;;  %v5032_v26 = vld [vmem:[%s5836_s26 + $0x34] ss:$8 sps:$4 sm:$0xff]   ;;  %v5034_v27 = vld [vmem:[%s5836_s26 + $0x30] ss:$8 sps:$4 sm:$0xff]  }
  0x22   : > { %806 = vmatpush1.bf16.msra.mxu0 %v5001_v5  ;;  %v5035_v28 = vld [vmem:[%s5836_s26 + $0x44] ss:$8 sps:$4 sm:$0xff]   ;;  %v5037_v29 = vld [vmem:[%s5836_s26 + $0x40] ss:$8 sps:$4 sm:$0xff]   ;;  %v5038_v30 = vld [vmem:[%s5836_s26 + $0x54] ss:$8 sps:$4 sm:$0xff]  }
  0x23   : > { %807 = vmatprep.subr.bf16.mxu0 %v5002_v6  ;;  %v5040_v31 = vld [vmem:[%s5836_s26 + $0x50] ss:$8 sps:$4 sm:$0xff]   ;;  %v5041_v32 = vld [vmem:[%s5836_s26 + $0x64] ss:$8 sps:$4 sm:$0xff]   ;;  %v5043_v33 = vld [vmem:[%s5836_s26 + $0x60] ss:$8 sps:$4 sm:$0xff]  }
  0x24   : > { %v5044_v34 = vld [vmem:[%s5836_s26 + $0x74] ss:$8 sps:$4 sm:$0xff]   ;;  %v5046_v35 = vld [vmem:[%s5836_s26 + $0x70] ss:$8 sps:$4 sm:$0xff]   ;;  %v5047_v36 = vld [vmem:[%s5836_s26 + $0x84] ss:$8 sps:$4 sm:$0xff]  }
  0x25   : > { %v5049_v37 = vld [vmem:[%s5836_s26 + $0x80] ss:$8 sps:$4 sm:$0xff]   ;;  %v5050_v38 = vld [vmem:[%s5836_s26 + $0x94] ss:$8 sps:$4 sm:$0xff]   ;;  %v5052_v41 = vld [vmem:[%s5836_s26 + $0x90] ss:$8 sps:$4 sm:$0xff]  }
  0x26   : > { %808 = vmatpush1.bf16.msra.mxu0 %v5004_v7  ;;  %v5065_v39 = vld [vmem:[%s7027_s3 + $0x38] sm:$0xff]   ;;  %v5053_v42 = vld [vmem:[%s5836_s26 + $0xa4] ss:$8 sps:$4 sm:$0xff]   ;;  %v5066_v43 = vld [vmem:[%s7027_s3 + $0x30] sm:$0xff]   ;;  %vm1465_vm1 = vcmask 1043456   ;;  %v5962_v62 = vshrl.u32 %v522_v61, 7 }
  0x27   : > { %809 = vmatprep.subr.bf16.mxu0 %v5005_v8  ;;  %1470 = vmatpush1.bf16.msra.mxu1 %v5065_v39  ;;  %v5067_v44 = vld [vmem:[%s7027_s3 + $0x28] sm:$0xff]   ;;  %v5068_v45 = vld [vmem:[%s7027_s3 + $0x20] sm:$0xff]   ;;  %v5056_v47 = vld [vmem:[%s5836_s26 + $0xb4] ss:$8 sps:$4 sm:$0xff]   ;;  %vm1422_vm2 = vcmask 326656   ;;  %vm1903_vm3 = vcmask 785408  }
  0x28   : > { %1471 = vmatprep.subr.bf16.mxu1 %v5681_v40  ;;  %v5055_v46 = vld [vmem:[%s5836_s26 + $0xa0] ss:$8 sps:$4 sm:$0xff]   ;;  %v5069_v48 = vld [vmem:[%s7027_s3 + $0x18] sm:$0xff]   ;;  %v5070_v50 = vld [vmem:[%s7027_s3 + $0x10] sm:$0xff]   ;;  %v524_v63 = vsub.s32 0, %v5962_v62  ;;  %v528_v1 = vsub.s32 1, %v5962_v62 }
  0x29   : > { %v5058_v49 = vld [vmem:[%s5836_s26 + $0xb0] ss:$8 sps:$4 sm:$0xff]   ;;  %v5059_v51 = vld [vmem:[%s5836_s26 + $0xc4] ss:$8 sps:$4 sm:$0xff]   ;;  %v5061_v53 = vld [vmem:[%s5836_s26 + $0xc0] ss:$8 sps:$4 sm:$0xff]  }
  0x2a   : > { %810 = vmatpush1.bf16.msra.mxu0 %v5007_v10  ;;  %v5071_v52 = vld [vmem:[%s7027_s3 + $0x8] sm:$0xff]   ;;  %v5072_v54 = vld [vmem:[%s7027_s3] sm:$0xff]   ;;  %v5062_v55 = vld [vmem:[%s5836_s26 + $0xd4] ss:$8 sps:$4 sm:$0xff]   ;;  %vm2316_vm4 = vcmask 1041408   ;;  %vm2300_vm5 = vcmask 687104  }
  0x2b   : > { %811 = vmatprep.subr.bf16.mxu0 %v5008_v11  ;;  %1472 = vmatpush1.bf16.msra.mxu1 %v5066_v43  ;;  %v5073_v56 = vld [vmem:[%s7027_s3 + $0x50] ss:$0 sps:$4 sm:$0xff]   ;;  %v5074_v59 = vld [vmem:[%s7027_s3 + $0x48] sm:$0xff]   ;;  %v5075_v60 = vld [vmem:[%s7027_s3 + $0x40] sm:$0xff]   ;;  %vm3333_vm6 = vcmask 654336   ;;  %vm5683_vm7 = vmmov 0  }
  0x2c   : > { %1473 = vmatprep.subr.bf16.mxu1 %v5681_v40  ;;  %v1467_v57 = vsel %vm1465_vm1, %v5073_v56, 0  ;;  %v5064_v58 = vld [vmem:[%s5836_s26 + $0xd0] ss:$8 sps:$4 sm:$0xff]   ;;  %v520_v0 = vld [vmem:[%s7026_s2] sm:$0x3]  ;;  %vm4118_vm8 = vcmask 982016  }
  0x2d   : > { %v5971_v2 = vrot.slane %v520_v0, %v524_v63  ;;  %v5975_v3 = vrot.slane %v520_v0, %v528_v1  ;;  %v5244_v62 = vld [vmem:[%s7032_s8 + $0x60] sm:$0xff]   ;;  %s5619_s19 = scalar_lea.vmem %s4295_s18, 128  ;;  %s5684_s26 = smov [#allocation2]  }
  0x2e   : > { %812 = vmatpush1.bf16.msra.mxu0 %v5010_v12  ;;  %p5620_p11 = scmp.ne.s32.totalorder %s4295_s18, %s5619_s19  ;;  %s5623_s0 = sshll.u32 %s5684_s26, 4  ;;  %s5624_s0 = int_to_ptr.vmem [resolvable:$false] %s5623_s0 }
  0x2f   : > { %813 = vmatprep.subr.bf16.mxu0 %v5011_v13  ;;  %1474 = vmatpush1.bf16.msra.mxu1 %v5067_v44  ;;  %s5625_s17 = scalar_lea.vmem %s5624_s0, 256  ;;  %p5626_p0 = scmp.lt.s32.totalorder %s4295_s18, %s5624_s0 }
  0x30   : > { %1475 = vmatprep.subr.bf16.mxu1 %v5681_v40  ;;  %p5621_p12 = pnand %p5620_p11, %p5798_p5  ;;  %p5627_p1 = scmp.lt.s32.totalorder %s5625_s17, %s5619_s19 }
  0x32   : > { %814 = vmatpush1.bf16.msra.mxu0 %v5013_v14  ;;  %p5622_p13 = pneg %p5621_p12  ;;  %p5628_p2 = por %p5627_p1, %p5626_p0 }
  0x33   : > { %815 = vmatprep.subr.bf16.mxu0 %v5014_v15  ;;  %1476 = vmatpush1.bf16.msra.mxu1 %v5068_v45 }
  0x34   : > { %1477 = vmatprep.subr.bf16.mxu1 %v5681_v40  ;;  %p5629_p3 = pnand %p5628_p2, %p5622_p13 }
  0x36   : > { %816 = vmatpush1.bf16.msra.mxu0 %v5016_v16 }
  0x37   : > { %829 = vmatprep.subr.bf16.mxu0 %v5017_v17  ;;  %1478 = vmatpush1.bf16.msra.mxu1 %v5069_v48 }
  0x38   : > { %1479 = vmatprep.subr.bf16.mxu1 %v5681_v40 }
  0x3a   : > { %830 = vmatpush2.bf16.msra.mxu0 %v5019_v18 }
  0x3b   : > { %831 = vmatprep.subr.bf16.mxu0 %v5020_v19  ;;  %1480 = vmatpush1.bf16.msra.mxu1 %v5070_v50 }
  0x3c   : > { %1481 = vmatprep.subr.bf16.mxu1 %v5681_v40 }
  0x3e   : > { %832 = vmatpush2.bf16.msra.mxu0 %v5022_v20 }
  0x3f   : > { %1979 = vmatprep.subr.bf16.mxu0 %v5681_v40  ;;  %1482 = vmatpush1.bf16.msra.mxu1 %v5071_v52 }
  0x40   : > { %1483 = vmatprep.subr.bf16.mxu1 %v5681_v40 }
  0x41   : > { %834 = vmatmul.mubr.bf16.vlgmr.msra.gmra.mxu0 %v5023_v21 }
  0x42   : > { %4409 = vmatprep.mubr.msk.bf16.mxu0 %vm758_vm0, %v5026_v22 }
  0x43   : > { %1484 = vmatpush1.bf16.msra.mxu1 %v5072_v54 }
  0x44   : > { %1495 = vmatprep.subr.bf16.mxu1 %v5681_v40 }
  0x47   : > { %1496 = vmatpush2.bf16.msra.mxu1 %v1467_v57 }
  0x48   : > { %1497 = vmatprep.subr.bf16.mxu1 %v5681_v40 }
  0x49   : > { %844 = vmatmul.mubr.bf16.gmra.mxu0 %v5028_v23 }
  0x4a   : > { %4410 = vmatprep.mubr.msk.bf16.mxu0 %vm758_vm0, %v5029_v24 }
  0x4b   : > { %1498 = vmatpush2.bf16.msra.mxu1 %v5074_v59 }
  0x4c   : > { %1499 = vmatprep.subr.bf16.mxu1 %v5681_v40 }
  0x4f   : > { %1500 = vmatpush2.bf16.msra.mxu1 %v5075_v60 }
  0x51   : > { %854 = vmatmul.mubr.bf16.gmra.mxu0 %v5031_v25 }
  0x52   : > { %4411 = vmatprep.mubr.msk.bf16.mxu0 %vm758_vm0, %v5032_v26 }
  0x59   : > { %864 = vmatmul.mubr.bf16.gmra.mxu0 %v5034_v27 }
  0x5a   : > { %4412 = vmatprep.mubr.msk.bf16.mxu0 %vm758_vm0, %v5035_v28 }
  0x61   : > { %874 = vmatmul.mubr.bf16.gmra.mxu0 %v5037_v29 }
  0x62   : > { %4413 = vmatprep.mubr.msk.bf16.mxu0 %vm758_vm0, %v5038_v30 }
  0x69   : > { %884 = vmatmul.mubr.bf16.gmra.mxu0 %v5040_v31 }
  0x6a   : > { %4414 = vmatprep.mubr.msk.bf16.mxu0 %vm758_vm0, %v5041_v32 }
  0x71   : > { %894 = vmatmul.mubr.bf16.gmra.mxu0 %v5043_v33 }
  0x72   : > { %4415 = vmatprep.mubr.msk.bf16.mxu0 %vm758_vm0, %v5044_v34 }
  0x79   : > { %904 = vmatmul.mubr.bf16.gmra.mxu0 %v5046_v35 }
  0x7a   : > { %4416 = vmatprep.mubr.msk.bf16.mxu0 %vm758_vm0, %v5047_v36 }
  0x81   : > { %914 = vmatmul.mubr.bf16.gmra.mxu0 %v5049_v37 }
  0x82   : > { %4417 = vmatprep.mubr.msk.bf16.mxu0 %vm758_vm0, %v5050_v38 }
  0x89   : > { %924 = vmatmul.mubr.bf16.gmra.mxu0 %v5052_v41 }
  0x8a   : > { %4418 = vmatprep.mubr.msk.bf16.mxu0 %vm758_vm0, %v5053_v42 }
  0x91   : > { %934 = vmatmul.mubr.bf16.gmra.mxu0 %v5055_v46 }
  0x92   : > { %4419 = vmatprep.mubr.msk.bf16.mxu0 %vm758_vm0, %v5056_v47 }
  0x99   : > { %944 = vmatmul.mubr.bf16.gmra.mxu0 %v5058_v49 }
  0x9a   : > { %4420 = vmatprep.mubr.msk.bf16.mxu0 %vm758_vm0, %v5059_v51 }
  0xa1   : > { %954 = vmatmul.mubr.bf16.gmra.mxu0 %v5061_v53 }
  0xa2   : > { %4421 = vmatprep.mubr.msk.bf16.mxu0 %vm758_vm0, %v5062_v55 }
  0xa9   : > { %964 = vmatmul.mubr.bf16.gmra.mxu0 %v5064_v58 }
 0x101   : > { %v835_v4 = vpop.f32.mrf.mxu0 }
 0x102   : > { %v836_v5 = vadd.f32 %v835_v4, %v5971_v2 }
 0x103   : > { %v837_v6 = vpop.f32.mrf.mxu0 }
 0x104   : > { %v4422_v7 = vmul.f32 -1.442695, %v836_v5  ;;  %v838_v8 = vadd.f32 %v837_v6, %v5975_v3 }
 0x105   : > { %v839_v9 = vpop.f32.mrf.mxu0 }
 0x106   : > { %5303 = vpow2.f32 %v4422_v7  ;;  %v4423_v10 = vmul.f32 -1.442695, %v838_v8  ;;  %v840_v11 = vadd.f32 %v839_v9, %v5971_v2 }
 0x107   : > { %v841_v12 = vpop.f32.mrf.mxu0 }
 0x108   : > { %5305 = vpow2.f32 %v4423_v10  ;;  %v4424_v13 = vmul.f32 -1.442695, %v840_v11  ;;  %v842_v14 = vadd.f32 %v841_v12, %v5975_v3 }
 0x109   : > { %v845_v15 = vpop.f32.mrf.mxu0 }
 0x10a   : > { %5307 = vpow2.f32 %v4424_v13  ;;  %v4425_v16 = vmul.f32 -1.442695, %v842_v14  ;;  %v846_v17 = vadd.f32 %v845_v15, %v5971_v2 }
 0x10b   : > { %v847_v18 = vpop.f32.mrf.mxu0 }
 0x10c   : > { %5309 = vpow2.f32 %v4425_v16  ;;  %v4426_v19 = vmul.f32 -1.442695, %v846_v17  ;;  %v848_v20 = vadd.f32 %v847_v18, %v5975_v3 }
 0x10d   : > { %v849_v21 = vpop.f32.mrf.mxu0 }
 0x10e   : > { %5311 = vpow2.f32 %v4426_v19  ;;  %v4427_v22 = vmul.f32 -1.442695, %v848_v20  ;;  %v850_v23 = vadd.f32 %v849_v21, %v5971_v2 }
 0x10f   : > { %v851_v24 = vpop.f32.mrf.mxu0 }
 0x110   : > { %5313 = vpow2.f32 %v4427_v22  ;;  %v4428_v25 = vmul.f32 -1.442695, %v850_v23  ;;  %v852_v26 = vadd.f32 %v851_v24, %v5975_v3 }
 0x111   : > { %v855_v27 = vpop.f32.mrf.mxu0 }
 0x112   : > { %5315 = vpow2.f32 %v4428_v25  ;;  %v4429_v28 = vmul.f32 -1.442695, %v852_v26  ;;  %v856_v29 = vadd.f32 %v855_v27, %v5971_v2 }
 0x113   : > { %v5304_v30 = vpop.eup %5303  ;;  %v857_v31 = vpop.f32.mrf.mxu0 }
 0x114   : > { %v1142_v32 = vadd.f32 1.0, %v5304_v30  ;;  %5317 = vpow2.f32 %v4429_v28  ;;  %v4430_v33 = vmul.f32 -1.442695, %v856_v29  ;;  %v858_v34 = vadd.f32 %v857_v31, %v5975_v3 }
 0x115   : > { %v5306_v35 = vpop.eup %5305  ;;  %v859_v36 = vpop.f32.mrf.mxu0 }
 0x116   : > { %5319 = vrcp.f32 %v1142_v32  ;;  %v1143_v37 = vadd.f32 1.0, %v5306_v35  ;;  %v4431_v38 = vmul.f32 -1.442695, %v858_v34  ;;  %v860_v39 = vadd.f32 %v859_v36, %v5971_v2 }
 0x117   : > { %v5308_v41 = vpop.eup %5307  ;;  %5321 = vpow2.f32 %v4430_v33  ;;  %v861_v42 = vpop.f32.mrf.mxu0 }
 0x118   : > { %5323 = vrcp.f32 %v1143_v37  ;;  %v1144_v43 = vadd.f32 1.0, %v5308_v41  ;;  %v4432_v44 = vmul.f32 -1.442695, %v860_v39  ;;  %v862_v45 = vadd.f32 %v861_v42, %v5975_v3 }
 0x119   : > { %v5310_v46 = vpop.eup %5309  ;;  %5325 = vpow2.f32 %v4431_v38  ;;  %v865_v47 = vpop.f32.mrf.mxu0 }
 0x11a   : > { %5327 = vrcp.f32 %v1144_v43  ;;  %v1145_v48 = vadd.f32 1.0, %v5310_v46  ;;  %v4433_v49 = vmul.f32 -1.442695, %v862_v45  ;;  %v866_v50 = vadd.f32 %v865_v47, %v5971_v2 }
 0x11b   : > { %v5312_v51 = vpop.eup %5311  ;;  %5329 = vpow2.f32 %v4432_v44  ;;  %v867_v52 = vpop.f32.mrf.mxu0 }
 0x11c   : > { %5331 = vrcp.f32 %v1145_v48  ;;  %v1146_v53 = vadd.f32 1.0, %v5312_v51  ;;  %v4434_v54 = vmul.f32 -1.442695, %v866_v50  ;;  %v868_v55 = vadd.f32 %v867_v52, %v5975_v3 }
 0x11d   : > { %v5314_v56 = vpop.eup %5313  ;;  %5333 = vpow2.f32 %v4433_v49  ;;  %v869_v57 = vpop.f32.mrf.mxu0 }
 0x11e   : > { %5335 = vrcp.f32 %v1146_v53  ;;  %v1147_v58 = vadd.f32 1.0, %v5314_v56  ;;  %v4435_v59 = vmul.f32 -1.442695, %v868_v55  ;;  %v870_v60 = vadd.f32 %v869_v57, %v5971_v2 }
 0x11f   : > { %v5316_v61 = vpop.eup %5315  ;;  %5337 = vpow2.f32 %v4434_v54  ;;  %v871_v0 = vpop.f32.mrf.mxu0 }
 0x120   : > { %5339 = vrcp.f32 %v1147_v58  ;;  %v1148_v4 = vadd.f32 1.0, %v5316_v61  ;;  %v4436_v5 = vmul.f32 -1.442695, %v870_v60  ;;  %v872_v6 = vadd.f32 %v871_v0, %v5975_v3 }
 0x121   : > { %v5318_v7 = vpop.eup %5317  ;;  %5341 = vpow2.f32 %v4435_v59  ;;  %v875_v8 = vpop.f32.mrf.mxu0 }
 0x122   : > { %5343 = vrcp.f32 %v1148_v4  ;;  %v1149_v9 = vadd.f32 1.0, %v5318_v7  ;;  %v4437_v10 = vmul.f32 -1.442695, %v872_v6  ;;  %v876_v11 = vadd.f32 %v875_v8, %v5971_v2 }
 0x123   : > { %v5320_v12 = vpop.eup %5319  ;;  %5345 = vpow2.f32 %v4436_v5  ;;  %v877_v13 = vpop.f32.mrf.mxu0 }
 0x124   : > { %v5322_v14 = vpop.eup %5321  ;;  %5347 = vrcp.f32 %v1149_v9  ;;  %v4438_v15 = vmul.f32 -1.442695, %v876_v11  ;;  %v878_v16 = vadd.f32 %v877_v13, %v5975_v3 }
 0x125   : > { %v5324_v17 = vpop.eup %5323  ;;  %5349 = vpow2.f32 %v4437_v10  ;;  %v879_v18 = vpop.f32.mrf.mxu0  ;;  %v1150_v29 = vadd.f32 1.0, %v5322_v14 }
 0x126   : > { %v5326_v19 = vpop.eup %5325  ;;  %v4439_v20 = vmul.f32 -1.442695, %v878_v16  ;;  %v880_v21 = vadd.f32 %v879_v18, %v5971_v2  ;;  %5351 = vpow2.f32 %v4438_v15 }
 0x127   : > { %v5328_v22 = vpop.eup %5327  ;;  %v1151_v23 = vadd.f32 1.0, %v5326_v19  ;;  %v881_v24 = vpop.f32.mrf.mxu0 }
 0x128   : > { %v5330_v25 = vpop.eup %5329  ;;  %5353 = vpow2.f32 %v4439_v20  ;;  %v4440_v26 = vmul.f32 -1.442695, %v880_v21  ;;  %v882_v27 = vadd.f32 %v881_v24, %v5975_v3  ;;  %v1310_v39 = vpack.c.bf16 %v5328_v22, %v5320_v12 }
 0x129   : > { %v5332_v28 = vpop.eup %5331  ;;  %5355 = vrcp.f32 %v1151_v23  ;;  %v1152_v30 = vadd.f32 1.0, %v5330_v25  ;;  %v885_v31 = vpop.f32.mrf.mxu0 }
 0x12a   : > { %v5334_v32 = vpop.eup %5333  ;;  %5357 = vpow2.f32 %v4440_v26  ;;  %v4441_v33 = vmul.f32 -1.442695, %v882_v27  ;;  %v886_v34 = vadd.f32 %v885_v31, %v5971_v2  ;;  %v1311_v35 = vpack.c.bf16 %v5332_v28, %v5324_v17 }
 0x12b   : > { %v5336_v36 = vpop.eup %5335  ;;  %5359 = vrcp.f32 %v1152_v30  ;;  %v1153_v37 = vadd.f32 1.0, %v5334_v32  ;;  %v887_v38 = vpop.f32.mrf.mxu0 }
 0x12c   : > { %v5338_v41 = vpop.eup %5337  ;;  %5361 = vpow2.f32 %v4441_v33  ;;  %v4442_v42 = vmul.f32 -1.442695, %v886_v34  ;;  %v888_v43 = vadd.f32 %v887_v38, %v5975_v3  ;;  %4489 = vmatprep.mubr.msk.bf16.mxu1 %vm1422_vm2, %v1311_v35 }
 0x12d   : > { %v5340_v44 = vpop.eup %5339  ;;  %5363 = vrcp.f32 %v1153_v37  ;;  %v889_v45 = vpop.f32.mrf.mxu0  ;;  %1502 = vmatmul.mubr.bf16.vlgmr.msra.gmra.mxu1 %v1310_v39  ;;  %v1154_v56 = vadd.f32 1.0, %v5338_v41 }
 0x12e   : > { %v5342_v46 = vpop.eup %5341  ;;  %5365 = vrcp.f32 %v1150_v29  ;;  %v4443_v47 = vmul.f32 -1.442695, %v888_v43  ;;  %v890_v48 = vadd.f32 %v889_v45, %v5971_v2 }
 0x12f   : > { %v5344_v49 = vpop.eup %5343  ;;  %v1155_v50 = vadd.f32 1.0, %v5342_v46  ;;  %5367 = vpow2.f32 %v4442_v42  ;;  %v891_v51 = vpop.f32.mrf.mxu0 }
 0x130   : > { %v5346_v52 = vpop.eup %5345  ;;  %5369 = vpow2.f32 %v4443_v47  ;;  %v4444_v53 = vmul.f32 -1.442695, %v890_v48  ;;  %v892_v54 = vadd.f32 %v891_v51, %v5975_v3  ;;  %v1312_v6 = vpack.c.bf16 %v5344_v49, %v5336_v36 }
 0x131   : > { %v5348_v55 = vpop.eup %5347  ;;  %5371 = vrcp.f32 %v1155_v50  ;;  %v1156_v57 = vadd.f32 1.0, %v5346_v52  ;;  %v895_v58 = vpop.f32.mrf.mxu0 }
 0x132   : > { %v5350_v59 = vpop.eup %5349  ;;  %5373 = vpow2.f32 %v4444_v53  ;;  %v4445_v60 = vmul.f32 -1.442695, %v892_v54  ;;  %v896_v61 = vadd.f32 %v895_v58, %v5971_v2  ;;  %v1313_v0 = vpack.c.bf16 %v5348_v55, %v5340_v44 }
 0x133   : > { %5375 = vrcp.f32 %v1156_v57  ;;  %v1157_v4 = vadd.f32 1.0, %v5350_v59  ;;  %v897_v5 = vpop.f32.mrf.mxu0  ;;  %v5352_v7 = vpop.eup %5351 }
 0x134   : > { %5377 = vpow2.f32 %v4445_v60  ;;  %v4446_v8 = vmul.f32 -1.442695, %v896_v61  ;;  %v898_v9 = vadd.f32 %v897_v5, %v5975_v3  ;;  %4490 = vmatprep.mubr.msk.bf16.mxu1 %vm1422_vm2, %v1313_v0  ;;  %v1158_v23 = vadd.f32 1.0, %v5352_v7 }
 0x135   : > { %v5354_v10 = vpop.eup %5353  ;;  %5379 = vrcp.f32 %v1157_v4  ;;  %v899_v11 = vpop.f32.mrf.mxu0  ;;  %1510 = vmatmul.mubr.bf16.gmra.mxu1 %v1312_v6 }
 0x136   : > { %v5356_v12 = vpop.eup %5355  ;;  %5381 = vrcp.f32 %v1154_v56  ;;  %v1159_v13 = vadd.f32 1.0, %v5354_v10  ;;  %v4447_v14 = vmul.f32 -1.442695, %v898_v9  ;;  %v900_v15 = vadd.f32 %v899_v11, %v5971_v2 }
 0x137   : > { %v5358_v16 = vpop.eup %5357  ;;  %5383 = vpow2.f32 %v4446_v8  ;;  %v901_v17 = vpop.f32.mrf.mxu0 }
 0x138   : > { %v5360_v18 = vpop.eup %5359  ;;  %5385 = vrcp.f32 %v1159_v13  ;;  %v1160_v19 = vadd.f32 1.0, %v5358_v16  ;;  %v4448_v20 = vmul.f32 -1.442695, %v900_v15  ;;  %v902_v21 = vadd.f32 %v901_v17, %v5975_v3 }
 0x139   : > { %v5362_v22 = vpop.eup %5361  ;;  %5387 = vpow2.f32 %v4447_v14  ;;  %v905_v24 = vpop.f32.mrf.mxu0 }
 0x13a   : > { %v5364_v25 = vpop.eup %5363  ;;  %5389 = vrcp.f32 %v1160_v19  ;;  %v1161_v26 = vadd.f32 1.0, %v5362_v22  ;;  %v4449_v27 = vmul.f32 -1.442695, %v902_v21  ;;  %v906_v28 = vadd.f32 %v905_v24, %v5971_v2 }
 0x13b   : > { %v5366_v29 = vpop.eup %5365  ;;  %5391 = vpow2.f32 %v4448_v20  ;;  %v907_v30 = vpop.f32.mrf.mxu0  ;;  %v1315_v31 = vpack.c.bf16 %v5364_v25, %v5356_v12 }
 0x13c   : > { %v5368_v32 = vpop.eup %5367  ;;  %5393 = vrcp.f32 %v1161_v26  ;;  %v4450_v33 = vmul.f32 -1.442695, %v906_v28  ;;  %v908_v34 = vadd.f32 %v907_v30, %v5975_v3  ;;  %v1314_v35 = vpack.c.bf16 %v5360_v18, %v5366_v29 }
 0x13d   : > { %v5370_v36 = vpop.eup %5369  ;;  %5395 = vpow2.f32 %v4449_v27  ;;  %4491 = vmatprep.mubr.msk.bf16.mxu1 %vm1422_vm2, %v1315_v31  ;;  %v909_v37 = vpop.f32.mrf.mxu0  ;;  %v1162_v50 = vadd.f32 1.0, %v5368_v32 }
 0x13e   : > { %v5372_v38 = vpop.eup %5371  ;;  %5397 = vrcp.f32 %v1158_v23  ;;  %v1163_v39 = vadd.f32 1.0, %v5370_v36  ;;  %v4451_v41 = vmul.f32 -1.442695, %v908_v34  ;;  %v910_v42 = vadd.f32 %v909_v37, %v5971_v2  ;;  %1518 = vmatmul.mubr.bf16.gmra.mxu1 %v1314_v35 }
 0x13f   : > { %v5374_v43 = vpop.eup %5373  ;;  %5399 = vpow2.f32 %v4450_v33  ;;  %v911_v44 = vpop.f32.mrf.mxu0 }
 0x140   : > { %v5376_v45 = vpop.eup %5375  ;;  %5401 = vrcp.f32 %v1163_v39  ;;  %v1164_v46 = vadd.f32 1.0, %v5374_v43  ;;  %v4452_v47 = vmul.f32 -1.442695, %v910_v42  ;;  %v912_v48 = vadd.f32 %v911_v44, %v5975_v3 }
 0x141   : > { %v5378_v49 = vpop.eup %5377  ;;  %5403 = vpow2.f32 %v4451_v41  ;;  %v915_v51 = vpop.f32.mrf.mxu0 }
 0x142   : > { %v5380_v52 = vpop.eup %5379  ;;  %5405 = vrcp.f32 %v1164_v46  ;;  %v1165_v53 = vadd.f32 1.0, %v5378_v49  ;;  %v4453_v54 = vmul.f32 -1.442695, %v912_v48  ;;  %v916_v55 = vadd.f32 %v915_v51, %v5971_v2 }
 0x143   : > { %v5382_v56 = vpop.eup %5381  ;;  %5407 = vpow2.f32 %v4452_v47  ;;  %v917_v57 = vpop.f32.mrf.mxu0  ;;  %v1317_v58 = vpack.c.bf16 %v5380_v52, %v5372_v38 }
 0x144   : > { %v5384_v59 = vpop.eup %5383  ;;  %5409 = vrcp.f32 %v1165_v53  ;;  %v4454_v60 = vmul.f32 -1.442695, %v916_v55  ;;  %v918_v61 = vadd.f32 %v917_v57, %v5975_v3  ;;  %v1316_v0 = vpack.c.bf16 %v5376_v45, %v5382_v56 }
 0x145   : > { %v5386_v4 = vpop.eup %5385  ;;  %5411 = vpow2.f32 %v4453_v54  ;;  %4492 = vmatprep.mubr.msk.bf16.mxu1 %vm1422_vm2, %v1317_v58  ;;  %v919_v5 = vpop.f32.mrf.mxu0  ;;  %v1166_v16 = vadd.f32 1.0, %v5384_v59 }
 0x146   : > { %v5388_v6 = vpop.eup %5387  ;;  %5413 = vrcp.f32 %v1162_v50  ;;  %v4455_v7 = vmul.f32 -1.442695, %v918_v61  ;;  %v920_v8 = vadd.f32 %v919_v5, %v5971_v2  ;;  %1526 = vmatmul.mubr.bf16.gmra.mxu1 %v1316_v0 }
 0x147   : > { %v5390_v9 = vpop.eup %5389  ;;  %v1167_v10 = vadd.f32 1.0, %v5388_v6  ;;  %5415 = vpow2.f32 %v4454_v60  ;;  %v921_v11 = vpop.f32.mrf.mxu0 }
 0x148   : > { %v5392_v12 = vpop.eup %5391  ;;  %5417 = vpow2.f32 %v4455_v7  ;;  %v4456_v13 = vmul.f32 -1.442695, %v920_v8  ;;  %v922_v14 = vadd.f32 %v921_v11, %v5975_v3 }
 0x149   : > { %v5394_v15 = vpop.eup %5393  ;;  %5419 = vrcp.f32 %v1167_v10  ;;  %v1168_v17 = vadd.f32 1.0, %v5392_v12  ;;  %v925_v18 = vpop.f32.mrf.mxu0 }
 0x14a   : > { %v5396_v19 = vpop.eup %5395  ;;  %5421 = vpow2.f32 %v4456_v13  ;;  %v4457_v20 = vmul.f32 -1.442695, %v922_v14  ;;  %v926_v21 = vadd.f32 %v925_v18, %v5971_v2  ;;  %v1319_v22 = vpack.c.bf16 %v5394_v15, %v5386_v4 }
 0x14b   : > { %v5398_v23 = vpop.eup %5397  ;;  %5423 = vrcp.f32 %v1168_v17  ;;  %v1169_v24 = vadd.f32 1.0, %v5396_v19  ;;  %v927_v25 = vpop.f32.mrf.mxu0 }
 0x14c   : > { %v5400_v26 = vpop.eup %5399  ;;  %5425 = vpow2.f32 %v4457_v20  ;;  %v4458_v27 = vmul.f32 -1.442695, %v926_v21  ;;  %v928_v28 = vadd.f32 %v927_v25, %v5975_v3  ;;  %4493 = vmatprep.mubr.msk.bf16.mxu1 %vm1422_vm2, %v1319_v22  ;;  %v1318_v29 = vpack.c.bf16 %v5390_v9, %v5398_v23 }
 0x14d   : > { %v5402_v30 = vpop.eup %5401  ;;  %5427 = vrcp.f32 %v1169_v24  ;;  %v929_v31 = vpop.f32.mrf.mxu0  ;;  %v1170_v43 = vadd.f32 1.0, %v5400_v26 }
 0x14e   : > { %v5404_v32 = vpop.eup %5403  ;;  %5429 = vrcp.f32 %v1166_v16  ;;  %v4459_v33 = vmul.f32 -1.442695, %v928_v28  ;;  %v930_v34 = vadd.f32 %v929_v31, %v5971_v2  ;;  %1534 = vmatmul.mubr.bf16.gmra.mxu1 %v1318_v29 }
 0x14f   : > { %v5406_v35 = vpop.eup %5405  ;;  %v1171_v36 = vadd.f32 1.0, %v5404_v32  ;;  %5431 = vpow2.f32 %v4458_v27  ;;  %v931_v37 = vpop.f32.mrf.mxu0 }
 0x150   : > { %v5408_v38 = vpop.eup %5407  ;;  %5433 = vpow2.f32 %v4459_v33  ;;  %v4460_v39 = vmul.f32 -1.442695, %v930_v34  ;;  %v932_v41 = vadd.f32 %v931_v37, %v5975_v3 }
 0x151   : > { %v5410_v42 = vpop.eup %5409  ;;  %5435 = vrcp.f32 %v1171_v36  ;;  %v1172_v44 = vadd.f32 1.0, %v5408_v38  ;;  %v935_v45 = vpop.f32.mrf.mxu0 }
 0x152   : > { %v5412_v46 = vpop.eup %5411  ;;  %5437 = vpow2.f32 %v4460_v39  ;;  %v4461_v47 = vmul.f32 -1.442695, %v932_v41  ;;  %v936_v48 = vadd.f32 %v935_v45, %v5971_v2  ;;  %v1321_v49 = vpack.c.bf16 %v5410_v42, %v5402_v30 }
 0x153   : > { %v5414_v50 = vpop.eup %5413  ;;  %5439 = vrcp.f32 %v1172_v44  ;;  %v1173_v51 = vadd.f32 1.0, %v5412_v46  ;;  %v937_v52 = vpop.f32.mrf.mxu0 }
 0x154   : > { %v5416_v53 = vpop.eup %5415  ;;  %5441 = vpow2.f32 %v4461_v47  ;;  %v4462_v54 = vmul.f32 -1.442695, %v936_v48  ;;  %v938_v55 = vadd.f32 %v937_v52, %v5975_v3  ;;  %4494 = vmatprep.mubr.msk.bf16.mxu1 %vm1422_vm2, %v1321_v49  ;;  %v1320_v56 = vpack.c.bf16 %v5406_v35, %v5414_v50 }
 0x155   : > { %v5418_v57 = vpop.eup %5417  ;;  %5443 = vrcp.f32 %v1173_v51  ;;  %v939_v58 = vpop.f32.mrf.mxu0  ;;  %v1174_v11 = vadd.f32 1.0, %v5416_v53 }
 0x156   : > { %v5420_v59 = vpop.eup %5419  ;;  %5445 = vrcp.f32 %v1170_v43  ;;  %v1175_v60 = vadd.f32 1.0, %v5418_v57  ;;  %v4463_v61 = vmul.f32 -1.442695, %v938_v55  ;;  %v940_v0 = vadd.f32 %v939_v58, %v5971_v2  ;;  %1542 = vmatmul.mubr.bf16.gmra.mxu1 %v1320_v56 }
 0x157   : > { %v5422_v4 = vpop.eup %5421  ;;  %5447 = vpow2.f32 %v4462_v54  ;;  %v941_v5 = vpop.f32.mrf.mxu0 }
 0x158   : > { %v5424_v6 = vpop.eup %5423  ;;  %5449 = vrcp.f32 %v1175_v60  ;;  %v1176_v7 = vadd.f32 1.0, %v5422_v4  ;;  %v4464_v8 = vmul.f32 -1.442695, %v940_v0  ;;  %v942_v9 = vadd.f32 %v941_v5, %v5975_v3 }
 0x159   : > { %v5426_v10 = vpop.eup %5425  ;;  %5451 = vpow2.f32 %v4463_v61  ;;  %v945_v12 = vpop.f32.mrf.mxu0 }
 0x15a   : > { %v5428_v13 = vpop.eup %5427  ;;  %5453 = vrcp.f32 %v1176_v7  ;;  %v1177_v14 = vadd.f32 1.0, %v5426_v10  ;;  %v4465_v15 = vmul.f32 -1.442695, %v942_v9  ;;  %v946_v16 = vadd.f32 %v945_v12, %v5971_v2 }
 0x15b   : > { %v5430_v17 = vpop.eup %5429  ;;  %5455 = vpow2.f32 %v4464_v8  ;;  %v947_v18 = vpop.f32.mrf.mxu0  ;;  %v1323_v19 = vpack.c.bf16 %v5428_v13, %v5420_v59 }
 0x15c   : > { %v5432_v20 = vpop.eup %5431  ;;  %5457 = vrcp.f32 %v1177_v14  ;;  %v4466_v21 = vmul.f32 -1.442695, %v946_v16  ;;  %v948_v22 = vadd.f32 %v947_v18, %v5975_v3  ;;  %v1322_v23 = vpack.c.bf16 %v5424_v6, %v5430_v17 }
 0x15d   : > { %v5434_v24 = vpop.eup %5433  ;;  %5459 = vpow2.f32 %v4465_v15  ;;  %4495 = vmatprep.mubr.msk.bf16.mxu1 %vm1422_vm2, %v1323_v19  ;;  %v949_v25 = vpop.f32.mrf.mxu0  ;;  %v1178_v37 = vadd.f32 1.0, %v5432_v20 }
 0x15e   : > { %v5436_v26 = vpop.eup %5435  ;;  %5461 = vrcp.f32 %v1174_v11  ;;  %v1179_v27 = vadd.f32 1.0, %v5434_v24  ;;  %v4467_v28 = vmul.f32 -1.442695, %v948_v22  ;;  %v950_v29 = vadd.f32 %v949_v25, %v5971_v2  ;;  %1550 = vmatmul.mubr.bf16.gmra.mxu1 %v1322_v23 }
 0x15f   : > { %v5438_v30 = vpop.eup %5437  ;;  %5463 = vpow2.f32 %v4466_v21  ;;  %v951_v31 = vpop.f32.mrf.mxu0 }
 0x160   : > { %v5440_v32 = vpop.eup %5439  ;;  %5465 = vrcp.f32 %v1179_v27  ;;  %v1180_v33 = vadd.f32 1.0, %v5438_v30  ;;  %v4468_v34 = vmul.f32 -1.442695, %v950_v29  ;;  %v952_v35 = vadd.f32 %v951_v31, %v5975_v3 }
 0x161   : > { %v5442_v36 = vpop.eup %5441  ;;  %5467 = vpow2.f32 %v4467_v28  ;;  %v955_v38 = vpop.f32.mrf.mxu0 }
 0x162   : > { %v5444_v39 = vpop.eup %5443  ;;  %5469 = vrcp.f32 %v1180_v33  ;;  %v1181_v41 = vadd.f32 1.0, %v5442_v36  ;;  %v4469_v42 = vmul.f32 -1.442695, %v952_v35  ;;  %v956_v43 = vadd.f32 %v955_v38, %v5971_v2 }
 0x163   : > { %v5446_v44 = vpop.eup %5445  ;;  %5471 = vpow2.f32 %v4468_v34  ;;  %v957_v45 = vpop.f32.mrf.mxu0  ;;  %v1325_v46 = vpack.c.bf16 %v5444_v39, %v5436_v26 }
 0x164   : > { %v5448_v47 = vpop.eup %5447  ;;  %5473 = vrcp.f32 %v1181_v41  ;;  %v4470_v48 = vmul.f32 -1.442695, %v956_v43  ;;  %v958_v49 = vadd.f32 %v957_v45, %v5975_v3  ;;  %v1324_v50 = vpack.c.bf16 %v5440_v32, %v5446_v44 }
 0x165   : > { %v5450_v51 = vpop.eup %5449  ;;  %5475 = vpow2.f32 %v4469_v42  ;;  %4496 = vmatprep.mubr.msk.bf16.mxu1 %vm1422_vm2, %v1325_v46  ;;  %v959_v52 = vpop.f32.mrf.mxu0  ;;  %v1182_v4 = vadd.f32 1.0, %v5448_v47 }
 0x166   : > { %v5452_v53 = vpop.eup %5451  ;;  %5477 = vrcp.f32 %v1178_v37  ;;  %v4471_v54 = vmul.f32 -1.442695, %v958_v49  ;;  %v960_v55 = vadd.f32 %v959_v52, %v5971_v2  ;;  %1558 = vmatmul.mubr.bf16.gmra.mxu1 %v1324_v50 }
 0x167   : > { %v5454_v56 = vpop.eup %5453  ;;  %v1183_v57 = vadd.f32 1.0, %v5452_v53  ;;  %5479 = vpow2.f32 %v4470_v48  ;;  %v961_v58 = vpop.f32.mrf.mxu0 }
 0x168   : > { %v5456_v59 = vpop.eup %5455  ;;  %5481 = vpow2.f32 %v4471_v54  ;;  %v4472_v60 = vmul.f32 -1.442695, %v960_v55  ;;  %v962_v61 = vadd.f32 %v961_v58, %v5975_v3 }
 0x169   : > { %v5458_v0 = vpop.eup %5457  ;;  %5483 = vrcp.f32 %v1183_v57  ;;  %v1184_v5 = vadd.f32 1.0, %v5456_v59  ;;  %v965_v6 = vpop.f32.mrf.mxu0 }
 0x16a   : > { %v5460_v7 = vpop.eup %5459  ;;  %5485 = vpow2.f32 %v4472_v60  ;;  %v4473_v8 = vmul.f32 -1.442695, %v962_v61  ;;  %v966_v9 = vadd.f32 %v965_v6, %v5971_v2  ;;  %v1327_v10 = vpack.c.bf16 %v5458_v0, %v5450_v51 }
 0x16b   : > { %v5462_v11 = vpop.eup %5461  ;;  %5487 = vrcp.f32 %v1184_v5  ;;  %v1185_v12 = vadd.f32 1.0, %v5460_v7  ;;  %v967_v13 = vpop.f32.mrf.mxu0 }
 0x16c   : > { %v5464_v14 = vpop.eup %5463  ;;  %5489 = vpow2.f32 %v4473_v8  ;;  %v4474_v15 = vmul.f32 -1.442695, %v966_v9  ;;  %v968_v16 = vadd.f32 %v967_v13, %v5975_v3  ;;  %4497 = vmatprep.mubr.msk.bf16.mxu1 %vm1422_vm2, %v1327_v10  ;;  %v1326_v17 = vpack.c.bf16 %v5454_v56, %v5462_v11 }
 0x16d   : > { %v5466_v18 = vpop.eup %5465  ;;  %5491 = vrcp.f32 %v1185_v12  ;;  %v969_v19 = vpop.f32.mrf.mxu0  ;;  %v1186_v32 = vadd.f32 1.0, %v5464_v14 }
 0x16e   : > { %v5468_v20 = vpop.eup %5467  ;;  %5493 = vrcp.f32 %v1182_v4  ;;  %v4475_v21 = vmul.f32 -1.442695, %v968_v16  ;;  %v970_v22 = vadd.f32 %v969_v19, %v5971_v2  ;;  %1566 = vmatmul.mubr.bf16.gmra.mxu1 %v1326_v17 }
 0x16f   : > { %v5470_v23 = vpop.eup %5469  ;;  %v1187_v24 = vadd.f32 1.0, %v5468_v20  ;;  %5495 = vpow2.f32 %v4474_v15  ;;  %v971_v25 = vpop.f32.mrf.mxu0 }
 0x170   : > { %v5472_v26 = vpop.eup %5471  ;;  %5497 = vpow2.f32 %v4475_v21  ;;  %v4476_v27 = vmul.f32 -1.442695, %v970_v22  ;;  %v972_v28 = vadd.f32 %v971_v25, %v5975_v3  ;;  %v5078_v21 = vld [vmem:[%s7028_s4 + $0x4] ss:$8 sps:$4 sm:$0xff]  }
 0x171   : > { %v5474_v29 = vpop.eup %5473  ;;  %5499 = vrcp.f32 %v1187_v24  ;;  %v1188_v30 = vadd.f32 1.0, %v5472_v26  ;;  %4553 = vmatprep.mubr.msk.bf16.mxu0 %vm1903_vm3, %v5078_v21 }
 0x172   : > { %v5476_v31 = vpop.eup %5475  ;;  %5501 = vpow2.f32 %v4476_v27  ;;  %v4477_v33 = vmul.f32 -1.442695, %v972_v28  ;;  %v1329_v34 = vpack.c.bf16 %v5474_v29, %v5466_v18 }
 0x173   : > { %v5478_v35 = vpop.eup %5477  ;;  %5503 = vrcp.f32 %v1188_v30  ;;  %v1189_v2 = vadd.f32 1.0, %v5476_v31 }
 0x174   : > { %v5480_v36 = vpop.eup %5479  ;;  %5505 = vpow2.f32 %v4477_v33  ;;  %4498 = vmatprep.mubr.msk.bf16.mxu1 %vm1422_vm2, %v1329_v34  ;;  %v1328_v37 = vpack.c.bf16 %v5470_v23, %v5478_v35 }
 0x175   : > { %v5482_v38 = vpop.eup %5481  ;;  %5507 = vrcp.f32 %v1189_v2  ;;  %v1190_v46 = vadd.f32 1.0, %v5480_v36 }
 0x176   : > { %v5484_v39 = vpop.eup %5483  ;;  %5509 = vrcp.f32 %v1186_v32  ;;  %v1191_v3 = vadd.f32 1.0, %v5482_v38  ;;  %1574 = vmatmul.mubr.bf16.gmra.mxu1 %v1328_v37 }
 0x177   : > { %v5486_v41 = vpop.eup %5485 }
 0x178   : > { %v5488_v42 = vpop.eup %5487  ;;  %v1192_v43 = vadd.f32 1.0, %v5486_v41  ;;  %5511 = vrcp.f32 %v1191_v3 }
 0x179   : > { %v5490_v44 = vpop.eup %5489 }
 0x17a   : > { %v5492_v45 = vpop.eup %5491  ;;  %v1193_v47 = vadd.f32 1.0, %v5490_v44  ;;  %5513 = vrcp.f32 %v1192_v43 }
 0x17b   : > { %v5494_v48 = vpop.eup %5493  ;;  %v1331_v49 = vpack.c.bf16 %v5492_v45, %v5484_v39 }
 0x17c   : > { %v5496_v50 = vpop.eup %5495  ;;  %5515 = vrcp.f32 %v1193_v47  ;;  %v1330_v51 = vpack.c.bf16 %v5488_v42, %v5494_v48 }
 0x17d   : > { %v5498_v52 = vpop.eup %5497  ;;  %4499 = vmatprep.mubr.msk.bf16.mxu1 %vm1422_vm2, %v1331_v49  ;;  %5517 = vrcp.f32 %v1190_v46  ;;  %v1194_v60 = vadd.f32 1.0, %v5496_v50 }
 0x17e   : > { %v5500_v53 = vpop.eup %5499  ;;  %v1195_v54 = vadd.f32 1.0, %v5498_v52  ;;  %1582 = vmatmul.mubr.bf16.gmra.mxu1 %v1330_v51 }
 0x17f   : > { %v5502_v55 = vpop.eup %5501 }
 0x180   : > { %v5504_v56 = vpop.eup %5503  ;;  %v1196_v57 = vadd.f32 1.0, %v5502_v55  ;;  %5519 = vrcp.f32 %v1195_v54 }
 0x181   : > { %v5506_v58 = vpop.eup %5505 }
 0x182   : > { %v5508_v59 = vpop.eup %5507  ;;  %v1197_v61 = vadd.f32 1.0, %v5506_v58  ;;  %5521 = vrcp.f32 %v1196_v57 }
 0x183   : > { %v5510_v0 = vpop.eup %5509  ;;  %v1333_v4 = vpack.c.bf16 %v5508_v59, %v5500_v53 }
 0x184   : > { %5523 = vrcp.f32 %v1197_v61  ;;  %v1332_v5 = vpack.c.bf16 %v5504_v56, %v5510_v0 }
 0x185   : > { %4500 = vmatprep.mubr.msk.bf16.mxu1 %vm1422_vm2, %v1333_v4  ;;  %5525 = vrcp.f32 %v1194_v60  ;;  %v5512_v6 = vpop.eup %5511 }
 0x186   : > { %1590 = vmatmul.mubr.bf16.gmra.mxu1 %v1332_v5 }
 0x187   : > { %v5514_v7 = vpop.eup %5513 }
 0x189   : > { %v5516_v8 = vpop.eup %5515 }
 0x18a   : > { %v1335_v9 = vpack.c.bf16 %v5516_v8, %v5512_v6  ;;  %v5518_v10 = vpop.eup %5517 }
 0x18b   : > { %v1334_v11 = vpack.c.bf16 %v5514_v7, %v5518_v10 }
 0x18c   : > { %4501 = vmatprep.mubr.msk.bf16.mxu1 %vm1422_vm2, %v1335_v9 }
 0x18d   : > { %v5520_v12 = vpop.eup %5519 }
 0x18e   : > { %1598 = vmatmul.mubr.bf16.gmra.mxu1 %v1334_v11 }
 0x18f   : > { %v5522_v13 = vpop.eup %5521 }
 0x191   : > { %v5524_v14 = vpop.eup %5523 }
 0x192   : > { %v1337_v15 = vpack.c.bf16 %v5524_v14, %v5520_v12  ;;  %v5526_v16 = vpop.eup %5525 }
 0x193   : > { %v1336_v17 = vpack.c.bf16 %v5522_v13, %v5526_v16 }
 0x194   : > { %4502 = vmatprep.mubr.msk.bf16.mxu1 %vm1422_vm2, %v1337_v15 }
 0x196   : > { %1606 = vmatmul.mubr.bf16.gmra.mxu1 %v1336_v17 }
 0x197   : > { %2355 = vmatprep.mubr.bf16.mxu1 %v5681_v40 }
 0x1ed   : > { %v6048_v18 = vpop.f32.mrf.mxu1 }
 0x1ef   : > { %v1505_v19 = vpop.f32.mrf.mxu1 }
 0x1f1   : > { %v6050_v20 = vpop.f32.mrf.mxu1 }
 0x1f2   : > { %v1664_v22 = vpack.c.bf16 %v6050_v20, %v6048_v18 }
 0x1f3   : > { %v1508_v23 = vpop.f32.mrf.mxu1 }
 0x1f5   : > { %v1511_v24 = vpop.f32.mrf.mxu1 }
 0x1f7   : > { %v1513_v25 = vpop.f32.mrf.mxu1 }
 0x1f9   : > { %v1514_v26 = vpop.f32.mrf.mxu1 }
 0x1fa   : > { %v1665_v27 = vpack.c.bf16 %v1514_v26, %v1511_v24 }
 0x1fb   : > { %v1516_v28 = vpop.f32.mrf.mxu1 }
 0x1fe   : > { %v1519_v29 = vpop.f32.mrf.mxu1 }
 0x200   : > { %v1521_v30 = vpop.f32.mrf.mxu1 }
 0x201   : > { %v5079_v30 = vld [vmem:[%s7028_s4 + $0x14] ss:$8 sps:$4 sm:$0xff]  }
 0x202   : > { %v1522_v31 = vpop.f32.mrf.mxu1 }
 0x203   : > { %v1666_v7 = vpack.c.bf16 %v1522_v31, %v1519_v29  ;;  %v5076_v29 = vld [vmem:[%s7028_s4] ss:$8 sps:$4 sm:$0xff]   ;;  %v5081_v31 = vld [vmem:[%s7028_s4 + $0x10] ss:$8 sps:$4 sm:$0xff]  }
 0x204   : > { %v1524_v32 = vpop.f32.mrf.mxu1 }
 0x205   : > { %v5082_v32 = vld [vmem:[%s7028_s4 + $0x24] ss:$8 sps:$4 sm:$0xff]  }
 0x206   : > { %v1527_v33 = vpop.f32.mrf.mxu1 }
 0x208   : > { %v1529_v34 = vpop.f32.mrf.mxu1 }
 0x209   : > { %v5085_v34 = vld [vmem:[%s7028_s4 + $0x34] ss:$8 sps:$4 sm:$0xff]  }
 0x20a   : > { %v1530_v35 = vpop.f32.mrf.mxu1 }
 0x20b   : > { %v1667_v4 = vpack.c.bf16 %v1530_v35, %v1527_v33  ;;  %v5084_v33 = vld [vmem:[%s7028_s4 + $0x20] ss:$8 sps:$4 sm:$0xff]   ;;  %v5087_v35 = vld [vmem:[%s7028_s4 + $0x30] ss:$8 sps:$4 sm:$0xff]  }
 0x20c   : > { %v1532_v2 = vpop.f32.mrf.mxu1 }
 0x20d   : > { %v5088_v2 = vld [vmem:[%s7028_s4 + $0x44] ss:$8 sps:$4 sm:$0xff]  }
 0x20e   : > { %v1535_v36 = vpop.f32.mrf.mxu1 }
 0x210   : > { %v1537_v37 = vpop.f32.mrf.mxu1 }
 0x211   : > { %v5091_v37 = vld [vmem:[%s7028_s4 + $0x54] ss:$8 sps:$4 sm:$0xff]  }
 0x212   : > { %v1538_v38 = vpop.f32.mrf.mxu1 }
 0x213   : > { %v1668_v60 = vpack.c.bf16 %v1538_v38, %v1535_v36  ;;  %v5090_v36 = vld [vmem:[%s7028_s4 + $0x40] ss:$8 sps:$4 sm:$0xff]   ;;  %v5093_v38 = vld [vmem:[%s7028_s4 + $0x50] ss:$8 sps:$4 sm:$0xff]  }
 0x214   : > { %v1540_v39 = vpop.f32.mrf.mxu1 }
 0x215   : > { %v5094_v39 = vld [vmem:[%s7028_s4 + $0x64] ss:$8 sps:$4 sm:$0xff]  }
 0x216   : > { %v1543_v3 = vpop.f32.mrf.mxu1 }
 0x218   : > { %v1545_v41 = vpop.f32.mrf.mxu1 }
 0x219   : > { %v5097_v41 = vld [vmem:[%s7028_s4 + $0x74] ss:$8 sps:$4 sm:$0xff]  }
 0x21a   : > { %v1546_v42 = vpop.f32.mrf.mxu1 }
 0x21b   : > { %v1669_v57 = vpack.c.bf16 %v1546_v42, %v1543_v3  ;;  %v5096_v3 = vld [vmem:[%s7028_s4 + $0x60] ss:$8 sps:$4 sm:$0xff]   ;;  %v5099_v42 = vld [vmem:[%s7028_s4 + $0x70] ss:$8 sps:$4 sm:$0xff]  }
 0x21c   : > { %v1548_v43 = vpop.f32.mrf.mxu1 }
 0x21d   : > { %v5100_v43 = vld [vmem:[%s7028_s4 + $0x84] ss:$8 sps:$4 sm:$0xff]  }
 0x21e   : > { %v1551_v44 = vpop.f32.mrf.mxu1 }
 0x220   : > { %v1553_v45 = vpop.f32.mrf.mxu1 }
 0x221   : > { %v5103_v45 = vld [vmem:[%s7028_s4 + $0x94] ss:$8 sps:$4 sm:$0xff]  }
 0x222   : > { %v1554_v46 = vpop.f32.mrf.mxu1 }
 0x223   : > { %v1670_v54 = vpack.c.bf16 %v1554_v46, %v1551_v44  ;;  %v5102_v44 = vld [vmem:[%s7028_s4 + $0x80] ss:$8 sps:$4 sm:$0xff]   ;;  %v5105_v46 = vld [vmem:[%s7028_s4 + $0x90] ss:$8 sps:$4 sm:$0xff]  }
 0x224   : > { %v1556_v47 = vpop.f32.mrf.mxu1 }
 0x225   : > { %v5106_v47 = vld [vmem:[%s7028_s4 + $0xa4] ss:$8 sps:$4 sm:$0xff]  }
 0x226   : > { %v1559_v48 = vpop.f32.mrf.mxu1 }
 0x228   : > { %v1561_v49 = vpop.f32.mrf.mxu1 }
 0x229   : > { %v5109_v49 = vld [vmem:[%s7028_s4 + $0xb4] ss:$8 sps:$4 sm:$0xff]  }
 0x22a   : > { %v1562_v50 = vpop.f32.mrf.mxu1 }
 0x22b   : > { %v1671_v51 = vpack.c.bf16 %v1562_v50, %v1559_v48  ;;  %v5108_v48 = vld [vmem:[%s7028_s4 + $0xa0] ss:$8 sps:$4 sm:$0xff]   ;;  %v5111_v50 = vld [vmem:[%s7028_s4 + $0xb0] ss:$8 sps:$4 sm:$0xff]  }
 0x22c   : > { %v1564_v52 = vpop.f32.mrf.mxu1 }
 0x22d   : > { %1980 = vmatpush1.bf16.msra.mxu0 %v1671_v51  ;;  %v4588_v51 = vld [vmem:[%s7029_s5 + $0xa8] sm:$0x33] }
 0x22e   : > { %v1567_v53 = vpop.f32.mrf.mxu1  ;;  %1981 = vmatprep.subr.bf16.mxu0 %v5681_v40  ;;  %v5112_v52 = vld [vmem:[%s7028_s4 + $0xc4] ss:$8 sps:$4 sm:$0xff]  }
 0x230   : > { %v1569_v55 = vpop.f32.mrf.mxu1 }
 0x231   : > { %1982 = vmatpush1.bf16.msra.mxu0 %v1670_v54  ;;  %v4599_v54 = vcombine.low %v4588_v51, %v4588_v51 }
 0x232   : > { %v1570_v56 = vpop.f32.mrf.mxu1  ;;  %1983 = vmatprep.subr.bf16.mxu0 %v5681_v40 }
 0x233   : > { %v1672_v28 = vpack.c.bf16 %v1570_v56, %v1567_v53  ;;  %v4600_v53 = vcombine.high %v4588_v51, %v4588_v51  ;;  %v2318_v55 = vsel %vm2316_vm4, %v4599_v54, 0  ;;  %v5152_v56 = vld [vmem:[%s7029_s5 + $0x9c] ss:$8 sps:$4 sm:$0xff]  }
 0x234   : > { %v1572_v58 = vpop.f32.mrf.mxu1 }
 0x235   : > { %1984 = vmatpush1.bf16.msra.mxu0 %v1669_v57  ;;  %4601 = vmatprep.subr.msk.bf16.mxu1 %vm2316_vm4, %v4600_v53  ;;  %v5150_v57 = vld [vmem:[%s7029_s5 + $0x98] ss:$8 sps:$4 sm:$0xff]  }
 0x236   : > { %v1575_v59 = vpop.f32.mrf.mxu1  ;;  %1985 = vmatprep.subr.bf16.mxu0 %v5681_v40  ;;  %2328 = vmatpush1.bf16.msra.mxu1 %v2318_v55  ;;  %v5114_v58 = vld [vmem:[%s7028_s4 + $0xc0] ss:$8 sps:$4 sm:$0xff]  }
 0x237   : > { %2329 = vmatprep.subr.bf16.mxu1 %v5152_v56 }
 0x238   : > { %v1577_v61 = vpop.f32.mrf.mxu1 }
 0x239   : > { %1986 = vmatpush1.bf16.msra.mxu0 %v1668_v60  ;;  %v5155_v60 = vld [vmem:[%s7029_s5 + $0x8c] ss:$8 sps:$4 sm:$0xff]   ;;  %v5153_v61 = vld [vmem:[%s7029_s5 + $0x88] ss:$8 sps:$4 sm:$0xff]  }
 0x23a   : > { %v1578_v0 = vpop.f32.mrf.mxu1  ;;  %1987 = vmatprep.subr.bf16.mxu0 %v5681_v40  ;;  %2330 = vmatpush1.bf16.msra.mxu1 %v5150_v57 }
 0x23b   : > { %2331 = vmatprep.subr.bf16.mxu1 %v5155_v60 }
 0x23c   : > { %v1580_v5 = vpop.f32.mrf.mxu1 }
 0x23d   : > { %1988 = vmatpush1.bf16.msra.mxu0 %v1667_v4  ;;  %v5159_v4 = vld [vmem:[%s7029_s5 + $0x78] ss:$8 sps:$4 sm:$0xff]  }
 0x23e   : > { %v1583_v6 = vpop.f32.mrf.mxu1  ;;  %1989 = vmatprep.subr.bf16.mxu0 %v5681_v40  ;;  %2332 = vmatpush1.bf16.msra.mxu1 %v5153_v61  ;;  %v5117_v5 = vld [vmem:[%s7028_s4 + $0xd0] ss:$8 sps:$4 sm:$0xff]  }
 0x240   : > { %v1585_v8 = vpop.f32.mrf.mxu1 }
 0x241   : > { %1990 = vmatpush1.bf16.msra.mxu0 %v1666_v7  ;;  %v5164_v7 = vld [vmem:[%s7029_s5 + $0x6c] ss:$8 sps:$4 sm:$0xff]   ;;  %v5162_v8 = vld [vmem:[%s7029_s5 + $0x68] ss:$8 sps:$4 sm:$0xff]  }
 0x242   : > { %v1586_v9 = vpop.f32.mrf.mxu1  ;;  %1991 = vmatprep.subr.bf16.mxu0 %v5681_v40 }
 0x243   : > { %v1674_v20 = vpack.c.bf16 %v1586_v9, %v1583_v6  ;;  %v5118_v6 = vld [vmem:[%s7028_s4 + $0xe4] ss:$8 sps:$4 sm:$0xff]  }
 0x244   : > { %v1588_v10 = vpop.f32.mrf.mxu1  ;;  %v5167_v9 = vld [vmem:[%s7029_s5 + $0x5c] ss:$8 sps:$4 sm:$0xff]  }
 0x245   : > { %1992 = vmatpush1.bf16.msra.mxu0 %v1665_v27  ;;  %v5165_v10 = vld [vmem:[%s7029_s5 + $0x58] ss:$8 sps:$4 sm:$0xff]  }
 0x246   : > { %v1591_v11 = vpop.f32.mrf.mxu1  ;;  %1993 = vmatprep.subr.bf16.mxu0 %v5681_v40 }
 0x248   : > { %v1593_v12 = vpop.f32.mrf.mxu1 }
 0x249   : > { %1994 = vmatpush1.bf16.msra.mxu0 %v1664_v22  ;;  %v1673_v22 = vpack.c.bf16 %v1578_v0, %v1575_v59  ;;  %v5115_v59 = vld [vmem:[%s7028_s4 + $0xd4] ss:$8 sps:$4 sm:$0xff]  }
 0x24a   : > { %v1594_v13 = vpop.f32.mrf.mxu1  ;;  %1999 = vmatprep.subr.bf16.mxu0 %v5681_v40  ;;  %v5161_v0 = vld [vmem:[%s7029_s5 + $0x7c] ss:$8 sps:$4 sm:$0xff]  }
 0x24b   : > { %v1675_v18 = vpack.c.bf16 %v1594_v13, %v1591_v11  ;;  %2333 = vmatprep.subr.bf16.mxu1 %v5161_v0  ;;  %v5120_v11 = vld [vmem:[%s7028_s4 + $0xe0] ss:$8 sps:$4 sm:$0xff]   ;;  %v5121_v12 = vld [vmem:[%s7028_s4 + $0xf4] ss:$8 sps:$4 sm:$0xff]   ;;  %v5123_v13 = vld [vmem:[%s7028_s4 + $0xf0] ss:$8 sps:$4 sm:$0xff]  }
 0x24c   : > { %v1596_v14 = vpop.f32.mrf.mxu1  ;;  %2334 = vmatpush1.bf16.msra.mxu1 %v5159_v4 }
 0x24d   : > { %2335 = vmatprep.subr.bf16.mxu1 %v5164_v7  ;;  %v5124_v14 = vld [vmem:[%s7028_s4 + $0x104] ss:$8 sps:$4 sm:$0xff]  }
 0x24e   : > { %v1599_v15 = vpop.f32.mrf.mxu1 }
 0x250   : > { %v1601_v16 = vpop.f32.mrf.mxu1  ;;  %2336 = vmatpush1.bf16.msra.mxu1 %v5162_v8  ;;  %v5170_v8 = vld [vmem:[%s7029_s5 + $0x40] ss:$8 sps:$4 sm:$0xff]  }
 0x251   : > { %2337 = vmatprep.subr.bf16.mxu1 %v5167_v9  ;;  %v6227_v16 = vld [vmem:[%s7029_s5 + $0x50] sm:$0x33] }
 0x252   : > { %v1602_v17 = vpop.f32.mrf.mxu1  ;;  %v5175_v9 = vld [vmem:[%s7029_s5 + $0x34] ss:$8 sps:$4 sm:$0xff]  }
 0x253   : > { %v1676_v27 = vpack.c.bf16 %v1602_v17, %v1599_v15  ;;  %v5126_v15 = vld [vmem:[%s7028_s4 + $0x100] ss:$8 sps:$4 sm:$0xff]   ;;  %v5127_v17 = vld [vmem:[%s7028_s4 + $0x114] ss:$8 sps:$4 sm:$0xff]  }
 0x254   : > { %v1604_v19 = vpop.f32.mrf.mxu1  ;;  %2338 = vmatpush1.bf16.msra.mxu1 %v5165_v10 }
 0x255   : > { %v4618_v19 = vcombine.high %v6227_v16, %v6227_v16 }
 0x256   : > { %v1607_v21 = vpop.f32.mrf.mxu1 }
 0x257   : > { %4619 = vmatprep.subr.msk.bf16.mxu1 %vm2316_vm4, %v4618_v19  ;;  %v5181_v19 = vld [vmem:[%s7029_s5 + $0x14] ss:$8 sps:$4 sm:$0xff]  }
 0x258   : > { %v1609_v23 = vpop.f32.mrf.mxu1 }
 0x259   : > { %v5130_v23 = vld [vmem:[%s7028_s4 + $0x124] ss:$8 sps:$4 sm:$0xff]  }
 0x25a   : > { %v1610_v24 = vpop.f32.mrf.mxu1 }
 0x25b   : > { %v1677_v25 = vpack.c.bf16 %v1610_v24, %v1607_v21  ;;  %v5129_v21 = vld [vmem:[%s7028_s4 + $0x110] ss:$8 sps:$4 sm:$0xff]   ;;  %v5132_v24 = vld [vmem:[%s7028_s4 + $0x120] ss:$8 sps:$4 sm:$0xff]  }
 0x25c   : > { %v1612_v26 = vpop.f32.mrf.mxu1 }
 0x25d   : > { %2000 = vmatpush2.bf16.msra.mxu0 %v1677_v25  ;;  %v5133_v25 = vld [vmem:[%s7028_s4 + $0x134] ss:$8 sps:$4 sm:$0xff]   ;;  %v5135_v26 = vld [vmem:[%s7028_s4 + $0x130] ss:$8 sps:$4 sm:$0xff]  }
 0x25e   : > { %2001 = vmatprep.subr.bf16.mxu0 %v5681_v40 }
 0x261   : > { %2002 = vmatpush2.bf16.msra.mxu0 %v1676_v27  ;;  %v5136_v27 = vld [vmem:[%s7028_s4 + $0x144] ss:$8 sps:$4 sm:$0xff]  }
 0x262   : > { %2003 = vmatprep.subr.bf16.mxu0 %v5681_v40 }
 0x265   : > { %2004 = vmatpush2.bf16.msra.mxu0 %v1675_v18  ;;  %v5138_v18 = vld [vmem:[%s7028_s4 + $0x140] ss:$8 sps:$4 sm:$0xff]  }
 0x266   : > { %2005 = vmatprep.subr.bf16.mxu0 %v5681_v40 }
 0x269   : > { %2006 = vmatpush2.bf16.msra.mxu0 %v1674_v20  ;;  %v5139_v20 = vld [vmem:[%s7028_s4 + $0x154] ss:$8 sps:$4 sm:$0xff]  }
 0x26a   : > { %2007 = vmatprep.subr.bf16.mxu0 %v5681_v40 }
 0x26d   : > { %2008 = vmatpush2.bf16.msra.mxu0 %v1673_v22  ;;  %v5141_v22 = vld [vmem:[%s7028_s4 + $0x150] ss:$8 sps:$4 sm:$0xff]  }
 0x26e   : > { %2009 = vmatprep.subr.bf16.mxu0 %v5681_v40 }
 0x271   : > { %2010 = vmatpush2.bf16.msra.mxu0 %v1672_v28  ;;  %v5142_v28 = vld [vmem:[%s7028_s4 + $0x164] ss:$8 sps:$4 sm:$0xff]  }
 0x274   : > { %2012 = vmatmul.mubr.bf16.vlgmr.msra.gmra.mxu0 %v5076_v29  ;;  %v5144_v29 = vld [vmem:[%s7028_s4 + $0x160] ss:$8 sps:$4 sm:$0xff]  }
 0x275   : > { %4554 = vmatprep.mubr.msk.bf16.mxu0 %vm1903_vm3, %v5079_v30  ;;  %v5147_v30 = vld [vmem:[%s7028_s4 + $0x174] ss:$8 sps:$4 sm:$0xff]  }
 0x27c   : > { %2020 = vmatmul.mubr.bf16.gmra.mxu0 %v5081_v31  ;;  %v5149_v31 = vld [vmem:[%s7028_s4 + $0x170] ss:$8 sps:$4 sm:$0xff]  }
 0x27d   : > { %4555 = vmatprep.mubr.msk.bf16.mxu0 %vm1903_vm3, %v5082_v32  ;;  %v5156_v32 = vld [vmem:[%s7028_s4 + $0x184] ss:$8 sps:$4 sm:$0xff]  }
 0x284   : > { %2028 = vmatmul.mubr.bf16.gmra.mxu0 %v5084_v33  ;;  %v5158_v33 = vld [vmem:[%s7028_s4 + $0x180] ss:$8 sps:$4 sm:$0xff]  }
 0x285   : > { %4556 = vmatprep.mubr.msk.bf16.mxu0 %vm1903_vm3, %v5085_v34 }
 0x28c   : > { %2036 = vmatmul.mubr.bf16.gmra.mxu0 %v5087_v35 }
 0x28d   : > { %4557 = vmatprep.mubr.msk.bf16.mxu0 %vm1903_vm3, %v5088_v2 }
 0x294   : > { %2044 = vmatmul.mubr.bf16.gmra.mxu0 %v5090_v36 }
 0x295   : > { %4558 = vmatprep.mubr.msk.bf16.mxu0 %vm1903_vm3, %v5091_v37 }
 0x29c   : > { %2052 = vmatmul.mubr.bf16.gmra.mxu0 %v5093_v38 }
 0x29d   : > { %4559 = vmatprep.mubr.msk.bf16.mxu0 %vm1903_vm3, %v5094_v39 }
 0x2a4   : > { %2060 = vmatmul.mubr.bf16.gmra.mxu0 %v5096_v3 }
 0x2a5   : > { %4560 = vmatprep.mubr.msk.bf16.mxu0 %vm1903_vm3, %v5097_v41 }
 0x2ac   : > { %2068 = vmatmul.mubr.bf16.gmra.mxu0 %v5099_v42 }
 0x2ad   : > { %4561 = vmatprep.mubr.msk.bf16.mxu0 %vm1903_vm3, %v5100_v43 }
 0x2b4   : > { %2076 = vmatmul.mubr.bf16.gmra.mxu0 %v5102_v44 }
 0x2b5   : > { %4562 = vmatprep.mubr.msk.bf16.mxu0 %vm1903_vm3, %v5103_v45 }
 0x2bc   : > { %2084 = vmatmul.mubr.bf16.gmra.mxu0 %v5105_v46 }
 0x2bd   : > { %4563 = vmatprep.mubr.msk.bf16.mxu0 %vm1903_vm3, %v5106_v47 }
 0x2c4   : > { %2092 = vmatmul.mubr.bf16.gmra.mxu0 %v5108_v48 }
 0x2c5   : > { %4564 = vmatprep.mubr.msk.bf16.mxu0 %vm1903_vm3, %v5109_v49 }
 0x2cc   : > { %2100 = vmatmul.mubr.bf16.gmra.mxu0 %v5111_v50 }
 0x2cd   : > { %4565 = vmatprep.mubr.msk.bf16.mxu0 %vm1903_vm3, %v5112_v52 }
 0x2d4   : > { %2108 = vmatmul.mubr.bf16.gmra.mxu0 %v5114_v58 }
 0x2d5   : > { %4566 = vmatprep.mubr.msk.bf16.mxu0 %vm1903_vm3, %v5115_v59  ;;  %v4617_v59 = vcombine.low %v6227_v16, %v6227_v16 }
 0x2d7   : > { %v2477_v4 = vsel %vm2316_vm4, %v4617_v59, 0  ;;  %v5187_v59 = vld [vmem:[%s7029_s5 + $0xf0] ss:$8 sps:$4 sm:$0xff]  }
 0x2dc   : > { %2116 = vmatmul.mubr.bf16.gmra.mxu0 %v5117_v5  ;;  %v5172_v5 = vld [vmem:[%s7029_s5 + $0x44] ss:$8 sps:$4 sm:$0xff]  }
 0x2dd   : > { %4567 = vmatprep.mubr.msk.bf16.mxu0 %vm1903_vm3, %v5118_v6 }
 0x2e4   : > { %2124 = vmatmul.mubr.bf16.gmra.mxu0 %v5120_v11 }
 0x2e5   : > { %4568 = vmatprep.mubr.msk.bf16.mxu0 %vm1903_vm3, %v5121_v12  ;;  %v5173_v12 = vld [vmem:[%s7029_s5 + $0x30] ss:$8 sps:$4 sm:$0xff]  }
 0x2ec   : > { %2132 = vmatmul.mubr.bf16.gmra.mxu0 %v5123_v13 }
 0x2ed   : > { %4569 = vmatprep.mubr.msk.bf16.mxu0 %vm1903_vm3, %v5124_v14  ;;  %v5178_v14 = vld [vmem:[%s7029_s5 + $0x24] ss:$8 sps:$4 sm:$0xff]  }
 0x2f4   : > { %2140 = vmatmul.mubr.bf16.gmra.mxu0 %v5126_v15 }
 0x2f5   : > { %4570 = vmatprep.mubr.msk.bf16.mxu0 %vm1903_vm3, %v5127_v17  ;;  %v5176_v17 = vld [vmem:[%s7029_s5 + $0x20] ss:$8 sps:$4 sm:$0xff]  }
 0x2fc   : > { %2148 = vmatmul.mubr.bf16.gmra.mxu0 %v5129_v21 }
 0x2fd   : > { %4571 = vmatprep.mubr.msk.bf16.mxu0 %vm1903_vm3, %v5130_v23 }
 0x304   : > { %2156 = vmatmul.mubr.bf16.gmra.mxu0 %v5132_v24  ;;  %v5179_v24 = vld [vmem:[%s7029_s5 + $0x10] ss:$8 sps:$4 sm:$0xff]  }
 0x305   : > { %4572 = vmatprep.mubr.msk.bf16.mxu0 %vm1903_vm3, %v5133_v25 }
 0x30c   : > { %2164 = vmatmul.mubr.bf16.gmra.mxu0 %v5135_v26  ;;  %v5184_v26 = vld [vmem:[%s7029_s5 + $0x4] ss:$8 sps:$4 sm:$0xff]  }
 0x30d   : > { %4573 = vmatprep.mubr.msk.bf16.mxu0 %vm1903_vm3, %v5136_v27 }
 0x314   : > { %2172 = vmatmul.mubr.bf16.gmra.mxu0 %v5138_v18  ;;  %v4635_v18 = vld [vmem:[%s7029_s5 + $0x100] sm:$0x33] }
 0x315   : > { %4574 = vmatprep.mubr.msk.bf16.mxu0 %vm1903_vm3, %v5139_v20 }
 0x31c   : > { %2180 = vmatmul.mubr.bf16.gmra.mxu0 %v5141_v22  ;;  %v5182_v22 = vld [vmem:[%s7029_s5] ss:$8 sps:$4 sm:$0xff]  }
 0x31d   : > { %4575 = vmatprep.mubr.msk.bf16.mxu0 %vm1903_vm3, %v5142_v28  ;;  %v4647_v28 = vcombine.high %v4635_v18, %v4635_v18 }
 0x324   : > { %2188 = vmatmul.mubr.bf16.gmra.mxu0 %v5144_v29 }
 0x325   : > { %4576 = vmatprep.mubr.msk.bf16.mxu0 %vm1903_vm3, %v5147_v30 }
 0x32c   : > { %2196 = vmatmul.mubr.bf16.gmra.mxu0 %v5149_v31 }
 0x32d   : > { %4577 = vmatprep.mubr.msk.bf16.mxu0 %vm1903_vm3, %v5156_v32 }
 0x334   : > { %v6288_v34 = vpop.f32.mrf.mxu0  ;;  %2204 = vmatmul.mubr.bf16.gmra.mxu0 %v5158_v33 }
 0x335   : > { %3375 = vmatprep.mubr.bf16.mxu0 %v5681_v40 }
 0x336   : > { %v2015_v35 = vpop.f32.mrf.mxu0 }
 0x338   : > { %v6291_v2 = vpop.f32.mrf.mxu0 }
 0x339   : > { %v2212_v36 = vpack.c.bf16 %v6291_v2, %v6288_v34  ;;  %v5190_v34 = vld [vmem:[%s7029_s5 + $0xe0] ss:$8 sps:$4 sm:$0xff]  }
 0x33a   : > { %v2018_v37 = vpop.f32.mrf.mxu0 }
 0x33c   : > { %v6295_v38 = vpop.f32.mrf.mxu0 }
 0x33e   : > { %v2023_v39 = vpop.f32.mrf.mxu0 }
 0x340   : > { %v6297_v3 = vpop.f32.mrf.mxu0 }
 0x341   : > { %v2213_v41 = vpack.c.bf16 %v6297_v3, %v6295_v38  ;;  %v5196_v38 = vld [vmem:[%s7029_s5 + $0xc0] ss:$8 sps:$4 sm:$0xff]  }
 0x342   : > { %v2026_v42 = vpop.f32.mrf.mxu0 }
 0x344   : > { %v6301_v43 = vpop.f32.mrf.mxu0 }
 0x346   : > { %v2031_v44 = vpop.f32.mrf.mxu0 }
 0x348   : > { %v6303_v45 = vpop.f32.mrf.mxu0 }
 0x349   : > { %v2214_v46 = vpack.c.bf16 %v6303_v45, %v6301_v43 }
 0x34a   : > { %v2034_v47 = vpop.f32.mrf.mxu0 }
 0x34b   : > { %v4646_v47 = vcombine.low %v4635_v18, %v4635_v18 }
 0x34c   : > { %v6307_v48 = vpop.f32.mrf.mxu0 }
 0x34e   : > { %v2039_v49 = vpop.f32.mrf.mxu0 }
 0x350   : > { %v6309_v50 = vpop.f32.mrf.mxu0 }
 0x351   : > { %v2215_v51 = vpack.c.bf16 %v6309_v50, %v6307_v48 }
 0x352   : > { %v2042_v52 = vpop.f32.mrf.mxu0 }
 0x354   : > { %v6313_v53 = vpop.f32.mrf.mxu0 }
 0x356   : > { %v2047_v54 = vpop.f32.mrf.mxu0 }
 0x357   : > { %v2653_v54 = vsel %vm2316_vm4, %v4646_v47, 0  ;;  %v5216_v47 = vld [vmem:[%s7029_s5 + $0x108] ss:$8 sps:$4 sm:$0xff]  }
 0x358   : > { %v6315_v55 = vpop.f32.mrf.mxu0 }
 0x359   : > { %v2216_v56 = vpack.c.bf16 %v6315_v55, %v6313_v53  ;;  %v5204_v53 = vld [vmem:[%s7029_s5 + $0x148] ss:$8 sps:$4 sm:$0xff]  }
 0x35a   : > { %v2050_v57 = vpop.f32.mrf.mxu0 }
 0x35b   : > { %v5189_v57 = vld [vmem:[%s7029_s5 + $0xf4] ss:$8 sps:$4 sm:$0xff]  }
 0x35c   : > { %v2053_v58 = vpop.f32.mrf.mxu0 }
 0x35e   : > { %v2055_v60 = vpop.f32.mrf.mxu0 }
 0x360   : > { %v2056_v61 = vpop.f32.mrf.mxu0 }
 0x361   : > { %v2228_v0 = vpack.c.bf16 %v2056_v61, %v2053_v58  ;;  %v5192_v61 = vld [vmem:[%s7029_s5 + $0xe4] ss:$8 sps:$4 sm:$0xff]  }
 0x362   : > { %v2058_v6 = vpop.f32.mrf.mxu0 }
 0x363   : > { %4602 = vmatmul.mubr.msk.bf16.vlgmr.msra.gmra.mxu1 %vm2300_vm5, %v2228_v0 }
 0x364   : > { %v2061_v7 = vpop.f32.mrf.mxu0  ;;  %2365 = vmatprep.mubr.bf16.mxu1 %v5681_v40  ;;  %2487 = vmatpush1.bf16.msra.mxu1 %v2477_v4 }
 0x365   : > { %2488 = vmatprep.subr.bf16.mxu1 %v5172_v5  ;;  %v5193_v5 = vld [vmem:[%s7029_s5 + $0xd0] ss:$8 sps:$4 sm:$0xff]  }
 0x366   : > { %v2063_v10 = vpop.f32.mrf.mxu0 }
 0x367   : > { %v4664_v10 = vld [vmem:[%s7029_s5 + $0x158] sm:$0x33] }
 0x368   : > { %v2064_v11 = vpop.f32.mrf.mxu0  ;;  %2489 = vmatpush1.bf16.msra.mxu1 %v5170_v8  ;;  %v4675_v48 = vcombine.low %v4664_v10, %v4664_v10 }
 0x369   : > { %v2229_v13 = vpack.c.bf16 %v2064_v11, %v2061_v7  ;;  %2490 = vmatprep.subr.bf16.mxu1 %v5175_v9  ;;  %v5198_v7 = vld [vmem:[%s7029_s5 + $0xc4] ss:$8 sps:$4 sm:$0xff]   ;;  %v5199_v11 = vld [vmem:[%s7029_s5 + $0xb0] ss:$8 sps:$4 sm:$0xff]  }
 0x36a   : > { %v2066_v15 = vpop.f32.mrf.mxu0 }
 0x36b   : > { %4603 = vmatmul.mubr.msk.bf16.gmra.mxu1 %vm2300_vm5, %v2229_v13  ;;  %v4676_v13 = vcombine.high %v4664_v10, %v4664_v10  ;;  %v5226_v10 = vld [vmem:[%s7029_s5 + $0x194] ss:$8 sps:$4 sm:$0xff]  }
 0x36c   : > { %v2069_v16 = vpop.f32.mrf.mxu0  ;;  %2375 = vmatprep.mubr.bf16.mxu1 %v5681_v40  ;;  %2491 = vmatpush1.bf16.msra.mxu1 %v5173_v12 }
 0x36d   : > { %2492 = vmatprep.subr.bf16.mxu1 %v5178_v14 }
 0x36e   : > { %v2071_v21 = vpop.f32.mrf.mxu0 }
 0x370   : > { %v2072_v23 = vpop.f32.mrf.mxu0  ;;  %2493 = vmatpush1.bf16.msra.mxu1 %v5176_v17 }
 0x371   : > { %v2230_v25 = vpack.c.bf16 %v2072_v23, %v2069_v16  ;;  %2494 = vmatprep.subr.bf16.mxu1 %v5181_v19  ;;  %v2849_v23 = vsel %vm2316_vm4, %v4675_v48, 0 }
 0x372   : > { %v2074_v27 = vpop.f32.mrf.mxu0 }
 0x373   : > { %4604 = vmatmul.mubr.msk.bf16.gmra.mxu1 %vm2300_vm5, %v2230_v25  ;;  %v5207_v27 = vld [vmem:[%s7029_s5 + $0x138] ss:$8 sps:$4 sm:$0xff]  }
 0x374   : > { %v2077_v20 = vpop.f32.mrf.mxu0  ;;  %2385 = vmatprep.mubr.bf16.mxu1 %v5681_v40  ;;  %2495 = vmatpush1.bf16.msra.mxu1 %v5179_v24  ;;  %v5206_v24 = vld [vmem:[%s7029_s5 + $0x14c] ss:$8 sps:$4 sm:$0xff]  }
 0x375   : > { %2496 = vmatprep.subr.bf16.mxu1 %v5184_v26 }
 0x376   : > { %v2079_v29 = vpop.f32.mrf.mxu0 }
 0x377   : > { %v5210_v29 = vld [vmem:[%s7029_s5 + $0x128] ss:$8 sps:$4 sm:$0xff]  }
 0x378   : > { %v2080_v30 = vpop.f32.mrf.mxu0  ;;  %2497 = vmatpush1.bf16.msra.mxu1 %v5182_v22  ;;  %v5212_v22 = vld [vmem:[%s7029_s5 + $0x12c] ss:$8 sps:$4 sm:$0xff]  }
 0x379   : > { %v2231_v31 = vpack.c.bf16 %v2080_v30, %v2077_v20  ;;  %4648 = vmatprep.subr.msk.bf16.mxu1 %vm2316_vm4, %v4647_v28 }
 0x37a   : > { %v2082_v32 = vpop.f32.mrf.mxu0 }
 0x37b   : > { %4605 = vmatmul.mubr.msk.bf16.gmra.mxu1 %vm2300_vm5, %v2231_v31  ;;  %v5215_v31 = vld [vmem:[%s7029_s5 + $0x11c] ss:$8 sps:$4 sm:$0xff]  }
 0x37c   : > { %v2085_v33 = vpop.f32.mrf.mxu0  ;;  %2395 = vmatprep.mubr.bf16.mxu1 %v5681_v40 }
 0x37e   : > { %v2087_v35 = vpop.f32.mrf.mxu0 }
 0x380   : > { %v2088_v37 = vpop.f32.mrf.mxu0 }
 0x381   : > { %v2232_v39 = vpack.c.bf16 %v2088_v37, %v2085_v33  ;;  %v5213_v33 = vld [vmem:[%s7029_s5 + $0x118] ss:$8 sps:$4 sm:$0xff]  }
 0x382   : > { %v2090_v42 = vpop.f32.mrf.mxu0 }
 0x383   : > { %4606 = vmatmul.mubr.msk.bf16.gmra.mxu1 %vm2300_vm5, %v2232_v39  ;;  %v5218_v39 = vld [vmem:[%s7029_s5 + $0x10c] ss:$8 sps:$4 sm:$0xff]  }
 0x384   : > { %2514 = vmatprep.mubr.bf16.mxu1 %v5681_v40  ;;  %v6366_v44 = vpop.f32.mrf.mxu0 }
 0x386   : > { %v2095_v49 = vpop.f32.mrf.mxu0 }
 0x388   : > { %v2096_v52 = vpop.f32.mrf.mxu0 }
 0x389   : > { %v2565_v21 = vpack.c.bf16 %v2096_v52, %v6366_v44  ;;  %v4693_v44 = vld [vmem:[%s7029_s5 + $0x1b0] sm:$0x33] }
 0x38a   : > { %v2098_v58 = vpop.f32.mrf.mxu0  ;;  %v4705_v52 = vcombine.high %v4693_v44, %v4693_v44 }
 0x38b   : > { %4620 = vmatmul.mubr.msk.bf16.vlgmr.msra.gmra.mxu1 %vm2300_vm5, %v2212_v36  ;;  %v5195_v36 = vld [vmem:[%s7029_s5 + $0xd4] ss:$8 sps:$4 sm:$0xff]  }
 0x38c   : > { %2524 = vmatprep.mubr.bf16.mxu1 %v5681_v40  ;;  %2663 = vmatpush1.bf16.msra.mxu1 %v2653_v54  ;;  %v6380_v60 = vpop.f32.mrf.mxu0 }
 0x38d   : > { %2664 = vmatprep.subr.bf16.mxu1 %v5189_v57 }
 0x38e   : > { %v2103_v0 = vpop.f32.mrf.mxu0 }
 0x390   : > { %2665 = vmatpush1.bf16.msra.mxu1 %v5187_v59  ;;  %v6388_v2 = vpop.f32.mrf.mxu0 }
 0x391   : > { %2666 = vmatprep.subr.bf16.mxu1 %v5192_v61  ;;  %v2566_v20 = vpack.c.bf16 %v6388_v2, %v6380_v60 }
 0x392   : > { %v2106_v4 = vpop.f32.mrf.mxu0 }
 0x393   : > { %4621 = vmatmul.mubr.msk.bf16.gmra.mxu1 %vm2300_vm5, %v2213_v41  ;;  %v5201_v41 = vld [vmem:[%s7029_s5 + $0xb4] ss:$8 sps:$4 sm:$0xff]   ;;  %v4704_v4 = vcombine.low %v4693_v44, %v4693_v44 }
 0x394   : > { %2534 = vmatprep.mubr.bf16.mxu1 %v5681_v40  ;;  %2667 = vmatpush1.bf16.msra.mxu1 %v5190_v34  ;;  %v6401_v6 = vpop.f32.mrf.mxu0 }
 0x395   : > { %2668 = vmatprep.subr.bf16.mxu1 %v5195_v36 }
 0x396   : > { %v2111_v8 = vpop.f32.mrf.mxu0 }
 0x397   : > { %v3045_v8 = vsel %vm2316_vm4, %v4704_v4, 0 }
 0x398   : > { %2669 = vmatpush1.bf16.msra.mxu1 %v5193_v5  ;;  %v6409_v3 = vpop.f32.mrf.mxu0 }
 0x399   : > { %2670 = vmatprep.subr.bf16.mxu1 %v5198_v7  ;;  %v2567_v37 = vpack.c.bf16 %v6409_v3, %v6401_v6 }
 0x39a   : > { %v2114_v9 = vpop.f32.mrf.mxu0 }
 0x39b   : > { %4622 = vmatmul.mubr.msk.bf16.gmra.mxu1 %vm2300_vm5, %v2214_v46 }
 0x39c   : > { %2544 = vmatprep.mubr.bf16.mxu1 %v5681_v40  ;;  %2671 = vmatpush1.bf16.msra.mxu1 %v5196_v38  ;;  %v6425_v12 = vpop.f32.mrf.mxu0  ;;  %v5223_v38 = vld [vmem:[%s7029_s5 + $0x1a4] ss:$8 sps:$4 sm:$0xff]  }
 0x39d   : > { %2672 = vmatprep.subr.bf16.mxu1 %v5201_v41  ;;  %v5221_v41 = vld [vmem:[%s7029_s5 + $0x1a0] ss:$8 sps:$4 sm:$0xff]  }
 0x39e   : > { %v2119_v14 = vpop.f32.mrf.mxu0 }
 0x3a0   : > { %2673 = vmatpush1.bf16.msra.mxu1 %v5199_v11  ;;  %v6427_v15 = vpop.f32.mrf.mxu0 }
 0x3a1   : > { %4677 = vmatprep.subr.msk.bf16.mxu1 %vm2316_vm4, %v4676_v13  ;;  %v2568_v58 = vpack.c.bf16 %v6427_v15, %v6425_v12  ;;  %v5224_v12 = vld [vmem:[%s7029_s5 + $0x190] ss:$8 sps:$4 sm:$0xff]   ;;  %v5229_v15 = vld [vmem:[%s7029_s5 + $0x184] ss:$8 sps:$4 sm:$0xff]  }
 0x3a2   : > { %v2122_v43 = vpop.f32.mrf.mxu0 }
 0x3a3   : > { %4623 = vmatmul.mubr.msk.bf16.gmra.mxu1 %vm2300_vm5, %v2215_v51 }
 0x3a4   : > { %2554 = vmatprep.mubr.bf16.mxu1 %v5681_v40  ;;  %v6435_v45 = vpop.f32.mrf.mxu0 }
 0x3a6   : > { %v2127_v46 = vpop.f32.mrf.mxu0 }
 0x3a8   : > { %v6437_v16 = vpop.f32.mrf.mxu0 }
 0x3a9   : > { %v2569_v34 = vpack.c.bf16 %v6437_v16, %v6435_v45  ;;  %v5227_v45 = vld [vmem:[%s7029_s5 + $0x180] ss:$8 sps:$4 sm:$0xff]   ;;  %v5232_v16 = vld [vmem:[%s7029_s5 + $0x174] ss:$8 sps:$4 sm:$0xff]  }
 0x3aa   : > { %v2130_v17 = vpop.f32.mrf.mxu0 }
 0x3ab   : > { %4624 = vmatmul.mubr.msk.bf16.gmra.mxu1 %vm2300_vm5, %v2216_v56  ;;  %v5209_v56 = vld [vmem:[%s7029_s5 + $0x13c] ss:$8 sps:$4 sm:$0xff]  }
 0x3ac   : > { %2690 = vmatprep.mubr.bf16.mxu1 %v5681_v40  ;;  %v6444_v19 = vpop.f32.mrf.mxu0 }
 0x3ae   : > { %v2135_v50 = vpop.f32.mrf.mxu0 }
 0x3b0   : > { %v6446_v51 = vpop.f32.mrf.mxu0 }
 0x3b1   : > { %v2761_v7 = vpack.c.bf16 %v6446_v51, %v6444_v19  ;;  %v5230_v19 = vld [vmem:[%s7029_s5 + $0x170] ss:$8 sps:$4 sm:$0xff]   ;;  %v5235_v51 = vld [vmem:[%s7029_s5 + $0x164] ss:$8 sps:$4 sm:$0xff]  }
 0x3b2   : > { %v2138_v25 = vpop.f32.mrf.mxu0 }
 0x3b3   : > { %4649 = vmatmul.mubr.msk.bf16.vlgmr.msra.gmra.mxu1 %vm2300_vm5, %v2565_v21 }
 0x3b4   : > { %2700 = vmatprep.mubr.bf16.mxu1 %v5681_v40  ;;  %2859 = vmatpush1.bf16.msra.mxu1 %v2849_v23  ;;  %v6458_v55 = vpop.f32.mrf.mxu0  ;;  %v5233_v23 = vld [vmem:[%s7029_s5 + $0x160] ss:$8 sps:$4 sm:$0xff]  }
 0x3b5   : > { %2860 = vmatprep.subr.bf16.mxu1 %v5206_v24 }
 0x3b6   : > { %v2143_v26 = vpop.f32.mrf.mxu0 }
 0x3b8   : > { %2861 = vmatpush1.bf16.msra.mxu1 %v5204_v53  ;;  %v6466_v18 = vpop.f32.mrf.mxu0 }
 0x3b9   : > { %2862 = vmatprep.subr.bf16.mxu1 %v5209_v56  ;;  %v2762_v14 = vpack.c.bf16 %v6466_v18, %v6458_v55 }
 0x3ba   : > { %v2146_v28 = vpop.f32.mrf.mxu0 }
 0x3bb   : > { %4650 = vmatmul.mubr.msk.bf16.gmra.mxu1 %vm2300_vm5, %v2566_v20 }
 0x3bc   : > { %2710 = vmatprep.mubr.bf16.mxu1 %v5681_v40  ;;  %2863 = vmatpush1.bf16.msra.mxu1 %v5207_v27  ;;  %v6478_v30 = vpop.f32.mrf.mxu0 }
 0x3bd   : > { %2864 = vmatprep.subr.bf16.mxu1 %v5212_v22 }
 0x3be   : > { %v2151_v32 = vpop.f32.mrf.mxu0 }
 0x3c0   : > { %2865 = vmatpush1.bf16.msra.mxu1 %v5210_v29  ;;  %v6486_v35 = vpop.f32.mrf.mxu0 }
 0x3c1   : > { %2866 = vmatprep.subr.bf16.mxu1 %v5215_v31  ;;  %v2763_v50 = vpack.c.bf16 %v6486_v35, %v6478_v30 }
 0x3c2   : > { %v2154_v42 = vpop.f32.mrf.mxu0 }
 0x3c3   : > { %4651 = vmatmul.mubr.msk.bf16.gmra.mxu1 %vm2300_vm5, %v2567_v37 }
 0x3c4   : > { %2720 = vmatprep.mubr.bf16.mxu1 %v5681_v40  ;;  %2867 = vmatpush1.bf16.msra.mxu1 %v5213_v33  ;;  %v6501_v49 = vpop.f32.mrf.mxu0 }
 0x3c5   : > { %2868 = vmatprep.subr.bf16.mxu1 %v5218_v39 }
 0x3c6   : > { %v2159_v54 = vpop.f32.mrf.mxu0 }
 0x3c8   : > { %2869 = vmatpush1.bf16.msra.mxu1 %v5216_v47  ;;  %v6503_v57 = vpop.f32.mrf.mxu0 }
 0x3c9   : > { %4706 = vmatprep.subr.msk.bf16.mxu1 %vm2316_vm4, %v4705_v52  ;;  %v2764_v55 = vpack.c.bf16 %v6503_v57, %v6501_v49 }
 0x3ca   : > { %v2162_v59 = vpop.f32.mrf.mxu0 }
 0x3cb   : > { %4652 = vmatmul.mubr.msk.bf16.gmra.mxu1 %vm2300_vm5, %v2568_v58 }
 0x3cc   : > { %2730 = vmatprep.mubr.bf16.mxu1 %v5681_v40  ;;  %v6510_v60 = vpop.f32.mrf.mxu0 }
 0x3ce   : > { %v2167_v61 = vpop.f32.mrf.mxu0 }
 0x3d0   : > { %v6512_v0 = vpop.f32.mrf.mxu0 }
 0x3d1   : > { %v2765_v20 = vpack.c.bf16 %v6512_v0, %v6510_v60 }
 0x3d2   : > { %v2170_v2 = vpop.f32.mrf.mxu0 }
 0x3d3   : > { %4653 = vmatmul.mubr.msk.bf16.gmra.mxu1 %vm2300_vm5, %v2569_v34 }
 0x3d4   : > { %2886 = vmatprep.mubr.bf16.mxu1 %v5681_v40  ;;  %v2173_v36 = vpop.f32.mrf.mxu0 }
 0x3d6   : > { %v2175_v5 = vpop.f32.mrf.mxu0 }
 0x3d8   : > { %v2176_v6 = vpop.f32.mrf.mxu0 }
 0x3d9   : > { %v2957_v28 = vpack.c.bf16 %v2176_v6, %v2173_v36 }
 0x3da   : > { %v2178_v3 = vpop.f32.mrf.mxu0 }
 0x3db   : > { %4678 = vmatmul.mubr.msk.bf16.vlgmr.msra.gmra.mxu1 %vm2300_vm5, %v2761_v7 }
 0x3dc   : > { %2896 = vmatprep.mubr.bf16.mxu1 %v5681_v40  ;;  %3055 = vmatpush1.bf16.msra.mxu1 %v3045_v8  ;;  %v2181_v9 = vpop.f32.mrf.mxu0 }
 0x3dd   : > { %3056 = vmatprep.subr.bf16.mxu1 %v5223_v38 }
 0x3de   : > { %v2183_v11 = vpop.f32.mrf.mxu0 }
 0x3e0   : > { %3057 = vmatpush1.bf16.msra.mxu1 %v5221_v41  ;;  %v2184_v13 = vpop.f32.mrf.mxu0 }
 0x3e1   : > { %3058 = vmatprep.subr.bf16.mxu1 %v5226_v10  ;;  %v2958_v29 = vpack.c.bf16 %v2184_v13, %v2181_v9 }
 0x3e2   : > { %v2186_v43 = vpop.f32.mrf.mxu0 }
 0x3e3   : > { %4679 = vmatmul.mubr.msk.bf16.gmra.mxu1 %vm2300_vm5, %v2762_v14 }
 0x3e4   : > { %2906 = vmatprep.mubr.bf16.mxu1 %v5681_v40  ;;  %3059 = vmatpush1.bf16.msra.mxu1 %v5224_v12  ;;  %v2189_v46 = vpop.f32.mrf.mxu0 }
 0x3e5   : > { %3060 = vmatprep.subr.bf16.mxu1 %v5229_v15 }
 0x3e6   : > { %v2191_v17 = vpop.f32.mrf.mxu0 }
 0x3e8   : > { %3061 = vmatpush1.bf16.msra.mxu1 %v5227_v45  ;;  %v2192_v48 = vpop.f32.mrf.mxu0 }
 0x3e9   : > { %3062 = vmatprep.subr.bf16.mxu1 %v5232_v16  ;;  %v2959_v30 = vpack.c.bf16 %v2192_v48, %v2189_v46 }
 0x3ea   : > { %v2194_v21 = vpop.f32.mrf.mxu0 }
 0x3eb   : > { %4680 = vmatmul.mubr.msk.bf16.gmra.mxu1 %vm2300_vm5, %v2763_v50 }
 0x3ec   : > { %2916 = vmatprep.mubr.bf16.mxu1 %v5681_v40  ;;  %3063 = vmatpush1.bf16.msra.mxu1 %v5230_v19  ;;  %v2197_v24 = vpop.f32.mrf.mxu0 }
 0x3ed   : > { %3064 = vmatprep.subr.bf16.mxu1 %v5235_v51 }
 0x3ee   : > { %v2199_v25 = vpop.f32.mrf.mxu0 }
 0x3f0   : > { %3065 = vmatpush1.bf16.msra.mxu1 %v5233_v23  ;;  %v2200_v53 = vpop.f32.mrf.mxu0 }
 0x3f1   : > { %3512 = vmatprep.subr.bf16.mxu1 %v5681_v40  ;;  %v2960_v31 = vpack.c.bf16 %v2200_v53, %v2197_v24 }
 0x3f2   : > { %v2202_v56 = vpop.f32.mrf.mxu0 }
 0x3f3   : > { %4681 = vmatmul.mubr.msk.bf16.gmra.mxu1 %vm2300_vm5, %v2764_v55 }
 0x3f4   : > { %2926 = vmatprep.mubr.bf16.mxu1 %v5681_v40  ;;  %v2205_v26 = vpop.f32.mrf.mxu0 }
 0x3f6   : > { %v2207_v27 = vpop.f32.mrf.mxu0 }
 0x3f8   : > { %v2208_v18 = vpop.f32.mrf.mxu0 }
 0x3f9   : > { %v2961_v32 = vpack.c.bf16 %v2208_v18, %v2205_v26 }
 0x3fa   : > { %v2210_v22 = vpop.f32.mrf.mxu0 }
 0x3fb   : > { %4682 = vmatmul.mubr.msk.bf16.gmra.mxu1 %vm2300_vm5, %v2765_v20 }
 0x3fc   : > { %3082 = vmatprep.mubr.bf16.mxu1 %v5681_v40 }
 0x403   : > { %4707 = vmatmul.mubr.msk.bf16.vlgmr.msra.gmra.mxu1 %vm2300_vm5, %v2957_v28 }
 0x404   : > { %3092 = vmatprep.mubr.bf16.mxu1 %v5681_v40 }
 0x40b   : > { %4708 = vmatmul.mubr.msk.bf16.gmra.mxu1 %vm2300_vm5, %v2958_v29 }
 0x40c   : > { %3102 = vmatprep.mubr.bf16.mxu1 %v5681_v40 }
 0x413   : > { %4709 = vmatmul.mubr.msk.bf16.gmra.mxu1 %vm2300_vm5, %v2959_v30 }
 0x414   : > { %3112 = vmatprep.mubr.bf16.mxu1 %v5681_v40 }
 0x41b   : > { %4710 = vmatmul.mubr.msk.bf16.gmra.mxu1 %vm2300_vm5, %v2960_v31 }
 0x41c   : > { %3122 = vmatprep.mubr.bf16.mxu1 %v5681_v40 }
 0x423   : > { %v2357_v33 = vpop.f32.mrf.mxu1  ;;  %4711 = vmatmul.mubr.msk.bf16.gmra.mxu1 %vm2300_vm5, %v2961_v32 }
 0x425   : > { %v2359_v35 = vpop.f32.mrf.mxu1 }
 0x427   : > { %v2361_v37 = vpop.f32.mrf.mxu1 }
 0x429   : > { %v2363_v39 = vpop.f32.mrf.mxu1 }
 0x42b   : > { %v2367_v42 = vpop.f32.mrf.mxu1 }
 0x42d   : > { %v2369_v44 = vpop.f32.mrf.mxu1 }
 0x42f   : > { %v2371_v47 = vpop.f32.mrf.mxu1 }
 0x431   : > { %v2373_v49 = vpop.f32.mrf.mxu1 }
 0x433   : > { %v2377_v52 = vpop.f32.mrf.mxu1 }
 0x435   : > { %v2379_v54 = vpop.f32.mrf.mxu1 }
 0x437   : > { %v2381_v57 = vpop.f32.mrf.mxu1 }
 0x439   : > { %v2383_v58 = vpop.f32.mrf.mxu1 }
 0x43b   : > { %v2387_v59 = vpop.f32.mrf.mxu1 }
 0x43d   : > { %v2389_v60 = vpop.f32.mrf.mxu1 }
 0x43f   : > { %v2391_v61 = vpop.f32.mrf.mxu1 }
 0x441   : > { %v2393_v0 = vpop.f32.mrf.mxu1 }
 0x443   : > { %v2397_v34 = vpop.f32.mrf.mxu1 }
 0x445   : > { %v2399_v2 = vpop.f32.mrf.mxu1 }
 0x447   : > { %v2401_v36 = vpop.f32.mrf.mxu1 }
 0x449   : > { %v2403_v4 = vpop.f32.mrf.mxu1 }
 0x44b   : > { %v2516_v5 = vpop.f32.mrf.mxu1 }
 0x44c   : > { %v2517_v6 = vadd.f32 %v2516_v5, %v2357_v33 }
 0x44d   : > { %v2518_v7 = vpop.f32.mrf.mxu1 }
 0x44e   : > { %v2519_v8 = vadd.f32 %v2518_v7, %v2359_v35 }
 0x44f   : > { %v2520_v38 = vpop.f32.mrf.mxu1 }
 0x450   : > { %v2521_v3 = vadd.f32 %v2520_v38, %v2361_v37 }
 0x451   : > { %v2522_v41 = vpop.f32.mrf.mxu1 }
 0x453   : > { %v2526_v9 = vpop.f32.mrf.mxu1 }
 0x454   : > { %v2527_v10 = vadd.f32 %v2526_v9, %v2367_v42 }
 0x455   : > { %v2528_v11 = vpop.f32.mrf.mxu1 }
 0x456   : > { %v2529_v12 = vadd.f32 %v2528_v11, %v2369_v44  ;;  %v2523_v44 = vadd.f32 %v2522_v41, %v2363_v39 }
 0x457   : > { %v2530_v13 = vpop.f32.mrf.mxu1 }
 0x458   : > { %v2531_v14 = vadd.f32 %v2530_v13, %v2371_v47 }
 0x459   : > { %v2532_v15 = vpop.f32.mrf.mxu1 }
 0x45a   : > { %v2533_v43 = vadd.f32 %v2532_v15, %v2373_v49 }
 0x45b   : > { %v2536_v45 = vpop.f32.mrf.mxu1 }
 0x45c   : > { %v2537_v46 = vadd.f32 %v2536_v45, %v2377_v52 }
 0x45d   : > { %v2538_v16 = vpop.f32.mrf.mxu1 }
 0x45e   : > { %v2539_v17 = vadd.f32 %v2538_v16, %v2379_v54 }
 0x45f   : > { %v2540_v19 = vpop.f32.mrf.mxu1 }
 0x460   : > { %v2541_v48 = vadd.f32 %v2540_v19, %v2381_v57 }
 0x461   : > { %v2542_v50 = vpop.f32.mrf.mxu1 }
 0x462   : > { %v2543_v51 = vadd.f32 %v2542_v50, %v2383_v58 }
 0x463   : > { %v2546_v21 = vpop.f32.mrf.mxu1 }
 0x464   : > { %v2547_v23 = vadd.f32 %v2546_v21, %v2387_v59 }
 0x465   : > { %v2548_v24 = vpop.f32.mrf.mxu1 }
 0x466   : > { %v2549_v25 = vadd.f32 %v2548_v24, %v2389_v60 }
 0x467   : > { %v2550_v53 = vpop.f32.mrf.mxu1 }
 0x468   : > { %v2551_v55 = vadd.f32 %v2550_v53, %v2391_v61 }
 0x469   : > { %v2552_v56 = vpop.f32.mrf.mxu1 }
 0x46a   : > { %v2553_v26 = vadd.f32 %v2552_v56, %v2393_v0 }
 0x46b   : > { %v2556_v27 = vpop.f32.mrf.mxu1 }
 0x46c   : > { %v2557_v18 = vadd.f32 %v2556_v27, %v2397_v34 }
 0x46d   : > { %v2558_v20 = vpop.f32.mrf.mxu1 }
 0x46e   : > { %v2559_v22 = vadd.f32 %v2558_v20, %v2399_v2 }
 0x46f   : > { %v2560_v28 = vpop.f32.mrf.mxu1 }
 0x470   : > { %v2561_v29 = vadd.f32 %v2560_v28, %v2401_v36 }
 0x471   : > { %v2562_v30 = vpop.f32.mrf.mxu1 }
 0x472   : > { %v2563_v31 = vadd.f32 %v2562_v30, %v2403_v4 }
 0x473   : > { %v2692_v32 = vpop.f32.mrf.mxu1 }
 0x474   : > { %v2741_v33 = vadd.f32 %v2692_v32, %v2517_v6 }
 0x475   : > { %v2694_v35 = vpop.f32.mrf.mxu1 }
 0x476   : > { %v2742_v37 = vadd.f32 %v2694_v35, %v2519_v8 }
 0x477   : > { %v2696_v42 = vpop.f32.mrf.mxu1 }
 0x478   : > { %v2743_v47 = vadd.f32 %v2696_v42, %v2521_v3 }
 0x479   : > { %v2698_v49 = vpop.f32.mrf.mxu1 }
 0x47a   : > { %v2744_v52 = vadd.f32 %v2698_v49, %v2523_v44 }
 0x47b   : > { %v2702_v54 = vpop.f32.mrf.mxu1 }
 0x47c   : > { %v2745_v57 = vadd.f32 %v2702_v54, %v2527_v10 }
 0x47d   : > { %v2704_v58 = vpop.f32.mrf.mxu1 }
 0x47e   : > { %v2746_v59 = vadd.f32 %v2704_v58, %v2529_v12  ;;  %v5241_v58 = vld [vmem:[%s7032_s8 + $0x78] sm:$0xff]  }
 0x47f   : > { %v2706_v60 = vpop.f32.mrf.mxu1 }
 0x480   : > { %v2747_v61 = vadd.f32 %v2706_v60, %v2531_v14 }
 0x481   : > { %v2708_v0 = vpop.f32.mrf.mxu1 }
 0x482   : > { %v2748_v34 = vadd.f32 %v2708_v0, %v2533_v43  ;;  %v5242_v0 = vld [vmem:[%s7032_s8 + $0x70] sm:$0xff]  }
 0x483   : > { %v2712_v2 = vpop.f32.mrf.mxu1 }
 0x484   : > { %v2749_v36 = vadd.f32 %v2712_v2, %v2537_v46 }
 0x485   : > { %v2714_v4 = vpop.f32.mrf.mxu1 }
 0x486   : > { %v2750_v5 = vadd.f32 %v2714_v4, %v2539_v17 }
 0x487   : > { %v2716_v6 = vpop.f32.mrf.mxu1 }
 0x488   : > { %v2751_v7 = vadd.f32 %v2716_v6, %v2541_v48  ;;  %v5243_v6 = vld [vmem:[%s7032_s8 + $0x68] sm:$0xff]  }
 0x489   : > { %v2718_v8 = vpop.f32.mrf.mxu1 }
 0x48a   : > { %v6579_v38 = vadd.f32 %v2718_v8, %v2543_v51 }
 0x48b   : > { %v2722_v39 = vpop.f32.mrf.mxu1 }
 0x48c   : > { %v6581_v3 = vadd.f32 %v2722_v39, %v2547_v23 }
 0x48d   : > { %v2724_v41 = vpop.f32.mrf.mxu1 }
 0x48e   : > { %v6583_v9 = vadd.f32 %v2724_v41, %v2549_v25 }
 0x48f   : > { %v2726_v10 = vpop.f32.mrf.mxu1 }
 0x490   : > { %v6585_v11 = vadd.f32 %v2726_v10, %v2551_v55 }
 0x491   : > { %v2728_v12 = vpop.f32.mrf.mxu1 }
 0x492   : > { %v6587_v13 = vadd.f32 %v2728_v12, %v2553_v26 }
 0x493   : > { %v2732_v14 = vpop.f32.mrf.mxu1 }
 0x494   : > { %v6589_v15 = vadd.f32 %v2732_v14, %v2557_v18 }
 0x495   : > { %v2734_v43 = vpop.f32.mrf.mxu1 }
 0x496   : > { %v6591_v45 = vadd.f32 %v2734_v43, %v2559_v22 }
 0x497   : > { %v2736_v46 = vpop.f32.mrf.mxu1 }
 0x498   : > { %v6593_v16 = vadd.f32 %v2736_v46, %v2561_v29 }
 0x499   : > { %v2738_v17 = vpop.f32.mrf.mxu1 }
 0x49a   : > { %v6595_v19 = vadd.f32 %v2738_v17, %v2563_v31 }
 0x49b   : > { %v2888_v48 = vpop.f32.mrf.mxu1 }
 0x49c   : > { %v2937_v50 = vadd.f32 %v2888_v48, %v2741_v33 }
 0x49d   : > { %v2890_v51 = vpop.f32.mrf.mxu1 }
 0x49e   : > { %v2938_v21 = vadd.f32 %v2890_v51, %v2742_v37 }
 0x49f   : > { %v2892_v23 = vpop.f32.mrf.mxu1 }
 0x4a0   : > { %v2939_v24 = vadd.f32 %v2892_v23, %v2743_v47  ;;  %v5239_v47 = vld [vmem:[%s7032_s8 + $0x88] sm:$0xff]  }
 0x4a1   : > { %v2894_v25 = vpop.f32.mrf.mxu1  ;;  %3513 = vmatpush1.bf16.msra.mxu1 %v5239_v47 }
 0x4a2   : > { %v2940_v53 = vadd.f32 %v2894_v25, %v2744_v52  ;;  %v5240_v52 = vld [vmem:[%s7032_s8 + $0x80] sm:$0xff]   ;;  %3514 = vmatprep.subr.bf16.mxu1 %v5681_v40 }
 0x4a3   : > { %v2898_v55 = vpop.f32.mrf.mxu1 }
 0x4a4   : > { %v2941_v56 = vadd.f32 %v2898_v55, %v2745_v57 }
 0x4a5   : > { %v2900_v26 = vpop.f32.mrf.mxu1  ;;  %3515 = vmatpush1.bf16.msra.mxu1 %v5240_v52 }
 0x4a6   : > { %v6597_v27 = vadd.f32 %v2900_v26, %v2746_v59  ;;  %3516 = vmatprep.subr.bf16.mxu1 %v5681_v40 }
 0x4a7   : > { %v2902_v18 = vpop.f32.mrf.mxu1 }
 0x4a8   : > { %v6599_v20 = vadd.f32 %v2902_v18, %v2747_v61  ;;  %v3153_v61 = vld [vmem:[%s7030_s6] sm:$0x3] }
 0x4a9   : > { %v2904_v22 = vpop.f32.mrf.mxu1  ;;  %3517 = vmatpush1.bf16.msra.mxu1 %v5241_v58  ;;  %v6647_v2 = vrot.slane %v3153_v61, %v524_v63 }
 0x4aa   : > { %v6601_v28 = vadd.f32 %v2904_v22, %v2748_v34  ;;  %3518 = vmatprep.subr.bf16.mxu1 %v5681_v40  ;;  %v5246_v22 = vld [vmem:[%s7032_s8 + $0x50] sm:$0xff]  }
 0x4ab   : > { %v2908_v29 = vpop.f32.mrf.mxu1 }
 0x4ac   : > { %v6603_v30 = vadd.f32 %v2908_v29, %v2749_v36 }
 0x4ad   : > { %v2910_v31 = vpop.f32.mrf.mxu1  ;;  %3519 = vmatpush1.bf16.msra.mxu1 %v5242_v0 }
 0x4ae   : > { %v6605_v32 = vadd.f32 %v2910_v31, %v2750_v5  ;;  %v6651_v5 = vrot.slane %v3153_v61, %v528_v1  ;;  %3520 = vmatprep.subr.bf16.mxu1 %v5681_v40 }
 0x4af   : > { %v2912_v33 = vpop.f32.mrf.mxu1 }
 0x4b0   : > { %v6607_v35 = vadd.f32 %v2912_v33, %v2751_v7 }
 0x4b1   : > { %v6609_v37 = vpop.f32.mrf.mxu1  ;;  %3521 = vmatpush1.bf16.msra.mxu1 %v5243_v6 }
 0x4b2   : > { %3522 = vmatprep.subr.bf16.mxu1 %v5681_v40 }
 0x4b3   : > { %v6611_v42 = vpop.f32.mrf.mxu1 }
 0x4b5   : > { %v6613_v44 = vpop.f32.mrf.mxu1  ;;  %3523 = vmatpush1.bf16.msra.mxu1 %v5244_v62 }
 0x4b6   : > { %3524 = vmatprep.subr.bf16.mxu1 %v5681_v40 }
 0x4b7   : > { %v6618_v49 = vpop.f32.mrf.mxu1 }
 0x4b9   : > { %v6623_v54 = vpop.f32.mrf.mxu1 }
 0x4bb   : > { %v6626_v57 = vpop.f32.mrf.mxu1 }
 0x4bd   : > { %v6631_v59 = vpop.f32.mrf.mxu1 }
 0x4bf   : > { %v6634_v60 = vpop.f32.mrf.mxu1 }
 0x4c1   : > { %v6642_v34 = vpop.f32.mrf.mxu1 }
 0x4c3   : > { %v3084_v36 = vpop.f32.mrf.mxu1 }
 0x4c4   : > { %v3133_v4 = vadd.f32 %v3084_v36, %v2937_v50 }
 0x4c5   : > { %v3086_v7 = vpop.f32.mrf.mxu1 }
 0x4c6   : > { %v3165_v8 = vadd.f32 %v6647_v2, %v3133_v4  ;;  %v3134_v39 = vadd.f32 %v3086_v7, %v2938_v21  ;;  %v5245_v21 = vld [vmem:[%s7032_s8 + $0x58] sm:$0xff]  }
 0x4c7   : > { %v3088_v41 = vpop.f32.mrf.mxu1  ;;  %3525 = vmatpush1.bf16.msra.mxu1 %v5245_v21 }
 0x4c8   : > { %v4712_v63 = vmul.f32 -1.442695, %v3165_v8  ;;  %v3166_v10 = vadd.f32 %v6651_v5, %v3134_v39  ;;  %v3135_v12 = vadd.f32 %v3088_v41, %v2939_v24  ;;  %3526 = vmatprep.subr.bf16.mxu1 %v5681_v40 }
 0x4c9   : > { %v3090_v1 = vpop.f32.mrf.mxu1 }
 0x4ca   : > { %5527 = vpow2.f32 %v4712_v63  ;;  %v4713_v14 = vmul.f32 -1.442695, %v3166_v10  ;;  %v3167_v43 = vadd.f32 %v6647_v2, %v3135_v12  ;;  %v3136_v46 = vadd.f32 %v3090_v1, %v2940_v53 }
 0x4cb   : > { %v3094_v17 = vpop.f32.mrf.mxu1  ;;  %3527 = vmatpush1.bf16.msra.mxu1 %v5246_v22  ;;  %v2949_v63 = vadd.f32 %v6611_v42, %v6581_v3  ;;  %v2950_v3 = vadd.f32 %v6613_v44, %v6583_v9 }
 0x4cc   : > { %5529 = vpow2.f32 %v4713_v14  ;;  %v4714_v48 = vmul.f32 -1.442695, %v3167_v43  ;;  %v3168_v50 = vadd.f32 %v6651_v5, %v3136_v46  ;;  %v3137_v51 = vadd.f32 %v3094_v17, %v2941_v56  ;;  %3540 = vmatprep.subr.bf16.mxu1 %v5681_v40 }
 0x4cd   : > { %v3096_v23 = vpop.f32.mrf.mxu1 }
 0x4ce   : > { %5531 = vpow2.f32 %v4714_v48  ;;  %v4715_v24 = vmul.f32 -1.442695, %v3168_v50  ;;  %v3169_v25 = vadd.f32 %v6647_v2, %v3137_v51  ;;  %v3138_v53 = vadd.f32 %v3096_v23, %v6597_v27 }
 0x4cf   : > { %v3098_v55 = vpop.f32.mrf.mxu1 }
 0x4d0   : > { %5533 = vpow2.f32 %v4715_v24  ;;  %v4716_v26 = vmul.f32 -1.442695, %v3169_v25  ;;  %v3170_v18 = vadd.f32 %v6651_v5, %v3138_v53  ;;  %v3139_v56 = vadd.f32 %v3098_v55, %v6599_v20 }
 0x4d1   : > { %v3100_v29 = vpop.f32.mrf.mxu1  ;;  %v2952_v25 = vadd.f32 %v6623_v54, %v6587_v13  ;;  %v2953_v13 = vadd.f32 %v6626_v57, %v6589_v15  ;;  %v2954_v54 = vadd.f32 %v6631_v59, %v6591_v45 }
 0x4d2   : > { %5535 = vpow2.f32 %v4716_v26  ;;  %v4717_v31 = vmul.f32 -1.442695, %v3170_v18  ;;  %v3171_v33 = vadd.f32 %v6647_v2, %v3139_v56  ;;  %v3140_v27 = vadd.f32 %v3100_v29, %v6601_v28 }
 0x4d3   : > { %v3104_v47 = vpop.f32.mrf.mxu1  ;;  %v2948_v28 = vadd.f32 %v6609_v37, %v6579_v38 }
 0x4d4   : > { %5537 = vpow2.f32 %v4717_v31  ;;  %v4718_v52 = vmul.f32 -1.442695, %v3171_v33  ;;  %v3172_v58 = vadd.f32 %v6651_v5, %v3140_v27  ;;  %v3141_v20 = vadd.f32 %v3104_v47, %v6603_v30 }
 0x4d5   : > { %v3106_v61 = vpop.f32.mrf.mxu1 }
 0x4d6   : > { %5539 = vpow2.f32 %v4718_v52  ;;  %v4719_v0 = vmul.f32 -1.442695, %v3172_v58  ;;  %v3173_v36 = vadd.f32 %v6647_v2, %v3141_v20  ;;  %v3142_v4 = vadd.f32 %v3106_v61, %v6605_v32 }
 0x4d7   : > { %v5528_v6 = vpop.eup %5527  ;;  %v3108_v7 = vpop.f32.mrf.mxu1  ;;  %v2955_v61 = vadd.f32 %v6634_v60, %v6593_v16 }
 0x4d8   : > { %v3245_v8 = vadd.f32 1.0, %v5528_v6  ;;  %5541 = vpow2.f32 %v4719_v0  ;;  %v4720_v39 = vmul.f32 -1.442695, %v3173_v36  ;;  %v3174_v30 = vadd.f32 %v6651_v5, %v3142_v4 }
 0x4d9   : > { %v5530_v41 = vpop.eup %5529  ;;  %v3143_v10 = vadd.f32 %v3108_v7, %v6607_v35  ;;  %v3110_v12 = vpop.f32.mrf.mxu1  ;;  %v2951_v35 = vadd.f32 %v6618_v49, %v6585_v11  ;;  %v2956_v7 = vadd.f32 %v6642_v34, %v6595_v19 }
 0x4da   : > { %5543 = vrcp.f32 %v3245_v8  ;;  %v3246_v62 = vadd.f32 1.0, %v5530_v41  ;;  %v4721_v32 = vmul.f32 -1.442695, %v3174_v30  ;;  %v3144_v1 = vadd.f32 %v3110_v12, %v2948_v28 }
 0x4db   : > { %v5532_v14 = vpop.eup %5531  ;;  %5545 = vpow2.f32 %v4720_v39  ;;  %v3175_v38 = vadd.f32 %v6647_v2, %v3143_v10  ;;  %v3114_v37 = vpop.f32.mrf.mxu1 }
 0x4dc   : > { %5547 = vrcp.f32 %v3246_v62  ;;  %v3247_v43 = vadd.f32 1.0, %v5532_v14  ;;  %v3176_v46 = vadd.f32 %v6651_v5, %v3144_v1  ;;  %v3145_v17 = vadd.f32 %v3114_v37, %v2949_v63 }
 0x4dd   : > { %v5534_v48 = vpop.eup %5533  ;;  %5549 = vpow2.f32 %v4721_v32  ;;  %v4722_v42 = vmul.f32 -1.442695, %v3175_v38  ;;  %v3116_v50 = vpop.f32.mrf.mxu1 }
 0x4de   : > { %5551 = vrcp.f32 %v3247_v43  ;;  %v3248_v51 = vadd.f32 1.0, %v5534_v48  ;;  %v4723_v21 = vmul.f32 -1.442695, %v3176_v46  ;;  %v3177_v23 = vadd.f32 %v6647_v2, %v3145_v17 }
 0x4df   : > { %v5536_v24 = vpop.eup %5535  ;;  %5553 = vpow2.f32 %v4722_v42  ;;  %v3146_v53 = vadd.f32 %v3116_v50, %v2950_v3  ;;  %v3118_v55 = vpop.f32.mrf.mxu1 }
 0x4e0   : > { %5555 = vrcp.f32 %v3248_v51  ;;  %v3249_v9 = vadd.f32 1.0, %v5536_v24  ;;  %v4724_v44 = vmul.f32 -1.442695, %v3177_v23  ;;  %v3147_v26 = vadd.f32 %v3118_v55, %v2951_v35 }
 0x4e1   : > { %v5538_v11 = vpop.eup %5537  ;;  %5557 = vpow2.f32 %v4723_v21  ;;  %v3178_v49 = vadd.f32 %v6651_v5, %v3146_v53  ;;  %v3120_v18 = vpop.f32.mrf.mxu1 }
 0x4e2   : > { %5559 = vrcp.f32 %v3249_v9  ;;  %v3250_v56 = vadd.f32 1.0, %v5538_v11  ;;  %v3179_v22 = vadd.f32 %v6647_v2, %v3147_v26  ;;  %v3148_v29 = vadd.f32 %v3120_v18, %v2952_v25 }
 0x4e3   : > { %v5540_v31 = vpop.eup %5539  ;;  %5561 = vpow2.f32 %v4724_v44  ;;  %v4725_v33 = vmul.f32 -1.442695, %v3178_v49  ;;  %v3124_v27 = vpop.f32.mrf.mxu1 }
 0x4e4   : > { %5563 = vrcp.f32 %v3250_v56  ;;  %v3251_v47 = vadd.f32 1.0, %v5540_v31  ;;  %v4726_v52 = vmul.f32 -1.442695, %v3179_v22  ;;  %v3180_v58 = vadd.f32 %v6651_v5, %v3148_v29 }
 0x4e5   : > { %v5542_v20 = vpop.eup %5541  ;;  %5565 = vpow2.f32 %v4725_v33  ;;  %v3149_v0 = vadd.f32 %v3124_v27, %v2953_v13  ;;  %v3126_v36 = vpop.f32.mrf.mxu1 }
 0x4e6   : > { %5567 = vrcp.f32 %v3251_v47  ;;  %v3252_v15 = vadd.f32 1.0, %v5542_v20  ;;  %v4727_v57 = vmul.f32 -1.442695, %v3180_v58  ;;  %v3150_v4 = vadd.f32 %v3126_v36, %v2954_v54 }
 0x4e7   : > { %v6708_v45 = vpop.eup %5543  ;;  %5569 = vpow2.f32 %v4726_v52  ;;  %v3181_v59 = vadd.f32 %v6647_v2, %v3149_v0  ;;  %v3128_v6 = vpop.f32.mrf.mxu1 }
 0x4e8   : > { %v5546_v28 = vpop.eup %5545  ;;  %5571 = vrcp.f32 %v3252_v15  ;;  %v3182_v16 = vadd.f32 %v6651_v5, %v3150_v4  ;;  %v3151_v60 = vadd.f32 %v3128_v6, %v2955_v61 }
 0x4e9   : > { %v6714_v8 = vpop.eup %5547  ;;  %v3253_v39 = vadd.f32 1.0, %v5546_v28  ;;  %5573 = vpow2.f32 %v4727_v57  ;;  %v4728_v30 = vmul.f32 -1.442695, %v3181_v59  ;;  %v3130_v41 = vpop.f32.mrf.mxu1 }
 0x4ea   : > { %v5550_v63 = vpop.eup %5549  ;;  %v4729_v10 = vmul.f32 -1.442695, %v3182_v16  ;;  %v3183_v12 = vadd.f32 %v6647_v2, %v3151_v60  ;;  %v3152_v62 = vadd.f32 %v3130_v41, %v2956_v7  ;;  %v5236_v16 = vld [vmem:[%s7031_s7] sm:$0xff]   ;;  %v5237_v60 = vld [vmem:[%s7031_s7 + $0x8] sm:$0xff]  }
 0x4eb   : > { %v6717_v32 = vpop.eup %5551  ;;  %5575 = vrcp.f32 %v3253_v39  ;;  %v3254_v1 = vadd.f32 1.0, %v5550_v63  ;;  %v5251_v39 = vld [vmem:[%s7032_s8 + $0x30] sm:$0xff]   ;;  %v5255_v41 = vld [vmem:[%s7032_s8 + $0x20] sm:$0xff]   ;;  %v5257_v63 = vld [vmem:[%s7032_s8 + $0x18] sm:$0xff]  }
 0x4ec   : > { %v5554_v19 = vpop.eup %5553  ;;  %5577 = vpow2.f32 %v4728_v30  ;;  %v4730_v34 = vmul.f32 -1.442695, %v3183_v12  ;;  %v3184_v14 = vadd.f32 %v6651_v5, %v3152_v62  ;;  %v3310_v38 = vpack.c.bf16 %v6717_v32, %v6708_v45  ;;  %v5249_v45 = vld [vmem:[%s7032_s8 + $0x38] sm:$0xff]   ;;  %v5253_v30 = vld [vmem:[%s7032_s8 + $0x28] sm:$0xff]   ;;  %v5263_v62 = vld [vmem:[%s7032_s8] sm:$0xff]  }
 0x4ed   : > { %v6722_v37 = vpop.eup %5555  ;;  %5579 = vrcp.f32 %v3254_v1  ;;  %v3255_v43 = vadd.f32 1.0, %v5554_v19  ;;  %v5261_v12 = vld [vmem:[%s7032_s8 + $0x8] sm:$0xff]   ;;  %v5247_v1 = vld [vmem:[%s7032_s8 + $0x98] sm:$0xff]   ;;  %v5267_v19 = vld [vmem:[%s7032_s8 + $0x40] sm:$0xff]  }
 0x4ee   : > { %v5558_v46 = vpop.eup %5557  ;;  %5581 = vpow2.f32 %v4729_v10  ;;  %v4731_v2 = vmul.f32 -1.442695, %v3184_v14  ;;  %v3311_v17 = vpack.c.bf16 %v6722_v37, %v6714_v8  ;;  %v5238_v8 = vld [vmem:[%s7031_s7 + $0x10] ss:$0 sps:$4 sm:$0xff]   ;;  %v5265_v32 = vld [vmem:[%s7032_s8 + $0x48] sm:$0xff]   ;;  %3541 = vmatpush2.bf16.msra.mxu1 %v5247_v1  ;;  %v5296_v1 = vld [vmem:[%s7034_s10] sm:$0xff]  }
 0x4ef   : > { %v5560_v48 = vpop.eup %5559  ;;  %5583 = vrcp.f32 %v3255_v43  ;;  %v3256_v3 = vadd.f32 1.0, %v5558_v46  ;;  %v5259_v10 = vld [vmem:[%s7032_s8 + $0x10] sm:$0xff]   ;;  %3542 = vmatprep.subr.bf16.mxu1 %v5681_v40  ;;  %v5269_v43 = vld [vmem:[%s7032_s8 + $0x128] sm:$0xff]  }
 0x4f0   : > { %v5562_v35 = vpop.eup %5561  ;;  %5585 = vpow2.f32 %v4730_v34  ;;  %v5248_v34 = vld [vmem:[%s7032_s8 + $0x90] sm:$0xff]  }
 0x4f1   : > { %v5564_v42 = vpop.eup %5563  ;;  %5587 = vrcp.f32 %v3256_v3  ;;  %v3257_v50 = vadd.f32 1.0, %v5562_v35  ;;  %v5250_v3 = vld [vmem:[%s7032_s8 + $0xd8] sm:$0xff]   ;;  %v5271_v35 = vld [vmem:[%s7032_s8 + $0x120] sm:$0xff]  }
 0x4f2   : > { %v5566_v5 = vpop.eup %5565  ;;  %5589 = vpow2.f32 %v4731_v2  ;;  %3543 = vmatpush2.bf16.msra.mxu1 %v5248_v34 }
 0x4f3   : > { %v5568_v51 = vpop.eup %5567  ;;  %v3258_v23 = vadd.f32 1.0, %v5566_v5  ;;  %5591 = vrcp.f32 %v3257_v50  ;;  %3741 = vmatprep.subr.bf16.mxu1 %v5681_v40 }
 0x4f4   : > { %v5570_v21 = vpop.eup %5569  ;;  %v3312_v24 = vpack.c.bf16 %v5568_v51, %v5560_v48  ;;  %v5252_v51 = vld [vmem:[%s7032_s8 + $0xd0] sm:$0xff]  }
 0x4f5   : > { %v5572_v25 = vpop.eup %5571  ;;  %v3259_v53 = vadd.f32 1.0, %v5570_v21 }
 0x4f6   : > { %v5574_v55 = vpop.eup %5573  ;;  %v3313_v9 = vpack.c.bf16 %v5572_v25, %v5564_v42 }
 0x4f7   : > { %5593 = vrcp.f32 %v3259_v53  ;;  %v3260_v44 = vadd.f32 1.0, %v5574_v55  ;;  %v5254_v53 = vld [vmem:[%s7032_s8 + $0xc8] sm:$0xff]   ;;  %v5275_v55 = vld [vmem:[%s7032_s8 + $0x110] sm:$0xff]  }
 0x4f8   : > { %v5576_v26 = vpop.eup %5575  ;;  %5595 = vrcp.f32 %v3258_v23  ;;  %v5273_v23 = vld [vmem:[%s7032_s8 + $0x118] sm:$0xff]  }
 0x4f9   : > { %v5578_v11 = vpop.eup %5577  ;;  %5597 = vrcp.f32 %v3260_v44 }
 0x4fa   : > { %v5580_v49 = vpop.eup %5579  ;;  %v3261_v56 = vadd.f32 1.0, %v5578_v11  ;;  %v5256_v11 = vld [vmem:[%s7032_s8 + $0xc0] sm:$0xff]  }
 0x4fb   : > { %v5582_v18 = vpop.eup %5581 }
 0x4fc   : > { %v5584_v22 = vpop.eup %5583  ;;  %v3262_v31 = vadd.f32 1.0, %v5582_v18  ;;  %5599 = vrcp.f32 %v3261_v56 }
 0x4fd   : > { %v5586_v29 = vpop.eup %5585  ;;  %v3314_v13 = vpack.c.bf16 %v5584_v22, %v5576_v26  ;;  %v5258_v22 = vld [vmem:[%s7032_s8 + $0xb8] sm:$0xff]  }
 0x4fe   : > { %v5588_v54 = vpop.eup %5587  ;;  %v3263_v33 = vadd.f32 1.0, %v5586_v29  ;;  %v5279_v29 = vld [vmem:[%s7032_s8 + $0x100] sm:$0xff]  }
 0x4ff   : > { %v5590_v27 = vpop.eup %5589  ;;  %v3315_v47 = vpack.c.bf16 %v5588_v54, %v5580_v49  ;;  %v5277_v49 = vld [vmem:[%s7032_s8 + $0x108] sm:$0xff]  }
 0x500   : > { %5601 = vrcp.f32 %v3263_v33  ;;  %v3264_v52 = vadd.f32 1.0, %v5590_v27  ;;  %v5592_v58 = vpop.eup %5591  ;;  %v5262_v54 = vld [vmem:[%s7032_s8 + $0xa8] sm:$0xff]   ;;  %v5283_v33 = vld [vmem:[%s7032_s8 + $0xf0] sm:$0xff]   ;;  %v5264_v27 = vld [vmem:[%s7032_s8 + $0xa0] sm:$0xff]  }
 0x501   : > { %5603 = vrcp.f32 %v3262_v31  ;;  %v5260_v31 = vld [vmem:[%s7032_s8 + $0xb0] sm:$0xff]  }
 0x502   : > { %5605 = vrcp.f32 %v3264_v52  ;;  %v5266_v52 = vld [vmem:[%s7032_s8 + $0xe8] sm:$0xff]  }
 0x504   : > { %v5594_v20 = vpop.eup %5593 }
 0x505   : > { %v5596_v61 = vpop.eup %5595  ;;  %v3316_v0 = vpack.c.bf16 %v5594_v20, %v5592_v58  ;;  %v5287_v58 = vld [vmem:[%s7032_s8 + $0x130] sm:$0xff]  }
 0x506   : > { %v5598_v36 = vpop.eup %5597 }
 0x507   : > { %v3317_v15 = vpack.c.bf16 %v5598_v36, %v5596_v61  ;;  %v5268_v61 = vld [vmem:[%s7032_s8 + $0xe0] sm:$0xff]  }
 0x509   : > { %v5600_v57 = vpop.eup %5599 }
 0x50d   : > { %v5602_v4 = vpop.eup %5601 }
 0x50e   : > { %v5604_v59 = vpop.eup %5603  ;;  %v3318_v6 = vpack.c.bf16 %v5602_v4, %v5600_v57  ;;  %v5272_v57 = vld [vmem:[%s7032_s8 + $0x170] sm:$0xff]   ;;  %v5274_v4 = vld [vmem:[%s7032_s8 + $0x168] sm:$0xff]  }
 0x50f   : > { %v5606_v28 = vpop.eup %5605 }
 0x510   : > { %v3319_v7 = vpack.c.bf16 %v5606_v28, %v5604_v59  ;;  %v5276_v59 = vld [vmem:[%s7032_s8 + $0x160] sm:$0xff]   ;;  %v5280_v28 = vld [vmem:[%s7032_s8 + $0x150] sm:$0xff]  }
 0x512   : > { %3349 = vmatprep.subr.bf16.mxu0 %v3319_v7  ;;  %v5282_v7 = vld [vmem:[%s7032_s8 + $0x148] sm:$0xff]  }
 0x513   : > { %3350 = vmatpush1.bf16.msra.mxu0 %v3318_v6  ;;  %v5278_v6 = vld [vmem:[%s7032_s8 + $0x158] sm:$0xff]  }
 0x514   : > { %3351 = vmatprep.subr.bf16.mxu0 %v3317_v15 }
 0x517   : > { %3352 = vmatpush1.bf16.msra.mxu0 %v3316_v0  ;;  %v5270_v0 = vld [vmem:[%s7032_s8 + $0x178] sm:$0xff]  }
 0x518   : > { %3353 = vmatprep.subr.bf16.mxu0 %v3315_v47  ;;  %v5285_v47 = vld [vmem:[%s7032_s8 + $0x138] sm:$0xff]  }
 0x51b   : > { %3354 = vmatpush1.bf16.msra.mxu0 %v3314_v13  ;;  %v5281_v13 = vld [vmem:[%s7032_s8 + $0xf8] sm:$0xff]  }
 0x51c   : > { %3355 = vmatprep.subr.bf16.mxu0 %v3313_v9 }
 0x51f   : > { %3356 = vmatpush1.bf16.msra.mxu0 %v3312_v24 }
 0x520   : > { %3357 = vmatprep.subr.bf16.mxu0 %v3311_v17 }
 0x523   : > { %3358 = vmatpush1.bf16.msra.mxu0 %v3310_v38 }
 0x524   : > { %3615 = vmatprep.subr.bf16.mxu0 %v5681_v40 }
 0x526   : > { %4735 = vmatmul.mubr.msk.bf16.vlgmr.msra.gmra.mxu0 %vm3333_vm6, %v5236_v16  ;;  %v5284_v16 = vld [vmem:[%s7032_s8 + $0x140] sm:$0xff]  }
 0x527   : > { %3385 = vmatprep.mubr.bf16.mxu0 %v5681_v40  ;;  %3616 = vmatpush1.bf16.msra.mxu0 %v5249_v45 }
 0x528   : > { %3617 = vmatprep.subr.bf16.mxu0 %v5681_v40 }
 0x52b   : > { %3618 = vmatpush1.bf16.msra.mxu0 %v5251_v39  ;;  %v5289_v39 = vld [vmem:[%s7034_s10 + $0x38] ss:$0 sps:$4 sm:$0xff]  }
 0x52c   : > { %3619 = vmatprep.subr.bf16.mxu0 %v5681_v40 }
 0x52e   : > { %4736 = vmatmul.mubr.msk.bf16.gmra.mxu0 %vm3333_vm6, %v5237_v60  ;;  %v5286_v60 = vld [vmem:[%s7032_s8 + $0x188] sm:$0xff]  }
 0x52f   : > { %3395 = vmatprep.mubr.bf16.mxu0 %v5681_v40  ;;  %3620 = vmatpush1.bf16.msra.mxu0 %v5253_v30  ;;  %v5682_v30 = vmov 0.0  }
 0x530   : > { %3621 = vmatprep.subr.bf16.mxu0 %v5681_v40 }
 0x533   : > { %3622 = vmatpush1.bf16.msra.mxu0 %v5255_v41  ;;  %v4123_v41 = vsel %vm1465_vm1, %v5289_v39, 0 }
 0x534   : > { %3623 = vmatprep.subr.bf16.mxu0 %v5681_v40 }
 0x536   : > { %4737 = vmatmul.mubr.msk.bf16.gmra.mxu0 %vm3333_vm6, %v5238_v8  ;;  %v5288_v8 = vld [vmem:[%s7032_s8 + $0x180] sm:$0xff]  }
 0x537   : > { %3624 = vmatpush1.bf16.msra.mxu0 %v5257_v63  ;;  %v5291_v63 = vld [vmem:[%s7034_s10 + $0x28] sm:$0xff]  }
 0x538   : > { %3625 = vmatprep.subr.bf16.mxu0 %v5681_v40 }
 0x53b   : > { %3626 = vmatpush1.bf16.msra.mxu0 %v5259_v10  ;;  %v5292_v10 = vld [vmem:[%s7034_s10 + $0x20] sm:$0xff]  }
 0x53c   : > { %3627 = vmatprep.subr.bf16.mxu0 %v5681_v40 }
 0x53f   : > { %3628 = vmatpush1.bf16.msra.mxu0 %v5261_v12  ;;  %v5293_v12 = vld [vmem:[%s7034_s10 + $0x18] sm:$0xff]  }
 0x540   : > { %3629 = vmatprep.subr.bf16.mxu0 %v5681_v40 }
 0x543   : > { %3630 = vmatpush1.bf16.msra.mxu0 %v5263_v62  ;;  %v5294_v62 = vld [vmem:[%s7034_s10 + $0x10] sm:$0xff]  }
 0x544   : > { %3643 = vmatprep.subr.bf16.mxu0 %v5681_v40 }
 0x547   : > { %3644 = vmatpush2.bf16.msra.mxu0 %v5265_v32  ;;  %v5295_v32 = vld [vmem:[%s7034_s10 + $0x8] sm:$0xff]  }
 0x548   : > { %3645 = vmatprep.subr.bf16.mxu0 %v5681_v40 }
 0x54b   : > { %3646 = vmatpush2.bf16.msra.mxu0 %v5267_v19 }
 0x54c   : > { %3868 = vmatprep.subr.bf16.mxu0 %v5681_v40 }
 0x5e6   : > { %v3377_v14 = vpop.f32.mrf.mxu0 }
 0x5e7   : > { %v3404_v46 = vpack.c.bf16 %v3377_v14, %v3377_v14 }
 0x5e8   : > { %v3379_v38 = vpop.f32.mrf.mxu0 }
 0x5e9   : > { %v3405_v37 = vpack.c.bf16 %v3379_v38, %v3379_v38 }
 0x5ea   : > { %v3381_v2 = vpop.f32.mrf.mxu0 }
 0x5eb   : > { %4779 = vmatprep.mubr.msk.bf16.mxu0 %vm758_vm0, %v3405_v37  ;;  %v3426_v42 = vpack.c.bf16 %v3381_v2, %v3381_v2 }
 0x5ec   : > { %v3383_v17 = vpop.f32.mrf.mxu0  ;;  %3648 = vmatmul.mubr.bf16.vlgmr.msra.gmra.mxu0 %v3404_v46 }
 0x5ed   : > { %v3427_v48 = vpack.c.bf16 %v3383_v17, %v3383_v17  ;;  %3869 = vmatpush1.bf16.msra.mxu0 %v5269_v43 }
 0x5ee   : > { %v6799_v5 = vpop.f32.mrf.mxu0  ;;  %3870 = vmatprep.subr.bf16.mxu0 %v5681_v40 }
 0x5ef   : > { %4768 = vmatprep.mubr.msk.bf16.mxu1 %vm758_vm0, %v3427_v48  ;;  %v3655_v15 = vpack.c.bf16 %v6799_v5, %v6799_v5 }
 0x5f0   : > { %3545 = vmatmul.mubr.bf16.vlgmr.msra.gmra.mxu1 %v3426_v42  ;;  %v3389_v50 = vpop.f32.mrf.mxu0 }
 0x5f1   : > { %3742 = vmatpush1.bf16.msra.mxu1 %v5250_v3  ;;  %v3656_v21 = vpack.c.bf16 %v3389_v50, %v3389_v50  ;;  %3871 = vmatpush1.bf16.msra.mxu0 %v5271_v35 }
 0x5f2   : > { %3743 = vmatprep.subr.bf16.mxu1 %v5681_v40  ;;  %3872 = vmatprep.subr.bf16.mxu0 %v5681_v40  ;;  %v3391_v24 = vpop.f32.mrf.mxu0 }
 0x5f3   : > { %4810 = vmatprep.mubr.msk.bf16.mxu1 %vm758_vm0, %v3656_v21  ;;  %v3782_v20 = vpack.c.bf16 %v3391_v24, %v3391_v24 }
 0x5f4   : > { %v3393_v25 = vpop.f32.mrf.mxu0 }
 0x5f5   : > { %3744 = vmatpush1.bf16.msra.mxu1 %v5252_v51  ;;  %3873 = vmatpush1.bf16.msra.mxu0 %v5273_v23  ;;  %v3783_v9 = vpack.c.bf16 %v3393_v25, %v3393_v25 }
 0x5f6   : > { %3745 = vmatprep.subr.bf16.mxu1 %v5681_v40  ;;  %3874 = vmatprep.subr.bf16.mxu0 %v5681_v40  ;;  %v6820_v44 = vpop.f32.mrf.mxu0 }
 0x5f7   : > { %4841 = vmatprep.mubr.msk.bf16.mxu0 %vm758_vm0, %v3783_v9  ;;  %v3909_v45 = vpack.c.bf16 %v6820_v44, %v6820_v44 }
 0x5f8   : > { %v3399_v26 = vpop.f32.mrf.mxu0 }
 0x5f9   : > { %3746 = vmatpush1.bf16.msra.mxu1 %v5254_v53  ;;  %3875 = vmatpush1.bf16.msra.mxu0 %v5275_v55  ;;  %v3910_v36 = vpack.c.bf16 %v3399_v26, %v3399_v26  ;;  %v4873_v53 = vld [vmem:[%s7033_s9] ss:$0 sm:$0xff] }
 0x5fa   : > { %3747 = vmatprep.subr.bf16.mxu1 %v5681_v40  ;;  %3876 = vmatprep.subr.bf16.mxu0 %v5681_v40  ;;  %v3401_v18 = vpop.f32.mrf.mxu0 }
 0x5fc   : > { %v3402_v56 = vpop.f32.mrf.mxu0 }
 0x5fd   : > { %3748 = vmatpush1.bf16.msra.mxu1 %v5256_v11  ;;  %3877 = vmatpush1.bf16.msra.mxu0 %v5277_v49 }
 0x5fe   : > { %3749 = vmatprep.subr.bf16.mxu1 %v5681_v40  ;;  %3878 = vmatprep.subr.bf16.mxu0 %v5681_v40 }
 0x601   : > { %3750 = vmatpush1.bf16.msra.mxu1 %v5258_v22  ;;  %3879 = vmatpush1.bf16.msra.mxu0 %v5279_v29 }
 0x602   : > { %3751 = vmatprep.subr.bf16.mxu1 %v5681_v40  ;;  %3880 = vmatprep.subr.bf16.mxu0 %v5681_v40 }
 0x605   : > { %3752 = vmatpush1.bf16.msra.mxu1 %v5260_v31  ;;  %3881 = vmatpush1.bf16.msra.mxu0 %v5281_v13  ;;  %v5297_v31 = vld [vmem:[%s7036_s12 + $0x28] ss:$0 sps:$4 sm:$0x33]  }
 0x606   : > { %3753 = vmatprep.subr.bf16.mxu1 %v5681_v40  ;;  %3882 = vmatprep.subr.bf16.mxu0 %v5681_v40  ;;  %v4227_v13 = vsel %vm2316_vm4, %v5297_v31, 0 }
 0x609   : > { %3754 = vmatpush1.bf16.msra.mxu1 %v5262_v54  ;;  %3883 = vmatpush1.bf16.msra.mxu0 %v5283_v33  ;;  %v5298_v54 = vld [vmem:[%s7036_s12 + $0x20] sm:$0xff]   ;;  %v5299_v33 = vld [vmem:[%s7036_s12 + $0x18] sm:$0xff]  }
 0x60a   : > { %3755 = vmatprep.subr.bf16.mxu1 %v5681_v40  ;;  %3896 = vmatprep.subr.bf16.mxu0 %v5681_v40 }
 0x60d   : > { %3756 = vmatpush1.bf16.msra.mxu1 %v5264_v27  ;;  %3897 = vmatpush2.bf16.msra.mxu0 %v5285_v47  ;;  %v5300_v27 = vld [vmem:[%s7036_s12 + $0x10] sm:$0xff]   ;;  %v5301_v47 = vld [vmem:[%s7036_s12 + $0x8] sm:$0xff]  }
 0x60e   : > { %3769 = vmatprep.subr.bf16.mxu1 %v5681_v40  ;;  %3898 = vmatprep.subr.bf16.mxu0 %v5681_v40 }
 0x611   : > { %3770 = vmatpush2.bf16.msra.mxu1 %v5266_v52  ;;  %3899 = vmatpush2.bf16.msra.mxu0 %v5287_v58  ;;  %v5302_v52 = vld [vmem:[%s7036_s12] sm:$0xff]  }
 0x612   : > { %3771 = vmatprep.subr.bf16.mxu1 %v5681_v40  ;;  %4915 = vmatprep.subr.bf16.mxu0 %v5682_v30  ;;  %v4875_v58 = vld [vmem:[%s7035_s11] ss:$0 sm:$0xff] }
 0x614   : > { %3901 = vmatmul.mubr.bf16.vlgmr.msra.gmra.mxu0 %v3782_v20 }
 0x615   : > { %3772 = vmatpush2.bf16.msra.mxu1 %v5268_v61  ;;  %4916 = vmatpush3.bf16.msra.mxu0 %v4123_v41 }
 0x616   : > { %3995 = vmatprep.subr.bf16.mxu1 %v5681_v40  ;;  %4917 = vmatprep.subr.bf16.mxu0 %v5682_v30 }
 0x617   : > { %4931 = vmatprep.mubr.msk.bf16.mxu0 %vm5683_vm7, %v5682_v30 }
 0x618   : > { %3774 = vmatmul.mubr.bf16.vlgmr.msra.gmra.mxu1 %v3655_v15 }
 0x619   : > { %3996 = vmatpush1.bf16.msra.mxu1 %v5270_v0  ;;  %4872 = vmatprep.mubr.msk.bf16.mxu1 %vm758_vm0, %v3910_v36 }
 0x61a   : > { %3997 = vmatprep.subr.bf16.mxu1 %v5681_v40 }
 0x61d   : > { %3998 = vmatpush1.bf16.msra.mxu1 %v5272_v57 }
 0x61e   : > { %3999 = vmatprep.subr.bf16.mxu1 %v5681_v40 }
 0x621   : > { %4000 = vmatpush1.bf16.msra.mxu1 %v5274_v4 }
 0x622   : > { %4001 = vmatprep.subr.bf16.mxu1 %v5681_v40 }
 0x625   : > { %4002 = vmatpush1.bf16.msra.mxu1 %v5276_v59 }
 0x626   : > { %4003 = vmatprep.subr.bf16.mxu1 %v5681_v40 }
 0x629   : > { %4004 = vmatpush1.bf16.msra.mxu1 %v5278_v6 }
 0x62a   : > { %4005 = vmatprep.subr.bf16.mxu1 %v5681_v40 }
 0x62d   : > { %4006 = vmatpush1.bf16.msra.mxu1 %v5280_v28 }
 0x62e   : > { %4007 = vmatprep.subr.bf16.mxu1 %v5681_v40 }
 0x631   : > { %4008 = vmatpush1.bf16.msra.mxu1 %v5282_v7  ;;  %v4886_v7 = vld [vmem:[%s7037_s13] ss:$0 sm:$0xff] }
 0x632   : > { %4009 = vmatprep.subr.bf16.mxu1 %v5681_v40 }
 0x635   : > { %4010 = vmatpush1.bf16.msra.mxu1 %v5284_v16 }
 0x636   : > { %4023 = vmatprep.subr.bf16.mxu1 %v5681_v40 }
 0x639   : > { %4024 = vmatpush2.bf16.msra.mxu1 %v5286_v60 }
 0x63a   : > { %4025 = vmatprep.subr.bf16.mxu1 %v5681_v40  ;;  %v5290_v40 = vld [vmem:[%s7034_s10 + $0x30] sm:$0xff]  }
 0x63b   : > { %4918 = vmatpush3.bf16.msra.mxu0 %v5290_v40 }
 0x63c   : > { %4919 = vmatprep.subr.bf16.mxu0 %v5682_v30 }
 0x63d   : > { %4026 = vmatpush2.bf16.msra.mxu1 %v5288_v8 }
 0x63e   : > { %4935 = vmatprep.subr.bf16.mxu1 %v5682_v30 }
 0x63f   : > { %4920 = vmatpush3.bf16.msra.mxu0 %v5291_v63 }
 0x640   : > { %4028 = vmatmul.mubr.bf16.vlgmr.msra.gmra.mxu1 %v3909_v45  ;;  %4921 = vmatprep.subr.bf16.mxu0 %v5682_v30 }
 0x641   : > { %4947 = vmatprep.mubr.msk.bf16.mxu1 %vm5683_vm7, %v5682_v30  ;;  %4936 = vmatpush3.bf16.msra.mxu1 %v4227_v13 }
 0x642   : > { %4937 = vmatprep.subr.bf16.mxu1 %v5682_v30 }
 0x643   : > { %4922 = vmatpush3.bf16.msra.mxu0 %v5292_v10 }
 0x644   : > { %4923 = vmatprep.subr.bf16.mxu0 %v5682_v30 }
 0x645   : > { %4938 = vmatpush3.bf16.msra.mxu1 %v5298_v54 }
 0x646   : > { %4939 = vmatprep.subr.bf16.mxu1 %v5682_v30 }
 0x647   : > { %4924 = vmatpush3.bf16.msra.mxu0 %v5293_v12 }
 0x648   : > { %4925 = vmatprep.subr.bf16.mxu0 %v5682_v30 }
 0x649   : > { %4940 = vmatpush3.bf16.msra.mxu1 %v5299_v33 }
 0x64a   : > { %4941 = vmatprep.subr.bf16.mxu1 %v5682_v30 }
 0x64b   : > { %4926 = vmatpush3.bf16.msra.mxu0 %v5294_v62 }
 0x64c   : > { %4927 = vmatprep.subr.bf16.mxu0 %v5682_v30 }
 0x64d   : > { %4942 = vmatpush3.bf16.msra.mxu1 %v5300_v27 }
 0x64e   : > { %4943 = vmatprep.subr.bf16.mxu1 %v5682_v30 }
 0x64f   : > { %4928 = vmatpush3.bf16.msra.mxu0 %v5295_v32 }
 0x650   : > { %4929 = vmatprep.subr.bf16.mxu0 %v5682_v30 }
 0x651   : > { %4944 = vmatpush3.bf16.msra.mxu1 %v5301_v47 }
 0x652   : > { %4945 = vmatprep.subr.bf16.mxu1 %v5682_v30 }
 0x653   : > { %4930 = vmatpush3.bf16.msra.mxu0 %v5296_v1 }
 0x655   : > { %4946 = vmatpush3.bf16.msra.mxu1 %v5302_v52 }
 0x6ac   : > { %v3649_v19 = vpop.f32.mrf.mxu0 }
 0x6ae   : > { %v3651_v34 = vpop.f32.mrf.mxu0 }
 0x6b0   : > { %v3546_v14 = vpop.f32.mrf.mxu1  ;;  %v3652_v38 = vpop.f32.mrf.mxu0 }
 0x6b1   : > { %v3650_v37 = vadd.f32 %v3649_v19, %v3546_v14 }
 0x6b2   : > { %v3548_v43 = vpop.f32.mrf.mxu1  ;;  %v3653_v46 = vpop.f32.mrf.mxu0 }
 0x6b4   : > { %v3549_v2 = vpop.f32.mrf.mxu1 }
 0x6b6   : > { %v3550_v17 = vpop.f32.mrf.mxu1 }
 0x6d4   : > { %v3902_v48 = vpop.f32.mrf.mxu0 }
 0x6d6   : > { %v3904_v3 = vpop.f32.mrf.mxu0 }
 0x6d8   : > { %v3775_v35 = vpop.f32.mrf.mxu1  ;;  %v3905_v42 = vpop.f32.mrf.mxu0 }
 0x6d9   : > { %v3781_v23 = vadd.f32 %v3775_v35, %v3650_v37 }
 0x6da   : > { %v3777_v5 = vpop.f32.mrf.mxu1  ;;  %v3906_v50 = vpop.f32.mrf.mxu0 }
 0x6db   : > { %v3908_v24 = vadd.f32 %v3902_v48, %v3781_v23 }
 0x6dc   : > { %v3778_v51 = vpop.f32.mrf.mxu1 }
 0x6de   : > { %v3779_v21 = vpop.f32.mrf.mxu1 }
 0x700   : > { %v4029_v25 = vpop.f32.mrf.mxu1 }
 0x701   : > { %v4035_v55 = vadd.f32 %v4029_v25, %v3908_v24 }
 0x702   : > { %v4031_v9 = vpop.f32.mrf.mxu1 }
 0x703   : > { %v4043_v44 = vadd.f32 %v4873_v53, %v4035_v55 }
 0x704   : > { %v4032_v26 = vpop.f32.mrf.mxu1 }
 0x705   : > { %v4874_v11 = vmul.f32 -1.442695, %v4043_v44 }
 0x706   : > { %v4033_v49 = vpop.f32.mrf.mxu1 }
 0x707   : > { %5607 = vpow2.f32 %v4874_v11 }
 0x714   : > { %v5608_v18 = vpop.eup %5607 }
 0x715   : > { %v4047_v56 = vadd.f32 1.0, %v5608_v18 }
 0x717   : > { %5609 = vrcp.f32 %v4047_v56 }
 0x724   : > { %v5610_v22 = vpop.eup %5609 }
 0x725   : > { %v4050_v29 = vpack.c.bf16 %v5610_v22, %v5610_v22 }
 0x727   : > { %4932 = vmatmul.mubr.msk.bf16.vlgmr.msra.gmra.mxu0 %vm4118_vm8, %v4050_v29 }
 0x7e7   : > { %v4159_v20 = vpop.f32.mrf.mxu0 }
 0x7e8   : > { %v4160_v61 = vadd.f32 %v4875_v58, %v4159_v20 }
 0x7e9   : > { %v4933_v0 = vpop.f32.mrf.mxu0 }
 0x7ea   : > { %v4885_v36 = vmul.f32 -1.442695, %v4160_v61 }
 0x7eb   : > { %v4162_v15 = vpop.f32.mrf.mxu0 }
 0x7ec   : > { %5611 = vpow2.f32 %v4885_v36 }
 0x7ed   : > { %v4934_v57 = vpop.f32.mrf.mxu0 }
 0x7f9   : > { %v5612_v4 = vpop.eup %5611 }
 0x7fa   : > { %v4168_v59 = vadd.f32 1.0, %v5612_v4 }
 0x7fc   : > { %5613 = vrcp.f32 %v4168_v59 }
 0x809   : > { %v5614_v6 = vpop.eup %5613 }
 0x80a   : > { %v4171_v28 = vpack.c.bf16 %v5614_v6, %v5614_v6 }
 0x80c   : > { %4948 = vmatmul.mubr.msk.bf16.vlgmr.msra.gmra.mxu1 %vm2300_vm5, %v4171_v28 }
 0x8cc   : > { %v4263_v16 = vpop.f32.mrf.mxu1 }
 0x8cd   : > { %v4264_v60 = vadd.f32 %v4886_v7, %v4263_v16 }
 0x8ce   : > { %v4949_v8 = vpop.f32.mrf.mxu1 }
 0x8cf   : > { %4269 = vmax.xlane.f32.xlu0 %v4264_v60 }
 0x8d0   : > { %v4266_v45 = vpop.f32.mrf.mxu1 }
 0x8d2   : > { %v4950_v39 = vpop.f32.mrf.mxu1 }
 0x958   : > { %v4270_v30 = vpop.xlane.xlu0 %4269 }
 0x959   : > { %v4271_v41 = vsub.f32 %v4264_v60, %v4270_v30 }
 0x95b   : > { %v4272_v40 = vmul.f32 1.442695, %v4271_v41 }
 0x95d   : > { %5615 = vpow2.f32 %v4272_v40 }
 0x96a   : > { %v5616_v63 = vpop.eup %5615 }
 0x96b   : > { %4274 = vadd.xlane.f32.xlu0 %v5616_v63 }
 0x9f4   : > { %v4275_v10 = vpop.xlane.xlu0 %4274 }
 0x9f5   : > { %5617 = vlog2.f32 %v4275_v10 }
 0xa02   : > { %v5618_v12 = vpop.eup %5617 }
 0xa03   : > { %v4277_v62 = vmul.f32 0.6931472, %v5618_v12 }
 0xa05   : > { %v4278_v32 = vsub.f32 %v4271_v41, %v4277_v62 }
 0xa07   : > { %4279 = vst [vmem:[%s463_s28] sm:$0xff] %v4278_v32 }
 0xa08   : > { %5632 = shalt.err (!%p5629_p3)
}
 0xa09   : > { %s5633_s22 = scalar_lea.hbm %s4292_s21, 128  ;;  %s5637_s28 = scalar_lea.hbm %s7038_s14, 256 }
 0xa0a   : > { %p5634_p4 = scmp.ne.s32.totalorder %s4292_s21, %s5633_s22  ;;  %p5638_p9 = scmp.lt.s32.totalorder %s4292_s21, %s7038_s14 }
 0xa0b   : > { %p5639_p10 = scmp.lt.s32.totalorder %s5637_s28, %s5633_s22 }
 0xa0c   : > { %p5635_p7 = pnand %p5634_p4, %p5798_p5 }
 0xa0d   : > { %p5640_p11 = por %p5639_p10, %p5638_p9 }
 0xa0e   : > { %p5636_p8 = pneg %p5635_p7 }
 0xa10   : > { %p5641_p12 = pnand %p5640_p11, %p5636_p8 }
 0xa12   : > { %5644 = shalt.err (!%p5641_p12)
}
 0xa13   : > { %4951 = dma.vmem_to_hbm [thread:$0]  (%p5798_p5), %s4295_s18, 128, %s4292_s21, %s4281_s15  }
 0xa14 PF: > { %p4957_p13 = scmp.ge.s32.totalorder %s5679_s16, 2  ;;  %s4306_s19 = sand.u32 1, %s5667_s29  }
 0xa15   : > { %s4307_s26 = scalar_lea.sflag [#allocation3], %s4306_s19 }
 0xa16   : > { %p4954_p0 = pnand %p4957_p13, %p5802_p6 }
 0xa18   : > { %p4955_p1 = pneg %p4954_p0 }
 0xa1a   : > { %5662 = dma.done.wait (%p4955_p1), %s4307_s26, 128  }
 0xa1b   : > { %5664 = vsyncadd (%p4955_p1), %s4307_s26, 4294967168  ;;  %s7052_s16 = sld [smem:[#allocation6_spill]]  ;;  %s7055_s29 = smov %s5671_s30 }
 0xa1c   : > { %s7053_s17 = sld [smem:[#allocation5_spill]] }
 0xa1d   : > { %s7054_s15 = sld [smem:[#allocation7_spill]] }
 0xa21   : > { %p24_p2 = scmp.ge.s32.totalorder %s7052_s16, 4  }
 0xa22   : > { %s7056_s30 = smov %s7053_s17 }
 0xa23   :  { %26 = sbr.rel (!%p24_p2) target bundleno = 5 (0x5), region = 119 }
 0xa28   :  { %4312 = vsyncpa [#allocation3], 1 }
 0xa29   :  { %4314 = vsyncpa [#allocation3 + $0x1], 1 }

</bundles_post_ra>
